<compile_context>
chip_gen: v6e
topology: v6e:2x2x1
jax: 0.10.0
libtpu: 0.0.40
codegen_flags: <defaults>
</compile_context>

<pallas_src>
import functools

import numpy as np
import jax
import jax.numpy as jnp
from jax.experimental import pallas as pl

# ---------------- model dims (small, deterministic) ----------------
N = 2            # batch
C = 4            # input channels
H = W = 16       # spatial
HIDDEN = 32      # encoder feature dim
PROJ_DIM = 16    # projection head output dim
NUM_CLASSES = 8  # classification head output dim

_LANE = 128      # lane-dense output slab width
_OUT_ROWS = 8    # pad batch rows to a full sublane tile -> single unmasked store
_USED = HIDDEN + PROJ_DIM + NUM_CLASSES
assert _USED <= _LANE, "output slab must hold [h | z | ly] within 128 lanes"
assert N <= _OUT_ROWS


# ---------------- fused kernel: im2col + conv + ReLU + pool + both heads ----------------
def _fused_kernel(x2_ref, wconv_ref, bconv_ref, pool_ref, wheads_ref, bheads_ref,
                  out_ref, *, rows, tap_offsets, hidden, proj_dim, num_classes,
                  normalize):
    # x2_ref:     (rows + pad, C) f32      padded NHWC image flattened to rows
    # wconv_ref:  (9*C, hidden)   bf16     im2col conv weight, (ky, kx, c)-major
    # bconv_ref:  (1, hidden)     f32
    # pool_ref:   (_OUT_ROWS, rows) f32    pooling matrix, 1/(H*W) at valid rows
    # wheads_ref: (hidden, proj+cls) bf16  [proj_w | class_w]
    # bheads_ref: (1, proj+cls)   f32      [proj_b | class_b]
    # out_ref:    (_OUT_ROWS, 128) f32     [h | z | ly | zero pad]

    # In-kernel im2col: nine statically-offset row windows of the padded image.
    patches = jnp.concatenate(
        [x2_ref[pl.ds(d, rows), :] for d in tap_offsets], axis=-1)   # (rows, 9*C)

    # conv3x3(pad=1) as one matmul (bf16 MXU operands, f32 accumulate), bias, ReLU.
    acc = jnp.dot(patches.astype(jnp.bfloat16), wconv_ref[...],
                  preferred_element_type=jnp.float32)                # (rows, hidden)
    acc = jnp.maximum(acc + bconv_ref[...], 0.0)

    # Global average pool == pooling-matrix matmul; 1/(H*W) baked into pool,
    # invalid (padding) rows masked by zeros. Kept f32 for accuracy.
    h = jnp.dot(pool_ref[...], acc,
                preferred_element_type=jnp.float32)                  # (_OUT_ROWS, hidden)

    # Both heads as one matmul; split into projection / logits.
    heads = jnp.dot(h.astype(jnp.bfloat16), wheads_ref[...],
                    preferred_element_type=jnp.float32) + bheads_ref[...]
    z = heads[:, :proj_dim]
    ly = heads[:, proj_dim:proj_dim + num_classes]

    if normalize:
        # F.normalize(z, p=2, dim=-1, eps=1e-12) == z * rsqrt(max(sum(z*z), eps^2))
        ssum = jnp.sum(z * z, axis=-1, keepdims=True)
        z = z * jax.lax.rsqrt(jnp.maximum(ssum, 1e-24))

    pad = jnp.zeros((_OUT_ROWS, _LANE - (hidden + proj_dim + num_classes)),
                    jnp.float32)
    out_ref[...] = jnp.concatenate([h, z, ly, pad], axis=-1)   # one unmasked store


# ---------------- one-time static packing (hoisted out of the forward path) ----------------
def pack_params(params, n=N, h=H, w=W):
    c = params["conv_w"].shape[2]
    f = params["conv_w"].shape[3]
    p = params["proj_w"].shape[1]
    k = params["class_w"].shape[1]
    pp = (h + 2) * (w + 2)
    rows = n * pp

    # Pooling matrix: row b selects the valid (non-pad) spatial rows of image b
    # with weight 1/(H*W); rows b >= N are zero (slab row padding).
    pool = np.zeros((_OUT_ROWS, rows), np.float32)
    inv = 1.0 / float(h * w)
    for b in range(n):
        for y in range(h):
            r0 = b * pp + y * (w + 2)
            pool[b, r0:r0 + w] = inv

    return dict(
        wconv=jnp.asarray(params["conv_w"]).reshape(9 * c, f).astype(jnp.bfloat16),
        bconv=jnp.asarray(params["conv_b"]).reshape(1, f),
        pool=jnp.asarray(pool),
        wheads=jnp.concatenate([params["proj_w"], params["class_w"]],
                               axis=-1).astype(jnp.bfloat16),
        bheads=jnp.concatenate([params["proj_b"],
                                params["class_b"]]).reshape(1, p + k),
    )


# ---------------- jitted forward (layout glue fuses; one pallas_call) ----------------
@functools.partial(jax.jit, static_argnames=("return_hidden", "normalize_proj_head"))
def encoder_proj_class_forward(x_nchw, packed, return_hidden=False,
                               normalize_proj_head=True):
    n, c, h, w = x_nchw.shape
    f = packed["wconv"].shape[1]
    pq = packed["wheads"].shape[1]
    p = PROJ_DIM
    k = pq - p

    pp = (h + 2) * (w + 2)
    rows = n * pp
    max_off = 2 * (w + 2) + 2
    pad_rows = -(-max_off // 8) * 8   # round tail padding up to a sublane multiple

    # NCHW (PyTorch) -> NHWC, pad=1, flatten padded grid to rows (~11 KB total).
    x_nhwc = jnp.transpose(x_nchw, (0, 2, 3, 1))
    x_pad = jnp.pad(x_nhwc, ((0, 0), (1, 1), (1, 1), (0, 0)))
    x2 = jnp.pad(x_pad.reshape(rows, c), ((0, pad_rows), (0, 0)))

    tap_offsets = tuple(ky * (w + 2) + kx for ky in range(3) for kx in range(3))

    kernel = functools.partial(
        _fused_kernel, rows=rows, tap_offsets=tap_offsets, hidden=f,
        proj_dim=p, num_classes=k, normalize=normalize_proj_head)

    out = pl.pallas_call(
        kernel,
        out_shape=jax.ShapeDtypeStruct((_OUT_ROWS, _LANE), jnp.float32),
        in_specs=[
            pl.BlockSpec((rows + pad_rows, c), lambda: (0, 0)),
            pl.BlockSpec((9 * c, f), lambda: (0, 0)),
            pl.BlockSpec((1, f), lambda: (0, 0)),
            pl.BlockSpec((_OUT_ROWS, rows), lambda: (0, 0)),
            pl.BlockSpec((f, pq), lambda: (0, 0)),
            pl.BlockSpec((1, pq), lambda: (0, 0)),
        ],
        out_specs=pl.BlockSpec((_OUT_ROWS, _LANE), lambda: (0, 0)),
    )(x2, packed["wconv"], packed["bconv"], packed["pool"],
      packed["wheads"], packed["bheads"])

    h_feat = out[:n, :f]
    z = out[:n, f:f + p]
    ly = out[:n, f + p:f + p + k]
    # TODO(synk): freeze_encoder (eval mode / detach) is a training-time autograd
    # concern; it has no effect in this stateless inference forward.
    if return_hidden:
        return h_feat, z, ly
    return z, ly


# ---------------- params & pure-JAX reference ----------------
def init_params(key):
    k1, k2, k3 = jax.random.split(key, 3)
    conv_w = jax.random.normal(k1, (3, 3, C, HIDDEN), jnp.float32) * 0.1
    conv_b = jnp.zeros((HIDDEN,), jnp.float32)
    proj_w = jax.random.normal(k2, (HIDDEN, PROJ_DIM), jnp.float32) * 0.1
    proj_b = jnp.zeros((PROJ_DIM,), jnp.float32)
    class_w = jax.random.normal(k3, (HIDDEN, NUM_CLASSES), jnp.float32) * 0.1
    class_b = jnp.zeros((NUM_CLASSES,), jnp.float32)
    return dict(conv_w=conv_w, conv_b=conv_b,
                proj_w=proj_w, proj_b=proj_b,
                class_w=class_w, class_b=class_b)


def reference_forward(x_nchw, params, normalize=True):
    x = jnp.transpose(x_nchw, (0, 2, 3, 1))
    hmap = jax.lax.conv_general_dilated(
        x, params["conv_w"], window_strides=(1, 1), padding="SAME",
        dimension_numbers=("NHWC", "HWIO", "NHWC"),
        precision=jax.lax.Precision.HIGHEST)
    hmap = jnp.maximum(hmap + params["conv_b"], 0.0)
    h = jnp.mean(hmap, axis=(1, 2))
    z = h @ params["proj_w"] + params["proj_b"]
    if normalize:
        z = z / jnp.maximum(jnp.linalg.norm(z, axis=-1, keepdims=True), 1e-12)
    ly = h @ params["class_w"] + params["class_b"]
    return h, z, ly


if __name__ == "__main__":
    key = jax.random.PRNGKey(0)
    kx, kp = jax.random.split(key)
    x = jax.random.normal(kx, (N, C, H, W), jnp.float32)  # PyTorch NCHW input
    params = init_params(kp)
    packed = pack_params(params)                          # one-time static packing

    # Tolerances loosened to 5e-3 because the MXU operands are bf16 (perf review
    # item); elementwise path and accumulation are f32.
    TOL = 5e-3

    # normalized path (default)
    h, z, ly = encoder_proj_class_forward(x, packed, return_hidden=True)
    jax.block_until_ready((h, z, ly))
    h_ref, z_ref, ly_ref = reference_forward(x, params, normalize=True)

    assert h.shape == (N, HIDDEN)
    assert z.shape == (N, PROJ_DIM) and ly.shape == (N, NUM_CLASSES)
    assert jnp.allclose(jnp.linalg.norm(z, axis=-1), 1.0, atol=1e-5)
    assert jnp.allclose(h, h_ref, atol=TOL, rtol=TOL)
    assert jnp.allclose(z, z_ref, atol=TOL, rtol=TOL)
    assert jnp.allclose(ly, ly_ref, atol=TOL, rtol=TOL)

    # unnormalized path (normalize_proj_head=False)
    z_raw, ly2 = encoder_proj_class_forward(x, packed, normalize_proj_head=False)
    jax.block_until_ready((z_raw, ly2))
    _, z_raw_ref, _ = reference_forward(x, params, normalize=False)
    assert jnp.allclose(z_raw, z_raw_ref, atol=TOL, rtol=TOL)
    assert jnp.allclose(ly2, ly_ref, atol=TOL, rtol=TOL)

    print("KERNEL_OK")
</pallas_src>

<mosaic_0001>
module attributes {stable_mosaic.version = 11 : i64} {
  func.func @_fused_kernel(%arg0: memref<688x4xf32, #tpu.memory_space<vmem>>, %arg1: memref<36x32xbf16, #tpu.memory_space<vmem>>, %arg2: memref<1x32xf32, #tpu.memory_space<vmem>>, %arg3: memref<8x648xf32, #tpu.memory_space<vmem>>, %arg4: memref<32x24xbf16, #tpu.memory_space<vmem>>, %arg5: memref<1x24xf32, #tpu.memory_space<vmem>>, %arg6: memref<8x128xf32, #tpu.memory_space<vmem>>) attributes {dimension_semantics = [], scalar_prefetch = 0 : i64, scratch_operands = 0 : i64, tpu.core_type = #tpu.core_type<tc>} {
    %c0 = arith.constant 0 : index
    %c0_0 = arith.constant 0 : index
    %0 = vector.load %arg0[%c0, %c0_0] : memref<688x4xf32, #tpu.memory_space<vmem>>, vector<648x4xf32>
    %c1 = arith.constant 1 : index
    %c0_1 = arith.constant 0 : index
    %1 = vector.load %arg0[%c1, %c0_1] : memref<688x4xf32, #tpu.memory_space<vmem>>, vector<648x4xf32>
    %c2 = arith.constant 2 : index
    %c0_2 = arith.constant 0 : index
    %2 = vector.load %arg0[%c2, %c0_2] : memref<688x4xf32, #tpu.memory_space<vmem>>, vector<648x4xf32>
    %c18 = arith.constant 18 : index
    %c0_3 = arith.constant 0 : index
    %3 = vector.load %arg0[%c18, %c0_3] : memref<688x4xf32, #tpu.memory_space<vmem>>, vector<648x4xf32>
    %c19 = arith.constant 19 : index
    %c0_4 = arith.constant 0 : index
    %4 = vector.load %arg0[%c19, %c0_4] : memref<688x4xf32, #tpu.memory_space<vmem>>, vector<648x4xf32>
    %c20 = arith.constant 20 : index
    %c0_5 = arith.constant 0 : index
    %5 = vector.load %arg0[%c20, %c0_5] : memref<688x4xf32, #tpu.memory_space<vmem>>, vector<648x4xf32>
    %c36 = arith.constant 36 : index
    %c0_6 = arith.constant 0 : index
    %6 = vector.load %arg0[%c36, %c0_6] : memref<688x4xf32, #tpu.memory_space<vmem>>, vector<648x4xf32>
    %c37 = arith.constant 37 : index
    %c0_7 = arith.constant 0 : index
    %7 = vector.load %arg0[%c37, %c0_7] : memref<688x4xf32, #tpu.memory_space<vmem>>, vector<648x4xf32>
    %c38 = arith.constant 38 : index
    %c0_8 = arith.constant 0 : index
    %8 = vector.load %arg0[%c38, %c0_8] : memref<688x4xf32, #tpu.memory_space<vmem>>, vector<648x4xf32>
    %9 = tpu.concatenate %0, %1, %2, %3, %4, %5, %6, %7, %8 in 1 : vector<648x4xf32>, vector<648x4xf32>, vector<648x4xf32>, vector<648x4xf32>, vector<648x4xf32>, vector<648x4xf32>, vector<648x4xf32>, vector<648x4xf32>, vector<648x4xf32> -> vector<648x36xf32>
    %10 = arith.truncf %9 : vector<648x36xf32> to vector<648x36xbf16>
    %c0_9 = arith.constant 0 : index
    %c0_10 = arith.constant 0 : index
    %11 = vector.load %arg1[%c0_9, %c0_10] : memref<36x32xbf16, #tpu.memory_space<vmem>>, vector<36x32xbf16>
    %cst = arith.constant dense<0.000000e+00> : vector<648x32xf32>
    %12 = tpu.matmul %10, %11, %cst {dimension_numbers = #tpu.dot_dimension_numbers<[1], [0], [0], [1], [0, 0, 1, 1], [], []>} : vector<648x36xbf16>, vector<36x32xbf16>, vector<648x32xf32> -> vector<648x32xf32>
    %c0_11 = arith.constant 0 : index
    %c0_12 = arith.constant 0 : index
    %13 = vector.load %arg2[%c0_11, %c0_12] : memref<1x32xf32, #tpu.memory_space<vmem>>, vector<1x32xf32>
    %14 = vector.broadcast %13 : vector<1x32xf32> to vector<648x32xf32>
    %15 = arith.addf %12, %14 : vector<648x32xf32>
    %cst_13 = arith.constant 0.000000e+00 : f32
    %16 = vector.broadcast %cst_13 : f32 to vector<648x32xf32>
    %17 = arith.maximumf %15, %16 : vector<648x32xf32>
    %c0_14 = arith.constant 0 : index
    %c0_15 = arith.constant 0 : index
    %18 = vector.load %arg3[%c0_14, %c0_15] : memref<8x648xf32, #tpu.memory_space<vmem>>, vector<8x648xf32>
    %cst_16 = arith.constant dense<0.000000e+00> : vector<8x32xf32>
    %19 = tpu.matmul %18, %17, %cst_16 {dimension_numbers = #tpu.dot_dimension_numbers<[1], [0], [0], [1], [0, 0, 1, 1], [], []>} : vector<8x648xf32>, vector<648x32xf32>, vector<8x32xf32> -> vector<8x32xf32>
    %20 = arith.truncf %19 : vector<8x32xf32> to vector<8x32xbf16>
    %c0_17 = arith.constant 0 : index
    %c0_18 = arith.constant 0 : index
    %21 = vector.load %arg4[%c0_17, %c0_18] : memref<32x24xbf16, #tpu.memory_space<vmem>>, vector<32x24xbf16>
    %cst_19 = arith.constant dense<0.000000e+00> : vector<8x24xf32>
    %22 = tpu.matmul %20, %21, %cst_19 {dimension_numbers = #tpu.dot_dimension_numbers<[1], [0], [0], [1], [0, 0, 1, 1], [], []>} : vector<8x32xbf16>, vector<32x24xbf16>, vector<8x24xf32> -> vector<8x24xf32>
    %c0_20 = arith.constant 0 : index
    %c0_21 = arith.constant 0 : index
    %23 = vector.load %arg5[%c0_20, %c0_21] : memref<1x24xf32, #tpu.memory_space<vmem>>, vector<1x24xf32>
    %24 = vector.broadcast %23 : vector<1x24xf32> to vector<8x24xf32>
    %25 = arith.addf %22, %24 : vector<8x24xf32>
    %26 = vector.extract_strided_slice %25 {offsets = [0, 0], sizes = [8, 16], strides = [1, 1]} : vector<8x24xf32> to vector<8x16xf32>
    %27 = vector.extract_strided_slice %25 {offsets = [0, 16], sizes = [8, 8], strides = [1, 1]} : vector<8x24xf32> to vector<8x8xf32>
    %28 = arith.mulf %26, %26 : vector<8x16xf32>
    %cst_22 = arith.constant dense<0.000000e+00> : vector<8xf32>
    %29 = vector.multi_reduction <add>, %28, %cst_22 [1] : vector<8x16xf32> to vector<8xf32>
    %30 = vector.shape_cast %29 : vector<8xf32> to vector<8x1xf32>
    %cst_23 = arith.constant 1.000000e-24 : f32
    %31 = vector.broadcast %cst_23 : f32 to vector<8x1xf32>
    %32 = arith.maximumf %30, %31 : vector<8x1xf32>
    %33 = math.rsqrt %32 : vector<8x1xf32>
    %34 = vector.broadcast %33 : vector<8x1xf32> to vector<8x16xf32>
    %35 = arith.mulf %26, %34 : vector<8x16xf32>
    %cst_24 = arith.constant 0.000000e+00 : f32
    %36 = vector.broadcast %cst_24 : f32 to vector<8x72xf32>
    %37 = tpu.concatenate %19, %35, %27, %36 in 1 : vector<8x32xf32>, vector<8x16xf32>, vector<8x8xf32>, vector<8x72xf32> -> vector<8x128xf32>
    %c0_25 = arith.constant 0 : index
    %c0_26 = arith.constant 0 : index
    %38 = vector.load %arg6[%c0_25, %c0_26] : memref<8x128xf32, #tpu.memory_space<vmem>>, vector<8x128xf32>
    tpu.vector_store %arg6[%c0_25, %c0_26], %37 {strides = array<i32>} : memref<8x128xf32, #tpu.memory_space<vmem>>, vector<8x128xf32>,
    return
  }
}

</mosaic_0001>

<bundles_post_ra>
// kernel: encoder_proj_class_forward.1
= control target key start
LH: loop header
LB: loop body
LE: loop exit
PB: predicated region body
PF: predicated region fallthrough
CT: control target
= control target key end

     0   :  { %s6606_s13 = smov 4   ;;  %s6607_s10 = smov 8   ;;  %vm3877_vm0 = vcmask 1041408   ;;  %vm6611_vm1 = vmmov 0   ;;  %vm3029_vm2 = vcmask 31744   ;;  %vm3111_vm3 = vcmask 64512   ;;  %s10745_s0 = inlined_call_operand.vmem [shape: f32[688,4], index: 0, kind: input, shape index: {}]   ;;  %s10746_s1 = inlined_call_operand.vmem [shape: bf16[36,32], index: 1, kind: input, shape index: {}]   ;;  %s10747_s2 = inlined_call_operand.vmem [shape: f32[1,32], index: 2, kind: input, shape index: {}]   ;;  %s10748_s3 = inlined_call_operand.vmem [shape: f32[8,648], index: 3, kind: input, shape index: {}]   ;;  %s10749_s4 = inlined_call_operand.vmem [shape: bf16[32,24], index: 4, kind: input, shape index: {}]   ;;  %s10750_s5 = inlined_call_operand.vmem [shape: f32[1,24], index: 5, kind: input, shape index: {}]   ;;  %s10751_s6 = inlined_call_operand.vmem [shape: f32[8,128], index: 6, kind: output, shape index: {}]  }
   0x1   :  { %v109_v0 = vld [vmem:[%s10745_s0 + $0x21] sm:$0xff]  ;;  %v110_v1 = vld [vmem:[%s10745_s0 + $0x29] sm:$0xff]  ;;  %v111_v5 = vld [vmem:[%s10745_s0 + $0x31] sm:$0xff]  ;;  %s6609_s23 = smov 12   ;;  %s6610_s9 = smov 20   ;;  %vm3193_vm4 = vcmask 97280  }
   0x2   :  { %v105_v2 = vld [vmem:[%s10745_s0 + $0x1] sm:$0xff]  ;;  %v5004_v3 = vpack.i.bf16 %v110_v1, %v109_v0  ;;  %v106_v4 = vld [vmem:[%s10745_s0 + $0x9] sm:$0xff]  ;;  %v112_v6 = vld [vmem:[%s10745_s0 + $0x39] sm:$0xff]  ;;  %s6613_s16 = smov 28   ;;  %s6614_s17 = smov 24   ;;  %vm3275_vm5 = vcmask 130048  }
   0x3   :  { %v4994_v7 = vpack.i.bf16 %v106_v4, %v105_v2  ;;  %v107_v8 = vld [vmem:[%s10745_s0 + $0x11] sm:$0xff]  ;;  %v108_v9 = vld [vmem:[%s10745_s0 + $0x19] sm:$0xff]  ;;  %v5009_v10 = vpack.i.bf16 %v112_v6, %v111_v5  ;;  %v113_v14 = vld [vmem:[%s10745_s0 + $0x41] sm:$0xff]  ;;  %s6615_s22 = smov 32   ;;  %vm3357_vm6 = vcmask 162816   ;;  %vm3439_vm7 = vcmask 195584  }
   0x4   :  { %5005 = vrot.lane.b32.xlu1 %v5004_v3, %s6606_s13  ;;  %v4999_v11 = vpack.i.bf16 %v108_v9, %v107_v8  ;;  %v115_v12 = vld [vmem:[%s10745_s0 + $0x51] sm:$0xff]  ;;  %v116_v13 = vld [vmem:[%s10745_s0 + $0x59] sm:$0xff]  ;;  %v114_v15 = vld [vmem:[%s10745_s0 + $0x49] sm:$0xff]  ;;  %vm3521_vm8 = vcmask 228352   ;;  %vm3603_vm9 = vcmask 261120   ;;  %vm3753_vm10 = vcmask 293888  }
   0x5   :  { %4995 = vrot.lane.b32.xlu0 %v4994_v7, %s6606_s13  ;;  %v5019_v16 = vpack.i.bf16 %v116_v13, %v115_v12  ;;  %v5014_v17 = vpack.i.bf16 %v114_v15, %v113_v14  ;;  %v119_v18 = vld [vmem:[%s10745_s0 + $0x71] sm:$0xff]  ;;  %v120_v19 = vld [vmem:[%s10745_s0 + $0x79] sm:$0xff]  ;;  %v117_v20 = vld [vmem:[%s10745_s0 + $0x61] sm:$0xff]  ;;  %vm4624_vm11 = vcmask 392192   ;;  %vm4626_vm12 = vcmask 457728  }
   0x6   :  { %v118_v21 = vld [vmem:[%s10745_s0 + $0x69] sm:$0xff]  ;;  %v5029_v22 = vpack.i.bf16 %v120_v19, %v119_v18  ;;  %v123_v24 = vld [vmem:[%s10745_s0 + $0x91] sm:$0xff]  ;;  %v124_v25 = vld [vmem:[%s10745_s0 + $0x99] sm:$0xff] }
   0x7   :  { %v5024_v23 = vpack.i.bf16 %v118_v21, %v117_v20  ;;  %v121_v26 = vld [vmem:[%s10745_s0 + $0x81] sm:$0xff]  ;;  %v122_v27 = vld [vmem:[%s10745_s0 + $0x89] sm:$0xff]  ;;  %v5039_v28 = vpack.i.bf16 %v124_v25, %v123_v24  ;;  %v127_v30 = vld [vmem:[%s10745_s0 + $0xb1] sm:$0xff] }
   0x8   :  { %5010 = vrot.lane.b32.xlu1 %v5009_v10, %s6606_s13  ;;  %v5034_v29 = vpack.i.bf16 %v122_v27, %v121_v26  ;;  %v128_v31 = vld [vmem:[%s10745_s0 + $0xb9] sm:$0xff]  ;;  %v125_v32 = vld [vmem:[%s10745_s0 + $0xa1] sm:$0xff]  ;;  %v126_v33 = vld [vmem:[%s10745_s0 + $0xa9] sm:$0xff] }
   0x9   :  { %5000 = vrot.lane.b32.xlu0 %v4999_v11, %s6606_s13  ;;  %v5049_v34 = vpack.i.bf16 %v128_v31, %v127_v30  ;;  %v5044_v35 = vpack.i.bf16 %v126_v33, %v125_v32  ;;  %v131_v36 = vld [vmem:[%s10745_s0 + $0xd1] sm:$0xff]  ;;  %v132_v37 = vld [vmem:[%s10745_s0 + $0xd9] sm:$0xff]  ;;  %v129_v38 = vld [vmem:[%s10745_s0 + $0xc1] sm:$0xff] }
   0xa   :  { %v130_v39 = vld [vmem:[%s10745_s0 + $0xc9] sm:$0xff]  ;;  %v5059_v40 = vpack.i.bf16 %v132_v37, %v131_v36  ;;  %v135_v42 = vld [vmem:[%s10745_s0 + $0xf1] sm:$0xff]  ;;  %v136_v43 = vld [vmem:[%s10745_s0 + $0xf9] sm:$0xff] }
   0xb   :  { %v5054_v41 = vpack.i.bf16 %v130_v39, %v129_v38  ;;  %v133_v44 = vld [vmem:[%s10745_s0 + $0xe1] sm:$0xff]  ;;  %v134_v45 = vld [vmem:[%s10745_s0 + $0xe9] sm:$0xff]  ;;  %v5069_v46 = vpack.i.bf16 %v136_v43, %v135_v42  ;;  %v139_v48 = vld [vmem:[%s10745_s0 + $0x111] sm:$0xff] }
   0xc   :  { %5020 = vrot.lane.b32.xlu1 %v5019_v16, %s6606_s13  ;;  %v5064_v47 = vpack.i.bf16 %v134_v45, %v133_v44  ;;  %v140_v49 = vld [vmem:[%s10745_s0 + $0x119] sm:$0xff]  ;;  %v137_v50 = vld [vmem:[%s10745_s0 + $0x101] sm:$0xff]  ;;  %v138_v51 = vld [vmem:[%s10745_s0 + $0x109] sm:$0xff] }
   0xd   :  { %5015 = vrot.lane.b32.xlu0 %v5014_v17, %s6606_s13  ;;  %v143_v52 = vld [vmem:[%s10745_s0 + $0x131] sm:$0xff]  ;;  %v144_v53 = vld [vmem:[%s10745_s0 + $0x139] sm:$0xff]  ;;  %v5079_v56 = vpack.i.bf16 %v140_v49, %v139_v48  ;;  %v141_v57 = vld [vmem:[%s10745_s0 + $0x121] sm:$0xff]  ;;  %v5074_v61 = vpack.i.bf16 %v138_v51, %v137_v50 }
   0xe   :  { %v192_v54 = vld [vmem:[%s10745_s0 + $0x32] sm:$0xff]  ;;  %v193_v55 = vld [vmem:[%s10745_s0 + $0x3a] sm:$0xff]  ;;  %v142_v58 = vld [vmem:[%s10745_s0 + $0x129] sm:$0xff]  ;;  %v5089_v12 = vpack.i.bf16 %v144_v53, %v143_v52 }
   0xf   :  { %v202_v59 = vld [vmem:[%s10745_s0 + $0x82] sm:$0xff]  ;;  %v6795_v60 = vpack.i.bf16 %v193_v55, %v192_v54  ;;  %v203_v62 = vld [vmem:[%s10745_s0 + $0x8a] sm:$0xff]  ;;  %v200_v63 = vld [vmem:[%s10745_s0 + $0x72] sm:$0xff]  ;;  %v5084_v19 = vpack.i.bf16 %v142_v58, %v141_v57 }
  0x10   :  { %5030 = vrot.lane.b32.xlu1 %v5029_v22, %s6606_s13  ;;  %v201_v0 = vld [vmem:[%s10745_s0 + $0x7a] sm:$0xff]  ;;  %v6807_v1 = vpack.i.bf16 %v203_v62, %v202_v59  ;;  %v206_v3 = vld [vmem:[%s10745_s0 + $0xa2] sm:$0xff]  ;;  %v207_v4 = vld [vmem:[%s10745_s0 + $0xaa] sm:$0xff] }
  0x11   :  { %5025 = vrot.lane.b32.xlu0 %v5024_v23, %s6606_s13  ;;  %v6809_v2 = vpack.i.bf16 %v201_v0, %v200_v63  ;;  %v204_v5 = vld [vmem:[%s10745_s0 + $0x92] sm:$0xff]  ;;  %v6826_v8 = vpack.i.bf16 %v207_v4, %v206_v3  ;;  %v205_v9 = vld [vmem:[%s10745_s0 + $0x9a] sm:$0xff]  ;;  %v210_v10 = vld [vmem:[%s10745_s0 + $0xc2] sm:$0xff] }
  0x12   :  { %v147_v6 = vld [vmem:[%s10745_s0 + $0x151] sm:$0xff]  ;;  %v148_v7 = vld [vmem:[%s10745_s0 + $0x159] sm:$0xff]  ;;  %v145_v13 = vld [vmem:[%s10745_s0 + $0x141] sm:$0xff]  ;;  %v6841_v14 = vpack.i.bf16 %v205_v9, %v204_v5 }
  0x13   :  { %v211_v11 = vld [vmem:[%s10745_s0 + $0xca] sm:$0xff]  ;;  %v208_v16 = vld [vmem:[%s10745_s0 + $0xb2] sm:$0xff]  ;;  %v209_v17 = vld [vmem:[%s10745_s0 + $0xba] sm:$0xff]  ;;  %v5099_v33 = vpack.i.bf16 %v148_v7, %v147_v6 }
  0x14   :  { %5040 = vrot.lane.b32.xlu1 %v5039_v28, %s6606_s13  ;;  %v6843_v15 = vpack.i.bf16 %v211_v11, %v210_v10  ;;  %v214_v18 = vld [vmem:[%s10745_s0 + $0xe2] sm:$0xff]  ;;  %v6855_v20 = vpack.i.bf16 %v209_v17, %v208_v16  ;;  %v215_v21 = vld [vmem:[%s10745_s0 + $0xea] sm:$0xff]  ;;  %v212_v22 = vld [vmem:[%s10745_s0 + $0xd2] sm:$0xff] }
  0x15   :  { %5035 = vrot.lane.b32.xlu0 %v5034_v29, %s6606_s13  ;;  %v213_v23 = vld [vmem:[%s10745_s0 + $0xda] sm:$0xff]  ;;  %v146_v24 = vld [vmem:[%s10745_s0 + $0x149] sm:$0xff]  ;;  %v6869_v25 = vpack.i.bf16 %v215_v21, %v214_v18  ;;  %v151_v29 = vld [vmem:[%s10745_s0 + $0x171] sm:$0xff] }
  0x16   :  { %v6871_v26 = vpack.i.bf16 %v213_v23, %v212_v22  ;;  %v218_v27 = vld [vmem:[%s10745_s0 + $0x102] sm:$0xff]  ;;  %v219_v28 = vld [vmem:[%s10745_s0 + $0x10a] sm:$0xff]  ;;  %v216_v31 = vld [vmem:[%s10745_s0 + $0xf2] sm:$0xff]  ;;  %v5094_v38 = vpack.i.bf16 %v146_v24, %v145_v13 }
  0x17   :  { %v6882_v30 = vpack.i.bf16 %v219_v28, %v218_v27  ;;  %v217_v32 = vld [vmem:[%s10745_s0 + $0xfa] sm:$0xff]  ;;  %v222_v37 = vld [vmem:[%s10745_s0 + $0x122] sm:$0xff]  ;;  %v223_v39 = vld [vmem:[%s10745_s0 + $0x12a] sm:$0xff] }
  0x18   :  { %5050 = vrot.lane.b32.xlu1 %v5049_v34, %s6606_s13  ;;  %v152_v34 = vld [vmem:[%s10745_s0 + $0x179] sm:$0xff]  ;;  %v6897_v36 = vpack.i.bf16 %v217_v32, %v216_v31  ;;  %v150_v42 = vld [vmem:[%s10745_s0 + $0x169] sm:$0xff]  ;;  %v6921_v45 = vpack.i.bf16 %v223_v39, %v222_v37  ;;  %v155_v55 = vld [vmem:[%s10745_s0 + $0x191] sm:$0xff] }
  0x19   :  { %5045 = vrot.lane.b32.xlu0 %v5044_v35, %s6606_s13  ;;  %v149_v35 = vld [vmem:[%s10745_s0 + $0x161] sm:$0xff]  ;;  %v195_v44 = vld [vmem:[%s10745_s0 + $0x4a] sm:$0xff]  ;;  %v5109_v50 = vpack.i.bf16 %v152_v34, %v151_v29  ;;  %v224_v52 = vld [vmem:[%s10745_s0 + $0x132] sm:$0xff] }
  0x1a   :  { %v194_v43 = vld [vmem:[%s10745_s0 + $0x42] sm:$0xff]  ;;  %v227_v48 = vld [vmem:[%s10745_s0 + $0x14a] sm:$0xff]  ;;  %v225_v53 = vld [vmem:[%s10745_s0 + $0x13a] sm:$0xff]  ;;  %v5104_v54 = vpack.i.bf16 %v150_v42, %v149_v35 }
  0x1b   :  { %v6931_v49 = vpack.i.bf16 %v195_v44, %v194_v43  ;;  %v153_v57 = vld [vmem:[%s10745_s0 + $0x181] sm:$0xff]  ;;  %v6952_v58 = vpack.i.bf16 %v225_v53, %v224_v52  ;;  %v154_v59 = vld [vmem:[%s10745_s0 + $0x189] sm:$0xff]  ;;  %v228_v0 = vld [vmem:[%s10745_s0 + $0x152] sm:$0xff] }
  0x1c   :  { %5060 = vrot.lane.b32.xlu1 %v5059_v40, %s6606_s13  ;;  %v220_v40 = vld [vmem:[%s10745_s0 + $0x112] sm:$0xff]  ;;  %v231_v62 = vld [vmem:[%s10745_s0 + $0x16a] sm:$0xff]  ;;  %v229_v3 = vld [vmem:[%s10745_s0 + $0x15a] sm:$0xff]  ;;  %v5114_v10 = vpack.i.bf16 %v154_v59, %v153_v57 }
  0x1d   :  { %5055 = vrot.lane.b32.xlu0 %v5054_v41, %s6606_s13  ;;  %v221_v41 = vld [vmem:[%s10745_s0 + $0x11a] sm:$0xff]  ;;  %v159_v5 = vld [vmem:[%s10745_s0 + $0x1b1] sm:$0xff]  ;;  %v6978_v7 = vpack.i.bf16 %v229_v3, %v228_v0  ;;  %v234_v9 = vld [vmem:[%s10745_s0 + $0x182] sm:$0xff] }
  0x1e   :  { %v160_v6 = vld [vmem:[%s10745_s0 + $0x1b9] sm:$0xff]  ;;  %v235_v11 = vld [vmem:[%s10745_s0 + $0x18a] sm:$0xff]  ;;  %v157_v16 = vld [vmem:[%s10745_s0 + $0x1a1] sm:$0xff] }
  0x1f   :  { %10797 = vst [vmem:[#allocation4_spill] sm:$0xff] %v6978_v7  ;;  %v233_v13 = vld [vmem:[%s10745_s0 + $0x17a] sm:$0xff]  ;;  %v158_v17 = vld [vmem:[%s10745_s0 + $0x1a9] sm:$0xff]  ;;  %v6999_v18 = vpack.i.bf16 %v235_v11, %v234_v9  ;;  %v236_v21 = vld [vmem:[%s10745_s0 + $0x192] sm:$0xff]  ;;  %v5129_v23 = vpack.i.bf16 %v160_v6, %v159_v5 }
  0x20   :  { %5070 = vrot.lane.b32.xlu1 %v5069_v46, %s6606_s13  ;;  %v6923_v46 = vpack.i.bf16 %v221_v41, %v220_v40  ;;  %v237_v22 = vld [vmem:[%s10745_s0 + $0x19a] sm:$0xff]  ;;  %v5124_v27 = vpack.i.bf16 %v158_v17, %v157_v16  ;;  %v163_v28 = vld [vmem:[%s10745_s0 + $0x1d1] sm:$0xff]  ;;  %v162_v32 = vld [vmem:[%s10745_s0 + $0x1c9] sm:$0xff] }
  0x21   :  { %5065 = vrot.lane.b32.xlu0 %v5064_v47, %s6606_s13  ;;  %v226_v47 = vld [vmem:[%s10745_s0 + $0x142] sm:$0xff]  ;;  %10798 = vst [vmem:[#allocation5_spill] sm:$0xff] %v6999_v18  ;;  %v7010_v24 = vpack.i.bf16 %v237_v22, %v236_v21  ;;  %v164_v29 = vld [vmem:[%s10745_s0 + $0x1d9] sm:$0xff]  ;;  %v167_v39 = vld [vmem:[%s10745_s0 + $0x1f1] sm:$0xff] }
  0x22   :  { %v6934_v51 = vpack.i.bf16 %v227_v48, %v226_v47  ;;  %v161_v31 = vld [vmem:[%s10745_s0 + $0x1c1] sm:$0xff]  ;;  %v5139_v37 = vpack.i.bf16 %v164_v29, %v163_v28  ;;  %v168_v40 = vld [vmem:[%s10745_s0 + $0x1f9] sm:$0xff]  ;;  %v166_v42 = vld [vmem:[%s10745_s0 + $0x1e9] sm:$0xff] }
  0x23   :  { %10800 = vst [vmem:[#allocation7_spill] sm:$0xff] %v7010_v24  ;;  %v197_v34 = vld [vmem:[%s10745_s0 + $0x5a] sm:$0xff]  ;;  %v5149_v43 = vpack.i.bf16 %v168_v40, %v167_v39  ;;  %v171_v47 = vld [vmem:[%s10745_s0 + $0x211] sm:$0xff]  ;;  %v170_v52 = vld [vmem:[%s10745_s0 + $0x209] sm:$0xff] }
  0x24   :  { %5080 = vrot.lane.b32.xlu1 %v5079_v56, %s6606_s13  ;;  %10795 = vst [vmem:[#allocation2_spill] sm:$0xff] %v6934_v51  ;;  %v156_v56 = vld [vmem:[%s10745_s0 + $0x199] sm:$0xff]  ;;  %v165_v41 = vld [vmem:[%s10745_s0 + $0x1e1] sm:$0xff]  ;;  %v174_v59 = vld [vmem:[%s10745_s0 + $0x229] sm:$0xff] }
  0x25   :  { %5075 = vrot.lane.b32.xlu0 %v5074_v61, %s6606_s13  ;;  %v230_v61 = vld [vmem:[%s10745_s0 + $0x162] sm:$0xff]  ;;  %v5119_v4 = vpack.i.bf16 %v156_v56, %v155_v55  ;;  %v5144_v44 = vpack.i.bf16 %v166_v42, %v165_v41  ;;  %v172_v48 = vld [vmem:[%s10745_s0 + $0x219] sm:$0xff]  ;;  %v175_v55 = vld [vmem:[%s10745_s0 + $0x231] sm:$0xff] }
  0x26   :  { %v6963_v63 = vpack.i.bf16 %v231_v62, %v230_v61  ;;  %v5159_v53 = vpack.i.bf16 %v172_v48, %v171_v47  ;;  %v176_v56 = vld [vmem:[%s10745_s0 + $0x239] sm:$0xff]  ;;  %v173_v57 = vld [vmem:[%s10745_s0 + $0x221] sm:$0xff]  ;;  %v199_v62 = vld [vmem:[%s10745_s0 + $0x6a] sm:$0xff] }
  0x27   :  { %v198_v61 = vld [vmem:[%s10745_s0 + $0x62] sm:$0xff]  ;;  %v5169_v3 = vpack.i.bf16 %v176_v56, %v175_v55  ;;  %v179_v5 = vld [vmem:[%s10745_s0 + $0x251] sm:$0xff]  ;;  %v180_v6 = vld [vmem:[%s10745_s0 + $0x259] sm:$0xff] }
  0x28   :  { %5090 = vrot.lane.b32.xlu1 %v5089_v12, %s6606_s13  ;;  %10796 = vst [vmem:[#allocation3_spill] sm:$0xff] %v6963_v63  ;;  %v232_v12 = vld [vmem:[%s10745_s0 + $0x172] sm:$0xff]  ;;  %v7081_v0 = vpack.i.bf16 %v199_v62, %v198_v61  ;;  %v177_v9 = vld [vmem:[%s10745_s0 + $0x241] sm:$0xff]  ;;  %v5179_v11 = vpack.i.bf16 %v180_v6, %v179_v5  ;;  %v182_v21 = vld [vmem:[%s10745_s0 + $0x269] sm:$0xff] }
  0x29   :  { %5085 = vrot.lane.b32.xlu0 %v5084_v19, %s6606_s13  ;;  %v7001_v19 = vpack.i.bf16 %v233_v13, %v232_v12  ;;  %v183_v13 = vld [vmem:[%s10745_s0 + $0x271] sm:$0xff]  ;;  %v184_v16 = vld [vmem:[%s10745_s0 + $0x279] sm:$0xff]  ;;  %v181_v17 = vld [vmem:[%s10745_s0 + $0x261] sm:$0xff] }
  0x2a   :  { %v5189_v22 = vpack.i.bf16 %v184_v16, %v183_v13  ;;  %v187_v28 = vld [vmem:[%s10745_s0 + $0xa] sm:$0xff]  ;;  %v350_v56 = vld [vmem:[%s10745_s0 + $0x14] sm:$0xff]  ;;  %v6596_v5 = vld [vmem:[%s10746_s1] sm:$0xff]  }
  0x2b   :  { %10799 = vst [vmem:[#allocation6_spill] sm:$0xff] %v7001_v19  ;;  %v6594_v48 = vld [vmem:[%s10746_s1 + $0x10] ss:$0 sps:$4 sm:$0x33]   ;;  %v6595_v55 = vld [vmem:[%s10746_s1 + $0x8] sm:$0xff]   ;;  %v269_v61 = vld [vmem:[%s10745_s0 + $0x13] sm:$0xff] }
  0x2c   :  { %5100 = vrot.lane.b32.xlu1 %v5099_v33, %s6606_s13  ;;  %v196_v33 = vld [vmem:[%s10745_s0 + $0x52] sm:$0xff]  ;;  %v270_v62 = vld [vmem:[%s10745_s0 + $0x1b] sm:$0xff] }
  0x2d   :  { %5095 = vrot.lane.b32.xlu0 %v5094_v38, %s6606_s13  ;;  %v7031_v35 = vpack.i.bf16 %v197_v34, %v196_v33  ;;  %v5134_v38 = vpack.i.bf16 %v162_v32, %v161_v31  ;;  %v190_v31 = vld [vmem:[%s10745_s0 + $0x22] sm:$0xff]  ;;  %v191_v32 = vld [vmem:[%s10745_s0 + $0x2a] sm:$0xff]  ;;  %v188_v34 = vld [vmem:[%s10745_s0 + $0x12] sm:$0xff]  ;;  %v5329_v6 = vpack.i.bf16 %v270_v62, %v269_v61 }
  0x2e   :  { %v185_v33 = vld [vmem:[%s10745_s0 + $0x281] sm:$0xff]  ;;  %v353_v13 = vld [vmem:[%s10745_s0 + $0x2c] sm:$0xff] }
  0x30   :  { %5110 = vrot.lane.b32.xlu1 %v5109_v50, %s6606_s13  ;;  %v169_v50 = vld [vmem:[%s10745_s0 + $0x201] sm:$0xff] }
  0x31   :  { %5105 = vrot.lane.b32.xlu0 %v5104_v54, %s6606_s13  ;;  %v5154_v54 = vpack.i.bf16 %v170_v52, %v169_v50  ;;  %v10752_v50 = vmov 0.0   ;;  %v3879_v52 = vsel %vm3877_vm0, %v6594_v48, 0  ;;  %v436_v48 = vld [vmem:[%s10745_s0 + $0x3d] sm:$0xff] }
  0x32   :  { %4800 = vmatprep.subr.bf16.mxu0 %v10752_v50  ;;  %4978 = vmatprep.subr.bf16.mxu1 %v10752_v50 }
  0x33   :  { %4801 = vmatpush3.bf16.msra.mxu0 %v3879_v52  ;;  %4981 = vmatpush3.bf16.msra.mxu1 %v3879_v52 }
  0x34   :  { %5120 = vrot.lane.b32.xlu1 %v5119_v4, %s6606_s13  ;;  %v5164_v4 = vpack.i.bf16 %v174_v59, %v173_v57  ;;  %4802 = vmatprep.subr.bf16.mxu0 %v10752_v50  ;;  %v351_v57 = vld [vmem:[%s10745_s0 + $0x1c] sm:$0xff] }
  0x35   :  { %5115 = vrot.lane.b32.xlu0 %v5114_v10, %s6606_s13  ;;  %v178_v10 = vld [vmem:[%s10745_s0 + $0x249] sm:$0xff]  ;;  %4979 = vmatprep.subr.bf16.mxu1 %v10752_v50 }
  0x36   :  { %v5174_v12 = vpack.i.bf16 %v178_v10, %v177_v9  ;;  %v433_v9 = vld [vmem:[%s10745_s0 + $0x25] sm:$0xff]  ;;  %v434_v10 = vld [vmem:[%s10745_s0 + $0x2d] sm:$0xff]  ;;  %4806 = vmatprep.mubr.msk.bf16.mxu0 %vm6611_vm1, %v10752_v50  ;;  %4910 = vmatprep.mubr.msk.bf16.mxu1 %vm6611_vm1, %v10752_v50 }
  0x37   :  { %4803 = vmatpush3.bf16.msra.mxu0 %v6595_v55  ;;  %4982 = vmatpush3.bf16.msra.mxu1 %v6595_v55  ;;  %v354_v55 = vld [vmem:[%s10745_s0 + $0x34] sm:$0xff] }
  0x38   :  { %5130 = vrot.lane.b32.xlu1 %v5129_v23, %s6606_s13  ;;  %v5184_v23 = vpack.i.bf16 %v182_v21, %v181_v17  ;;  %4804 = vmatprep.subr.bf16.mxu0 %v10752_v50  ;;  %v5344_v17 = vpack.i.bf16 %v434_v10, %v433_v9 }
  0x39   :  { %5125 = vrot.lane.b32.xlu0 %v5124_v27, %s6606_s13  ;;  %v186_v27 = vld [vmem:[%s10745_s0 + $0x2] sm:$0xff]  ;;  %4980 = vmatprep.subr.bf16.mxu1 %v10752_v50 }
  0x3a   :  { %v5194_v29 = vpack.i.bf16 %v187_v28, %v186_v27  ;;  %v515_v27 = vld [vmem:[%s10745_s0 + $0x2e] sm:$0xff]  ;;  %v360_v50 = vld [vmem:[%s10745_s0 + $0x64] sm:$0xff] }
  0x3b   :  { %4805 = vmatpush3.bf16.msra.mxu0 %v6596_v5  ;;  %4983 = vmatpush3.bf16.msra.mxu1 %v6596_v5  ;;  %v517_v5 = vld [vmem:[%s10745_s0 + $0x3e] sm:$0xff] }
  0x3c   :  { %5140 = vrot.lane.b32.xlu1 %v5139_v37, %s6606_s13  ;;  %v189_v37 = vld [vmem:[%s10745_s0 + $0x1a] sm:$0xff] }
  0x3d   :  { %5135 = vrot.lane.b32.xlu0 %v5134_v38, %s6606_s13  ;;  %v7137_v38 = vpack.i.bf16 %v191_v32, %v190_v31  ;;  %v5199_v39 = vpack.i.bf16 %v189_v37, %v188_v34  ;;  %v271_v32 = vld [vmem:[%s10745_s0 + $0x23] sm:$0xff] }
  0x40   :  { %5150 = vrot.lane.b32.xlu1 %v5149_v43, %s6606_s13 }
  0x41   :  { %5145 = vrot.lane.b32.xlu0 %v5144_v44, %s6606_s13 }
  0x44   :  { %5160 = vrot.lane.b32.xlu1 %v5159_v53, %s6606_s13 }
  0x45   :  { %5155 = vrot.lane.b32.xlu0 %v5154_v54, %s6606_s13 }
  0x48   :  { %5170 = vrot.lane.b32.xlu1 %v5169_v3, %s6606_s13 }
  0x49   :  { %5165 = vrot.lane.b32.xlu0 %v5164_v4, %s6606_s13  ;;  %v5334_v4 = vpack.i.bf16 %v351_v57, %v350_v56 }
  0x4c   :  { %5180 = vrot.lane.b32.xlu1 %v5179_v11, %s6606_s13 }
  0x4d   :  { %5175 = vrot.lane.b32.xlu0 %v5174_v12, %s6606_s13  ;;  %v352_v12 = vld [vmem:[%s10745_s0 + $0x24] sm:$0xff] }
  0x4e   :  { %v5339_v21 = vpack.i.bf16 %v353_v13, %v352_v12  ;;  %v273_v12 = vld [vmem:[%s10745_s0 + $0x33] sm:$0xff]  ;;  %v274_v13 = vld [vmem:[%s10745_s0 + $0x3b] sm:$0xff] }
  0x50   :  { %5190 = vrot.lane.b32.xlu1 %v5189_v22, %s6606_s13 }
  0x51   :  { %5185 = vrot.lane.b32.xlu0 %v5184_v23, %s6606_s13  ;;  %v514_v23 = vld [vmem:[%s10745_s0 + $0x26] sm:$0xff] }
  0x54   :  { %5195 = vrot.lane.b32.xlu1 %v5194_v29, %s6607_s10  ;;  %v5349_v29 = vpack.i.bf16 %v515_v27, %v514_v23  ;;  %v437_v23 = vld [vmem:[%s10745_s0 + $0x45] sm:$0xff]  ;;  %v438_v27 = vld [vmem:[%s10745_s0 + $0x4d] sm:$0xff] }
  0x55   :  { %836 = vrot.lane.b32.xlu0 %v185_v33, %s6606_s13  ;;  %s6612_s13 = smov 16   ;;  %v272_v33 = vld [vmem:[%s10745_s0 + $0x2b] sm:$0xff] }
  0x56   :  { %v5359_v37 = vpack.i.bf16 %v272_v33, %v271_v32  ;;  %v356_v32 = vld [vmem:[%s10745_s0 + $0x44] sm:$0xff] }
  0x58   :  { %5205 = vrot.lane.b32.xlu1 %v7137_v38, %s6607_s10 }
  0x59   :  { %5200 = vrot.lane.b32.xlu0 %v5199_v39, %s6607_s10 }
  0x5c   :  { %5215 = vrot.lane.b32.xlu1 %v6931_v49, %s6607_s10 }
  0x5d   :  { %5210 = vrot.lane.b32.xlu0 %v6795_v60, %s6607_s10 }
  0x60   :  { %5225 = vrot.lane.b32.xlu1 %v7081_v0, %s6607_s10 }
  0x61   :  { %5220 = vrot.lane.b32.xlu0 %v7031_v35, %s6607_s10 }
  0x64   :  { %5235 = vrot.lane.b32.xlu1 %v6807_v1, %s6607_s10 }
  0x65   :  { %5230 = vrot.lane.b32.xlu0 %v6809_v2, %s6607_s10 }
  0x68   :  { %5245 = vrot.lane.b32.xlu1 %v6826_v8, %s6607_s10 }
  0x69   :  { %5240 = vrot.lane.b32.xlu0 %v6841_v14, %s6607_s10 }
  0x6c   :  { %5255 = vrot.lane.b32.xlu1 %v6843_v15, %s6607_s10 }
  0x6d   :  { %5250 = vrot.lane.b32.xlu0 %v6855_v20, %s6607_s10 }
  0x70   :  { %5265 = vrot.lane.b32.xlu1 %v6869_v25, %s6607_s10 }
  0x71   :  { %5260 = vrot.lane.b32.xlu0 %v6871_v26, %s6607_s10 }
  0x74   :  { %5275 = vrot.lane.b32.xlu1 %v6882_v30, %s6607_s10 }
  0x75   :  { %5270 = vrot.lane.b32.xlu0 %v6897_v36, %s6607_s10 }
  0x76   :  { %v7171_v40 = vpop.permute.xlu1 %5005 }
  0x77   :  { %v7173_v41 = vpop.permute.xlu0 %4995 }
  0x78   :  { %5285 = vrot.lane.b32.xlu1 %v6921_v45, %s6607_s10 }
  0x79   :  { %5280 = vrot.lane.b32.xlu0 %v6923_v46, %s6607_s10 }
  0x7a   :  { %v7179_v42 = vpop.permute.xlu1 %5010 }
  0x7b   :  { %v7181_v43 = vpop.permute.xlu0 %5000 }
  0x7c   :  { %5295 = vrot.lane.b32.xlu1 %v6934_v51, %s6607_s10 }
  0x7d   :  { %5290 = vrot.lane.b32.xlu0 %v6952_v58, %s6607_s10 }
  0x7e   :  { %v7187_v44 = vpop.permute.xlu1 %5020 }
  0x7f   :  { %v7189_v47 = vpop.permute.xlu0 %5015 }
  0x80   :  { %5305 = vrot.lane.b32.xlu1 %v6963_v63, %s6607_s10 }
  0x81   :  { %5300 = vrot.lane.b32.xlu0 %v6978_v7, %s6607_s10 }
  0x82   :  { %v7199_v53 = vpop.permute.xlu1 %5030 }
  0x83   :  { %v7202_v54 = vpop.permute.xlu0 %5025 }
  0x84   :  { %5315 = vrot.lane.b32.xlu1 %v6999_v18, %s6607_s10 }
  0x85   :  { %5310 = vrot.lane.b32.xlu0 %v7001_v19, %s6607_s10  ;;  %v531_v19 = vld [vmem:[%s10745_s0 + $0xae] sm:$0xff] }
  0x86   :  { %v7219_v59 = vpop.permute.xlu1 %5040 }
  0x87   :  { %v7227_v3 = vpop.permute.xlu0 %5035 }
  0x88   :  { %5325 = vrot.lane.b32.xlu1 %v5199_v39, %s6609_s23  ;;  %v435_v39 = vld [vmem:[%s10745_s0 + $0x35] sm:$0xff] }
  0x89   :  { %5320 = vrot.lane.b32.xlu0 %v7010_v24, %s6607_s10  ;;  %v5374_v57 = vpack.i.bf16 %v436_v48, %v435_v39 }
  0x8a   :  { %v7243_v11 = vpop.permute.xlu1 %5050 }
  0x8b   :  { %v7251_v16 = vpop.permute.xlu0 %5045 }
  0x8c   :  { %5335 = vrot.lane.b32.xlu1 %v5334_v4, %s6610_s9  ;;  %v516_v4 = vld [vmem:[%s10745_s0 + $0x36] sm:$0xff] }
  0x8d   :  { %5330 = vrot.lane.b32.xlu0 %v5329_v6, %s6612_s13  ;;  %v5379_v9 = vpack.i.bf16 %v517_v5, %v516_v4  ;;  %v275_v5 = vld [vmem:[%s10745_s0 + $0x43] sm:$0xff] }
  0x8e   :  { %v7259_v22 = vpop.permute.xlu1 %5060 }
  0x8f   :  { %v7267_v28 = vpop.permute.xlu0 %5055 }
  0x90   :  { %5345 = vrot.lane.b32.xlu1 %v5344_v17, %s6613_s16 }
  0x91   :  { %5340 = vrot.lane.b32.xlu0 %v5339_v21, %s6614_s17 }
  0x92   :  { %v7271_v31 = vpop.permute.xlu1 %5070 }
  0x93   :  { %10801 = vst [vmem:[#allocation8_spill] sm:$0xff] %v7271_v31  ;;  %v7279_v34 = vpop.permute.xlu0 %5065 }
  0x94   :  { %5355 = vrot.lane.b32.xlu1 %v7137_v38, %s6609_s23  ;;  %v355_v38 = vld [vmem:[%s10745_s0 + $0x3c] sm:$0xff] }
  0x95   :  { %5350 = vrot.lane.b32.xlu0 %v5349_v29, %s6615_s22  ;;  %v5369_v61 = vpack.i.bf16 %v355_v38, %v354_v55  ;;  %v518_v55 = vld [vmem:[%s10745_s0 + $0x46] sm:$0xff]  ;;  %v519_v38 = vld [vmem:[%s10745_s0 + $0x4e] sm:$0xff] }
  0x96   :  { %v7290_v52 = vpop.permute.xlu1 %5080 }
  0x97   :  { %10802 = vst [vmem:[#allocation9_spill] sm:$0xff] %v7290_v52  ;;  %v7298_v56 = vpop.permute.xlu0 %5075 }
  0x98   :  { %10803 = vst [vmem:[#allocation10_spill] sm:$0xff] %v7298_v56  ;;  %5365 = vrot.lane.b32.xlu1 %v5339_v21, %s6610_s9  ;;  %v5389_v21 = vpack.i.bf16 %v274_v13, %v273_v12 }
  0x99   :  { %5360 = vrot.lane.b32.xlu0 %v5359_v37, %s6612_s13  ;;  %v5404_v37 = vpack.i.bf16 %v438_v27, %v437_v23  ;;  %v440_v23 = vld [vmem:[%s10745_s0 + $0x5d] sm:$0xff] }
  0x9a   :  { %v7302_v62 = vpop.permute.xlu1 %5090 }
  0x9b   :  { %10804 = vst [vmem:[#allocation11_spill] sm:$0xff] %v7302_v62  ;;  %v7310_v6 = vpop.permute.xlu0 %5085  ;;  %v529_v62 = vld [vmem:[%s10745_s0 + $0x9e] sm:$0xff] }
  0x9c   :  { %10805 = vst [vmem:[#allocation12_spill] sm:$0xff] %v7310_v6  ;;  %5375 = vrot.lane.b32.xlu1 %v5374_v57, %s6613_s16 }
  0x9d   :  { %5370 = vrot.lane.b32.xlu0 %v5369_v61, %s6614_s17 }
  0x9e   :  { %v7314_v10 = vpop.permute.xlu1 %5100 }
  0x9f   :  { %10806 = vst [vmem:[#allocation13_spill] sm:$0xff] %v7314_v10  ;;  %v7322_v17 = vpop.permute.xlu0 %5095  ;;  %v527_v10 = vld [vmem:[%s10745_s0 + $0x8e] sm:$0xff] }
  0xa0   :  { %10807 = vst [vmem:[#allocation14_spill] sm:$0xff] %v7322_v17  ;;  %5385 = vrot.lane.b32.xlu1 %v6795_v60, %s6609_s23  ;;  %v357_v60 = vld [vmem:[%s10745_s0 + $0x4c] sm:$0xff]  ;;  %v366_v17 = vld [vmem:[%s10745_s0 + $0x94] sm:$0xff] }
  0xa1   :  { %5380 = vrot.lane.b32.xlu0 %v5379_v9, %s6615_s22  ;;  %v5399_v39 = vpack.i.bf16 %v357_v60, %v356_v32  ;;  %v276_v9 = vld [vmem:[%s10745_s0 + $0x4b] sm:$0xff]  ;;  %v358_v32 = vld [vmem:[%s10745_s0 + $0x54] sm:$0xff] }
  0xa2   :  { %v7333_v29 = vpop.permute.xlu1 %5110  ;;  %v5419_v13 = vpack.i.bf16 %v276_v9, %v275_v5  ;;  %v521_v5 = vld [vmem:[%s10745_s0 + $0x5e] sm:$0xff] }
  0xa3   :  { %10808 = vst [vmem:[#allocation15_spill] sm:$0xff] %v7333_v29  ;;  %v7341_v33 = vpop.permute.xlu0 %5105 }
  0xa4   :  { %10809 = vst [vmem:[#allocation16_spill] sm:$0xff] %v7341_v33  ;;  %5395 = vrot.lane.b32.xlu1 %v5369_v61, %s6610_s9  ;;  %v5409_v61 = vpack.i.bf16 %v519_v38, %v518_v55 }
  0xa5   :  { %5390 = vrot.lane.b32.xlu0 %v5389_v21, %s6612_s13  ;;  %v439_v21 = vld [vmem:[%s10745_s0 + $0x55] sm:$0xff] }
  0xa6   :  { %v7345_v48 = vpop.permute.xlu1 %5120 }
  0xa7   :  { %10810 = vst [vmem:[#allocation17_spill] sm:$0xff] %v7345_v48  ;;  %v7353_v57 = vpop.permute.xlu0 %5115 }
  0xa8   :  { %10811 = vst [vmem:[#allocation18_spill] sm:$0xff] %v7353_v57  ;;  %5405 = vrot.lane.b32.xlu1 %v5404_v37, %s6613_s16  ;;  %v5434_v37 = vpack.i.bf16 %v440_v23, %v439_v21  ;;  %v278_v23 = vld [vmem:[%s10745_s0 + $0x5b] sm:$0xff]  ;;  %v522_v57 = vld [vmem:[%s10745_s0 + $0x66] sm:$0xff] }
  0xa9   :  { %5400 = vrot.lane.b32.xlu0 %v5399_v39, %s6614_s17 }
  0xaa   :  { %v7357_v4 = vpop.permute.xlu1 %5130 }
  0xab   :  { %10812 = vst [vmem:[#allocation19_spill] sm:$0xff] %v7357_v4  ;;  %v7365_v12 = vpop.permute.xlu0 %5125 }
  0xac   :  { %5415 = vrot.lane.b32.xlu1 %v6931_v49, %s6609_s23  ;;  %v359_v49 = vld [vmem:[%s10745_s0 + $0x5c] sm:$0xff] }
  0xad   :  { %5410 = vrot.lane.b32.xlu0 %v5409_v61, %s6615_s22  ;;  %v5429_v55 = vpack.i.bf16 %v359_v49, %v358_v32  ;;  %v520_v61 = vld [vmem:[%s10745_s0 + $0x56] sm:$0xff] }
  0xae   :  { %v7376_v27 = vpop.permute.xlu1 %5140 }
  0xaf   :  { %10813 = vst [vmem:[#allocation20_spill] sm:$0xff] %v7376_v27  ;;  %v7384_v60 = vpop.permute.xlu0 %5135 }
  0xb0   :  { %10814 = vst [vmem:[#allocation21_spill] sm:$0xff] %v7384_v60  ;;  %5425 = vrot.lane.b32.xlu1 %v5399_v39, %s6610_s9  ;;  %v5439_v39 = vpack.i.bf16 %v521_v5, %v520_v61  ;;  %v442_v61 = vld [vmem:[%s10745_s0 + $0x6d] sm:$0xff] }
  0xb1   :  { %5420 = vrot.lane.b32.xlu0 %v5419_v13, %s6612_s13  ;;  %v277_v13 = vld [vmem:[%s10745_s0 + $0x53] sm:$0xff] }
  0xb2   :  { %v7388_v38 = vpop.permute.xlu1 %5150  ;;  %v5449_v49 = vpack.i.bf16 %v278_v23, %v277_v13 }
  0xb3   :  { %10815 = vst [vmem:[#allocation22_spill] sm:$0xff] %v7388_v38  ;;  %v7396_v9 = vpop.permute.xlu0 %5145  ;;  %v528_v38 = vld [vmem:[%s10745_s0 + $0x96] sm:$0xff] }
  0xb4   :  { %10816 = vst [vmem:[#allocation23_spill] sm:$0xff] %v7396_v9  ;;  %5435 = vrot.lane.b32.xlu1 %v5434_v37, %s6613_s16  ;;  %v441_v37 = vld [vmem:[%s10745_s0 + $0x65] sm:$0xff] }
  0xb5   :  { %5430 = vrot.lane.b32.xlu0 %v5429_v55, %s6614_s17  ;;  %v5464_v13 = vpack.i.bf16 %v442_v61, %v441_v37  ;;  %v368_v9 = vld [vmem:[%s10745_s0 + $0xa4] sm:$0xff] }
  0xb6   :  { %v7400_v21 = vpop.permute.xlu1 %5160 }
  0xb7   :  { %10817 = vst [vmem:[#allocation24_spill] sm:$0xff] %v7400_v21  ;;  %v7408_v32 = vpop.permute.xlu0 %5155  ;;  %v526_v21 = vld [vmem:[%s10745_s0 + $0x86] sm:$0xff] }
  0xb8   :  { %10818 = vst [vmem:[#allocation25_spill] sm:$0xff] %v7408_v32  ;;  %5445 = vrot.lane.b32.xlu1 %v7031_v35, %s6609_s23  ;;  %v361_v35 = vld [vmem:[%s10745_s0 + $0x6c] sm:$0xff] }
  0xb9   :  { %5440 = vrot.lane.b32.xlu0 %v5439_v39, %s6615_s22  ;;  %v5459_v23 = vpack.i.bf16 %v361_v35, %v360_v50  ;;  %v279_v50 = vld [vmem:[%s10745_s0 + $0x63] sm:$0xff] }
  0xba   :  { %v7419_v5 = vpop.permute.xlu1 %5170 }
  0xbb   :  { %10819 = vst [vmem:[#allocation26_spill] sm:$0xff] %v7419_v5  ;;  %v7427_v39 = vpop.permute.xlu0 %5165  ;;  %v523_v5 = vld [vmem:[%s10745_s0 + $0x6e] sm:$0xff] }
  0xbc   :  { %10820 = vst [vmem:[#allocation27_spill] sm:$0xff] %v7427_v39  ;;  %5455 = vrot.lane.b32.xlu1 %v5429_v55, %s6610_s9  ;;  %v5469_v55 = vpack.i.bf16 %v523_v5, %v522_v57  ;;  %v443_v57 = vld [vmem:[%s10745_s0 + $0x75] sm:$0xff]  ;;  %v444_v5 = vld [vmem:[%s10745_s0 + $0x7d] sm:$0xff] }
  0xbd   :  { %5450 = vrot.lane.b32.xlu0 %v5449_v49, %s6612_s13  ;;  %v280_v49 = vld [vmem:[%s10745_s0 + $0x6b] sm:$0xff] }
  0xbe   :  { %v7431_v48 = vpop.permute.xlu1 %5180  ;;  %v5479_v35 = vpack.i.bf16 %v280_v49, %v279_v50  ;;  %v5494_v50 = vpack.i.bf16 %v444_v5, %v443_v57 }
  0xbf   :  { %10821 = vst [vmem:[#allocation28_spill] sm:$0xff] %v7431_v48  ;;  %v7439_v29 = vpop.permute.xlu0 %5175  ;;  %v524_v48 = vld [vmem:[%s10745_s0 + $0x76] sm:$0xff] }
  0xc0   :  { %10822 = vst [vmem:[#allocation29_spill] sm:$0xff] %v7439_v29  ;;  %5465 = vrot.lane.b32.xlu1 %v5464_v13, %s6613_s16  ;;  %v525_v29 = vld [vmem:[%s10745_s0 + $0x7e] sm:$0xff] }
  0xc1   :  { %5460 = vrot.lane.b32.xlu0 %v5459_v23, %s6614_s17 }
  0xc2   :  { %v7443_v37 = vpop.permute.xlu1 %5190 }
  0xc3   :  { %10823 = vst [vmem:[#allocation30_spill] sm:$0xff] %v7443_v37  ;;  %v7451_v61 = vpop.permute.xlu0 %5185  ;;  %v362_v37 = vld [vmem:[%s10745_s0 + $0x74] sm:$0xff] }
  0xc4   :  { %10824 = vst [vmem:[#allocation31_spill] sm:$0xff] %v7451_v61  ;;  %5475 = vrot.lane.b32.xlu1 %v7081_v0, %s6609_s23  ;;  %v363_v0 = vld [vmem:[%s10745_s0 + $0x7c] sm:$0xff] }
  0xc5   :  { %5470 = vrot.lane.b32.xlu0 %v5469_v55, %s6615_s22  ;;  %v5489_v49 = vpack.i.bf16 %v363_v0, %v362_v37  ;;  %v281_v37 = vld [vmem:[%s10745_s0 + $0x73] sm:$0xff] }
  0xc6   :  { %v7462_v13 = vpop.permute.xlu1 %5195 }
  0xc7   :  { %v7470_v55 = vpop.permute.xlu0 %836 }
  0xc8   :  { %10825 = vst [vmem:[#allocation32_spill] sm:$0xff] %v7470_v55  ;;  %5485 = vrot.lane.b32.xlu1 %v5459_v23, %s6610_s9  ;;  %v5499_v23 = vpack.i.bf16 %v525_v29, %v524_v48  ;;  %v445_v29 = vld [vmem:[%s10745_s0 + $0x85] sm:$0xff]  ;;  %v446_v48 = vld [vmem:[%s10745_s0 + $0x8d] sm:$0xff] }
  0xc9   :  { %5480 = vrot.lane.b32.xlu0 %v5479_v35, %s6612_s13  ;;  %v282_v35 = vld [vmem:[%s10745_s0 + $0x7b] sm:$0xff]  ;;  %v364_v55 = vld [vmem:[%s10745_s0 + $0x84] sm:$0xff] }
  0xca   :  { %v7474_v61 = vpop.permute.xlu1 %5205  ;;  %v5509_v0 = vpack.i.bf16 %v282_v35, %v281_v37  ;;  %v5524_v37 = vpack.i.bf16 %v446_v48, %v445_v29 }
  0xcb   :  { %v7482_v39 = vpop.permute.xlu0 %5200 }
  0xcc   :  { %5495 = vrot.lane.b32.xlu1 %v5494_v50, %s6613_s16 }
  0xcd   :  { %5490 = vrot.lane.b32.xlu0 %v5489_v49, %s6614_s17 }
  0xce   :  { %v7486_v57 = vpop.permute.xlu1 %5215 }
  0xcf   :  { %v7494_v5 = vpop.permute.xlu0 %5210 }
  0xd0   :  { %5505 = vrot.lane.b32.xlu1 %v6809_v2, %s6609_s23  ;;  %v365_v2 = vld [vmem:[%s10745_s0 + $0x8c] sm:$0xff] }
  0xd1   :  { %5500 = vrot.lane.b32.xlu0 %v5499_v23, %s6615_s22  ;;  %v5519_v35 = vpack.i.bf16 %v365_v2, %v364_v55  ;;  %v283_v55 = vld [vmem:[%s10745_s0 + $0x83] sm:$0xff] }
  0xd2   :  { %v7505_v50 = vpop.permute.xlu1 %5225 }
  0xd3   :  { %v7513_v23 = vpop.permute.xlu0 %5220 }
  0xd4   :  { %5515 = vrot.lane.b32.xlu1 %v5489_v49, %s6610_s9  ;;  %v5529_v49 = vpack.i.bf16 %v527_v10, %v526_v21  ;;  %v447_v10 = vld [vmem:[%s10745_s0 + $0x95] sm:$0xff]  ;;  %v448_v21 = vld [vmem:[%s10745_s0 + $0x9d] sm:$0xff] }
  0xd5   :  { %5510 = vrot.lane.b32.xlu0 %v5509_v0, %s6612_s13  ;;  %v284_v0 = vld [vmem:[%s10745_s0 + $0x8b] sm:$0xff] }
  0xd6   :  { %v7517_v33 = vpop.permute.xlu1 %5235  ;;  %v5539_v2 = vpack.i.bf16 %v284_v0, %v283_v55  ;;  %v5554_v55 = vpack.i.bf16 %v448_v21, %v447_v10 }
  0xd7   :  { %v7525_v32 = vpop.permute.xlu0 %5230 }
  0xd8   :  { %5525 = vrot.lane.b32.xlu1 %v5524_v37, %s6613_s16 }
  0xd9   :  { %5520 = vrot.lane.b32.xlu0 %v5519_v35, %s6614_s17 }
  0xda   :  { %v7529_v29 = vpop.permute.xlu1 %5245 }
  0xdb   :  { %v7537_v48 = vpop.permute.xlu0 %5240 }
  0xdc   :  { %5535 = vrot.lane.b32.xlu1 %v6807_v1, %s6609_s23  ;;  %v367_v1 = vld [vmem:[%s10745_s0 + $0x9c] sm:$0xff] }
  0xdd   :  { %5530 = vrot.lane.b32.xlu0 %v5529_v49, %s6615_s22  ;;  %v5549_v0 = vpack.i.bf16 %v367_v1, %v366_v17  ;;  %v285_v17 = vld [vmem:[%s10745_s0 + $0x93] sm:$0xff] }
  0xde   :  { %v7548_v37 = vpop.permute.xlu1 %5255 }
  0xdf   :  { %v7556_v49 = vpop.permute.xlu0 %5250 }
  0xe0   :  { %5545 = vrot.lane.b32.xlu1 %v5519_v35, %s6610_s9  ;;  %v5559_v35 = vpack.i.bf16 %v529_v62, %v528_v38  ;;  %v449_v62 = vld [vmem:[%s10745_s0 + $0xa5] sm:$0xff]  ;;  %v450_v38 = vld [vmem:[%s10745_s0 + $0xad] sm:$0xff] }
  0xe1   :  { %5540 = vrot.lane.b32.xlu0 %v5539_v2, %s6612_s13  ;;  %v286_v2 = vld [vmem:[%s10745_s0 + $0x9b] sm:$0xff] }
  0xe2   :  { %v7560_v24 = vpop.permute.xlu1 %5265  ;;  %v5569_v1 = vpack.i.bf16 %v286_v2, %v285_v17  ;;  %v5584_v17 = vpack.i.bf16 %v450_v38, %v449_v62 }
  0xe3   :  { %v7568_v18 = vpop.permute.xlu0 %5260 }
  0xe4   :  { %5555 = vrot.lane.b32.xlu1 %v5554_v55, %s6613_s16 }
  0xe5   :  { %5550 = vrot.lane.b32.xlu0 %v5549_v0, %s6614_s17 }
  0xe6   :  { %v7572_v10 = vpop.permute.xlu1 %5275 }
  0xe7   :  { %10826 = vst [vmem:[#allocation33_spill] sm:$0xff] %v7572_v10  ;;  %v7580_v21 = vpop.permute.xlu0 %5270 }
  0xe8   :  { %10827 = vst [vmem:[#allocation34_spill] sm:$0xff] %v7580_v21  ;;  %5565 = vrot.lane.b32.xlu1 %v6841_v14, %s6609_s23  ;;  %v369_v14 = vld [vmem:[%s10745_s0 + $0xac] sm:$0xff] }
  0xe9   :  { %5560 = vrot.lane.b32.xlu0 %v5559_v35, %s6615_s22  ;;  %v5579_v2 = vpack.i.bf16 %v369_v14, %v368_v9  ;;  %v287_v9 = vld [vmem:[%s10745_s0 + $0xa3] sm:$0xff] }
  0xea   :  { %v7591_v55 = vpop.permute.xlu1 %5285 }
  0xeb   :  { %10828 = vst [vmem:[#allocation35_spill] sm:$0xff] %v7591_v55  ;;  %v7599_v35 = vpop.permute.xlu0 %5280  ;;  %v530_v55 = vld [vmem:[%s10745_s0 + $0xa6] sm:$0xff] }
  0xec   :  { %10829 = vst [vmem:[#allocation36_spill] sm:$0xff] %v7599_v35  ;;  %5575 = vrot.lane.b32.xlu1 %v5549_v0, %s6610_s9  ;;  %v5589_v0 = vpack.i.bf16 %v531_v19, %v530_v55  ;;  %v451_v19 = vld [vmem:[%s10745_s0 + $0xb5] sm:$0xff]  ;;  %v452_v55 = vld [vmem:[%s10745_s0 + $0xbd] sm:$0xff] }
  0xed   :  { %5570 = vrot.lane.b32.xlu0 %v5569_v1, %s6612_s13  ;;  %v288_v1 = vld [vmem:[%s10745_s0 + $0xab] sm:$0xff] }
  0xee   :  { %v7603_v6 = vpop.permute.xlu1 %5295  ;;  %v5599_v14 = vpack.i.bf16 %v288_v1, %v287_v9  ;;  %v5614_v9 = vpack.i.bf16 %v452_v55, %v451_v19  ;;  %v5198_v19 = vunpack.i.h.bf16 %v7462_v13  ;;  %v5197_v55 = vunpack.i.l.bf16 %v7462_v13 }
  0xef   :  { %10830 = vst [vmem:[#allocation37_spill] sm:$0xff] %v7603_v6  ;;  %v7611_v27 = vpop.permute.xlu0 %5290 }
  0xf0   :  { %10831 = vst [vmem:[#allocation38_spill] sm:$0xff] %v7611_v27  ;;  %5585 = vrot.lane.b32.xlu1 %v5584_v17, %s6613_s16  ;;  %v533_v27 = vld [vmem:[%s10745_s0 + $0xbe] sm:$0xff] }
  0xf1   :  { %5580 = vrot.lane.b32.xlu0 %v5579_v2, %s6614_s17 }
  0xf2   :  { %v7615_v62 = vpop.permute.xlu1 %5305 }
  0xf3   :  { %10832 = vst [vmem:[#allocation39_spill] sm:$0xff] %v7615_v62  ;;  %v7623_v38 = vpop.permute.xlu0 %5300  ;;  %v370_v62 = vld [vmem:[%s10745_s0 + $0xb4] sm:$0xff] }
  0xf4   :  { %10833 = vst [vmem:[#allocation40_spill] sm:$0xff] %v7623_v38  ;;  %5595 = vrot.lane.b32.xlu1 %v6826_v8, %s6609_s23  ;;  %v371_v8 = vld [vmem:[%s10745_s0 + $0xbc] sm:$0xff]  ;;  %v4997_v38 = vunpack.i.l.bf16 %v7173_v41 }
  0xf5   :  { %5590 = vrot.lane.b32.xlu0 %v5589_v0, %s6615_s22  ;;  %v5609_v1 = vpack.i.bf16 %v371_v8, %v370_v62  ;;  %v25_v62 = vld [vmem:[%s10745_s0 + $0x8] sm:$0xff]  ;;  %v290_v8 = vld [vmem:[%s10745_s0 + $0xbb] sm:$0xff] }
  0xf6   :  { %v7634_v17 = vpop.permute.xlu1 %5315 }
  0xf7   :  { %10834 = vst [vmem:[#allocation41_spill] sm:$0xff] %v7634_v17  ;;  %v7642_v0 = vpop.permute.xlu0 %5310  ;;  %v532_v17 = vld [vmem:[%s10745_s0 + $0xb6] sm:$0xff] }
  0xf8   :  { %10835 = vst [vmem:[#allocation42_spill] sm:$0xff] %v7642_v0  ;;  %5605 = vrot.lane.b32.xlu1 %v5579_v2, %s6610_s9  ;;  %v4998_v0 = vunpack.i.h.bf16 %v7173_v41  ;;  %v24_v2 = vld [vmem:[%s10745_s0] sm:$0xff]  ;;  %v289_v41 = vld [vmem:[%s10745_s0 + $0xb3] sm:$0xff]  ;;  %v5619_v52 = vpack.i.bf16 %v533_v27, %v532_v17 }
  0xf9   :  { %5600 = vrot.lane.b32.xlu0 %v5599_v14, %s6612_s13  ;;  %v3030_v63 = vsel %vm3029_vm2, %v24_v2, %v4997_v38  ;;  %v5629_v60 = vpack.i.bf16 %v290_v8, %v289_v41 }
  0xfa   :  { %v5326_v6 = vpop.permute.xlu1 %5325  ;;  %v3112_v56 = vsel %vm3111_vm3, %v3030_v63, %v5197_v55  ;;  %v454_v63 = vld [vmem:[%s10745_s0 + $0xcd] sm:$0xff] }
  0xfb   :  { %v7657_v14 = vpop.permute.xlu0 %5320  ;;  %v5327_v35 = vunpack.i.l.bf16 %v5326_v6  ;;  %v534_v55 = vld [vmem:[%s10745_s0 + $0xc6] sm:$0xff] }
  0xfc   :  { %10836 = vst [vmem:[#allocation43_spill] sm:$0xff] %v7657_v14  ;;  %5615 = vrot.lane.b32.xlu1 %v5614_v9, %s6613_s16  ;;  %v5328_v14 = vunpack.i.h.bf16 %v5326_v6  ;;  %v3031_v9 = vsel %vm3029_vm2, %v25_v62, %v4998_v0  ;;  %v453_v6 = vld [vmem:[%s10745_s0 + $0xc5] sm:$0xff] }
  0xfd   :  { %5610 = vrot.lane.b32.xlu0 %v5609_v1, %s6614_s17  ;;  %v3113_v7 = vsel %vm3111_vm3, %v3031_v9, %v5198_v19  ;;  %v3194_v27 = vsel %vm3193_vm4, %v3112_v56, %v5327_v35  ;;  %v5644_v62 = vpack.i.bf16 %v454_v63, %v453_v6  ;;  %v26_v63 = vld [vmem:[%s10745_s0 + $0x10] sm:$0xff] }
  0xfe   :  { %v5336_v13 = vpop.permute.xlu1 %5335  ;;  %v3195_v38 = vsel %vm3193_vm4, %v3113_v7, %v5328_v14 }
  0xff   :  { %v5331_v10 = vpop.permute.xlu0 %5330  ;;  %v5338_v17 = vunpack.i.h.bf16 %v5336_v13  ;;  %v5337_v0 = vunpack.i.l.bf16 %v5336_v13 }
 0x100   :  { %v5333_v21 = vunpack.i.h.bf16 %v5331_v10  ;;  %v5332_v4 = vunpack.i.l.bf16 %v5331_v10  ;;  %5625 = vrot.lane.b32.xlu1 %v6855_v20, %s6609_s23  ;;  %v372_v20 = vld [vmem:[%s10745_s0 + $0xc4] sm:$0xff]  ;;  %v373_v10 = vld [vmem:[%s10745_s0 + $0xcc] sm:$0xff] }
 0x101   :  { %5620 = vrot.lane.b32.xlu0 %v5619_v52, %s6615_s22  ;;  %v5639_v19 = vpack.i.bf16 %v373_v10, %v372_v20  ;;  %v5202_v10 = vunpack.i.l.bf16 %v7482_v39 }
 0x102   :  { %v3276_v56 = vsel %vm3275_vm5, %v3194_v27, %v5332_v4  ;;  %v3277_v7 = vsel %vm3275_vm5, %v3195_v38, %v5333_v21  ;;  %v5346_v35 = vpop.permute.xlu1 %5345  ;;  %v535_v4 = vld [vmem:[%s10745_s0 + $0xce] sm:$0xff]  ;;  %v5003_v38 = vunpack.i.h.bf16 %v7181_v43 }
 0x103   :  { %v5341_v52 = vpop.permute.xlu0 %5340  ;;  %v5348_v41 = vunpack.i.h.bf16 %v5346_v35  ;;  %v5347_v21 = vunpack.i.l.bf16 %v5346_v35  ;;  %v3358_v8 = vsel %vm3357_vm6, %v3276_v56, %v5337_v0  ;;  %v3359_v13 = vsel %vm3357_vm6, %v3277_v7, %v5338_v17  ;;  %v292_v35 = vld [vmem:[%s10745_s0 + $0xcb] sm:$0xff] }
 0x104   :  { %v5343_v2 = vunpack.i.h.bf16 %v5341_v52  ;;  %v5342_v14 = vunpack.i.l.bf16 %v5341_v52  ;;  %5635 = vrot.lane.b32.xlu1 %v5609_v1, %s6610_s9  ;;  %v5002_v1 = vunpack.i.l.bf16 %v7181_v43  ;;  %v5649_v20 = vpack.i.bf16 %v535_v4, %v534_v55  ;;  %v291_v43 = vld [vmem:[%s10745_s0 + $0xc3] sm:$0xff] }
 0x105   :  { %5630 = vrot.lane.b32.xlu0 %v5629_v60, %s6612_s13  ;;  %v27_v60 = vld [vmem:[%s10745_s0 + $0x18] sm:$0xff]  ;;  %v5203_v17 = vunpack.i.h.bf16 %v7482_v39  ;;  %v5659_v51 = vpack.i.bf16 %v292_v35, %v291_v43 }
 0x106   :  { %v3440_v9 = vsel %vm3439_vm7, %v3358_v8, %v5342_v14  ;;  %v3441_v6 = vsel %vm3439_vm7, %v3359_v13, %v5343_v2  ;;  %v5356_v27 = vpop.permute.xlu1 %5355  ;;  %v3032_v39 = vsel %vm3029_vm2, %v26_v63, %v5002_v1  ;;  %v3033_v13 = vsel %vm3029_vm2, %v27_v60, %v5003_v38  ;;  %v455_v1 = vld [vmem:[%s10745_s0 + $0xd5] sm:$0xff] }
 0x107   :  { %v5351_v0 = vpop.permute.xlu0 %5350  ;;  %v5358_v52 = vunpack.i.h.bf16 %v5356_v27  ;;  %v5357_v2 = vunpack.i.l.bf16 %v5356_v27  ;;  %v3522_v14 = vsel %vm3521_vm8, %v3440_v9, %v5347_v21  ;;  %v3523_v55 = vsel %vm3521_vm8, %v3441_v6, %v5348_v41 }
 0x108   :  { %v5353_v56 = vunpack.i.h.bf16 %v5351_v0  ;;  %v5352_v7 = vunpack.i.l.bf16 %v5351_v0  ;;  %5645 = vrot.lane.b32.xlu1 %v5644_v62, %s6613_s16  ;;  %v3114_v27 = vsel %vm3111_vm3, %v3032_v39, %v5202_v10  ;;  %v3115_v21 = vsel %vm3111_vm3, %v3033_v13, %v5203_v17  ;;  %v456_v17 = vld [vmem:[%s10745_s0 + $0xdd] sm:$0xff] }
 0x109   :  { %5640 = vrot.lane.b32.xlu0 %v5639_v19, %s6614_s17  ;;  %v3196_v6 = vsel %vm3193_vm4, %v3114_v27, %v5357_v2  ;;  %v3197_v38 = vsel %vm3193_vm4, %v3115_v21, %v5358_v52  ;;  %v375_v10 = vld [vmem:[%s10745_s0 + $0xdc] sm:$0xff]  ;;  %v5674_v2 = vpack.i.bf16 %v456_v17, %v455_v1 }
 0x10a   :  { %v3604_v62 = vsel %vm3603_vm9, %v3522_v14, %v5352_v7  ;;  %v3605_v4 = vsel %vm3603_vm9, %v3523_v55, %v5353_v56  ;;  %v5366_v8 = vpop.permute.xlu1 %5365  ;;  %v536_v55 = vld [vmem:[%s10745_s0 + $0xd6] sm:$0xff]  ;;  %v537_v39 = vld [vmem:[%s10745_s0 + $0xde] sm:$0xff] }
 0x10b   :  { %v5361_v0 = vpop.permute.xlu0 %5360  ;;  %v3685_v31 = vpack.c.bf16 %v3605_v4, %v3604_v62  ;;  %v5368_v63 = vunpack.i.h.bf16 %v5366_v8  ;;  %v5367_v60 = vunpack.i.l.bf16 %v5366_v8 }
 0x10c   :  { %v5363_v41 = vunpack.i.h.bf16 %v5361_v0  ;;  %v5362_v9 = vunpack.i.l.bf16 %v5361_v0  ;;  %5655 = vrot.lane.b32.xlu1 %v6843_v15, %s6609_s23  ;;  %v374_v15 = vld [vmem:[%s10745_s0 + $0xd4] sm:$0xff] }
 0x10d   :  { %5650 = vrot.lane.b32.xlu0 %v5649_v20, %s6615_s22  ;;  %4807 = vmatmul.mubr.msk.bf16.vlgmr.msra.gmra.mxu0 %vm3753_vm10, %v3685_v31  ;;  %v10837_v20 = vmov 0.0   ;;  %v5669_v14 = vpack.i.bf16 %v375_v10, %v374_v15  ;;  %v294_v15 = vld [vmem:[%s10745_s0 + $0xdb] sm:$0xff] }
 0x10e   :  { %v3278_v56 = vsel %vm3275_vm5, %v3196_v6, %v5362_v9  ;;  %v3279_v7 = vsel %vm3275_vm5, %v3197_v38, %v5363_v41  ;;  %v5376_v43 = vpop.permute.xlu1 %5375  ;;  %4810 = vmatprep.mubr.msk.bf16.mxu0 %vm6611_vm1, %v10837_v20  ;;  %v5008_v41 = vunpack.i.h.bf16 %v7171_v40  ;;  %v28_v9 = vld [vmem:[%s10745_s0 + $0x20] sm:$0xff]  ;;  %v5679_v6 = vpack.i.bf16 %v537_v39, %v536_v55  ;;  %v29_v38 = vld [vmem:[%s10745_s0 + $0x28] sm:$0xff] }
 0x10f   :  { %v5371_v31 = vpop.permute.xlu0 %5370  ;;  %v5378_v62 = vunpack.i.h.bf16 %v5376_v43  ;;  %v5377_v4 = vunpack.i.l.bf16 %v5376_v43  ;;  %v3360_v8 = vsel %vm3357_vm6, %v3278_v56, %v5367_v60  ;;  %v3361_v13 = vsel %vm3357_vm6, %v3279_v7, %v5368_v63 }
 0x110   :  { %v5373_v35 = vunpack.i.h.bf16 %v5371_v31  ;;  %v5372_v52 = vunpack.i.l.bf16 %v5371_v31  ;;  %5665 = vrot.lane.b32.xlu1 %v5639_v19, %s6610_s9  ;;  %v5007_v19 = vunpack.i.l.bf16 %v7171_v40  ;;  %v5207_v63 = vunpack.i.l.bf16 %v7474_v61  ;;  %v293_v40 = vld [vmem:[%s10745_s0 + $0xd3] sm:$0xff] }
 0x111   :  { %5660 = vrot.lane.b32.xlu0 %v5659_v51, %s6612_s13  ;;  %v5208_v51 = vunpack.i.h.bf16 %v7474_v61 }
 0x112   :  { %v3442_v0 = vsel %vm3439_vm7, %v3360_v8, %v5372_v52  ;;  %v3443_v27 = vsel %vm3439_vm7, %v3361_v13, %v5373_v35  ;;  %v5386_v21 = vpop.permute.xlu1 %5385  ;;  %v3034_v61 = vsel %vm3029_vm2, %v28_v9, %v5007_v19  ;;  %v5689_v8 = vpack.i.bf16 %v294_v15, %v293_v40  ;;  %v457_v19 = vld [vmem:[%s10745_s0 + $0xe5] sm:$0xff] }
 0x113   :  { %v5381_v1 = vpop.permute.xlu0 %5380  ;;  %v5388_v10 = vunpack.i.h.bf16 %v5386_v21  ;;  %v5387_v56 = vunpack.i.l.bf16 %v5386_v21  ;;  %v3524_v7 = vsel %vm3521_vm8, %v3442_v0, %v5377_v4  ;;  %v3525_v43 = vsel %vm3521_vm8, %v3443_v27, %v5378_v62 }
 0x114   :  { %v5383_v60 = vunpack.i.h.bf16 %v5381_v1  ;;  %v5382_v17 = vunpack.i.l.bf16 %v5381_v1  ;;  %5675 = vrot.lane.b32.xlu1 %v5674_v2, %s6613_s16  ;;  %v3035_v2 = vsel %vm3029_vm2, %v29_v38, %v5008_v41  ;;  %v3116_v13 = vsel %vm3111_vm3, %v3034_v61, %v5207_v63  ;;  %v458_v1 = vld [vmem:[%s10745_s0 + $0xed] sm:$0xff] }
 0x115   :  { %5670 = vrot.lane.b32.xlu0 %v5669_v14, %s6614_s17  ;;  %v3117_v4 = vsel %vm3111_vm3, %v3035_v2, %v5208_v51  ;;  %v3198_v27 = vsel %vm3193_vm4, %v3116_v13, %v5387_v56  ;;  %v377_v38 = vld [vmem:[%s10745_s0 + $0xec] sm:$0xff]  ;;  %v5704_v15 = vpack.i.bf16 %v458_v1, %v457_v19  ;;  %v5212_v19 = vunpack.i.l.bf16 %v7494_v5 }
 0x116   :  { %v3606_v31 = vsel %vm3603_vm9, %v3524_v7, %v5382_v17  ;;  %v3607_v35 = vsel %vm3603_vm9, %v3525_v43, %v5383_v60  ;;  %v5396_v52 = vpop.permute.xlu1 %5395  ;;  %v3199_v21 = vsel %vm3193_vm4, %v3117_v4, %v5388_v10  ;;  %v538_v56 = vld [vmem:[%s10745_s0 + $0xe6] sm:$0xff]  ;;  %v539_v7 = vld [vmem:[%s10745_s0 + $0xee] sm:$0xff] }
 0x117   :  { %v5391_v55 = vpop.permute.xlu0 %5390  ;;  %v3686_v39 = vpack.c.bf16 %v3607_v35, %v3606_v31  ;;  %v5398_v41 = vunpack.i.h.bf16 %v5396_v52  ;;  %v5397_v9 = vunpack.i.l.bf16 %v5396_v52  ;;  %v30_v13 = vld [vmem:[%s10745_s0 + $0x30] sm:$0xff] }
 0x118   :  { %v5393_v0 = vunpack.i.h.bf16 %v5391_v55  ;;  %v5392_v62 = vunpack.i.l.bf16 %v5391_v55  ;;  %5685 = vrot.lane.b32.xlu1 %v6871_v26, %s6609_s23  ;;  %v376_v26 = vld [vmem:[%s10745_s0 + $0xe4] sm:$0xff] }
 0x119   :  { %5680 = vrot.lane.b32.xlu0 %v5679_v6, %s6615_s22  ;;  %4811 = vmatmul.mubr.msk.bf16.gmra.mxu0 %vm3753_vm10, %v3686_v39  ;;  %v5699_v10 = vpack.i.bf16 %v377_v38, %v376_v26  ;;  %v5013_v39 = vunpack.i.h.bf16 %v7179_v42 }
 0x11a   :  { %v3280_v51 = vsel %vm3275_vm5, %v3198_v27, %v5392_v62  ;;  %v3281_v63 = vsel %vm3275_vm5, %v3199_v21, %v5393_v0  ;;  %v5406_v60 = vpop.permute.xlu1 %5405  ;;  %4814 = vmatprep.mubr.msk.bf16.mxu0 %vm6611_vm1, %v10837_v20  ;;  %v5709_v0 = vpack.i.bf16 %v539_v7, %v538_v56  ;;  %v31_v62 = vld [vmem:[%s10745_s0 + $0x38] sm:$0xff] }
 0x11b   :  { %v5401_v6 = vpop.permute.xlu0 %5400  ;;  %v5408_v43 = vunpack.i.h.bf16 %v5406_v60  ;;  %v5407_v61 = vunpack.i.l.bf16 %v5406_v60  ;;  %v3362_v31 = vsel %vm3357_vm6, %v3280_v51, %v5397_v9  ;;  %v3363_v35 = vsel %vm3357_vm6, %v3281_v63, %v5398_v41  ;;  %v296_v41 = vld [vmem:[%s10745_s0 + $0xeb] sm:$0xff] }
 0x11c   :  { %v5403_v17 = vunpack.i.h.bf16 %v5401_v6  ;;  %v5402_v40 = vunpack.i.l.bf16 %v5401_v6  ;;  %5695 = vrot.lane.b32.xlu1 %v5669_v14, %s6610_s9  ;;  %v5012_v14 = vunpack.i.l.bf16 %v7179_v42  ;;  %v295_v42 = vld [vmem:[%s10745_s0 + $0xe3] sm:$0xff]  ;;  %v3037_v6 = vsel %vm3029_vm2, %v31_v62, %v5013_v39 }
 0x11d   :  { %5690 = vrot.lane.b32.xlu0 %v5689_v8, %s6612_s13  ;;  %v5213_v8 = vunpack.i.h.bf16 %v7494_v5  ;;  %v379_v39 = vld [vmem:[%s10745_s0 + $0xfc] sm:$0xff] }
 0x11e   :  { %v3444_v52 = vsel %vm3439_vm7, %v3362_v31, %v5402_v40  ;;  %v3445_v2 = vsel %vm3439_vm7, %v3363_v35, %v5403_v17  ;;  %v5416_v55 = vpop.permute.xlu1 %5415  ;;  %v3036_v5 = vsel %vm3029_vm2, %v30_v13, %v5012_v14  ;;  %v459_v31 = vld [vmem:[%s10745_s0 + $0xf5] sm:$0xff] }
 0x11f   :  { %v5411_v4 = vpop.permute.xlu0 %5410  ;;  %v5418_v9 = vunpack.i.h.bf16 %v5416_v55  ;;  %v5417_v1 = vunpack.i.l.bf16 %v5416_v55  ;;  %v3526_v26 = vsel %vm3521_vm8, %v3444_v52, %v5407_v61  ;;  %v3527_v38 = vsel %vm3521_vm8, %v3445_v2, %v5408_v43  ;;  %v460_v55 = vld [vmem:[%s10745_s0 + $0xfd] sm:$0xff] }
 0x120   :  { %v5413_v27 = vunpack.i.h.bf16 %v5411_v4  ;;  %v5412_v21 = vunpack.i.l.bf16 %v5411_v4  ;;  %5705 = vrot.lane.b32.xlu1 %v5704_v15, %s6613_s16  ;;  %v5719_v15 = vpack.i.bf16 %v296_v41, %v295_v42  ;;  %v3118_v56 = vsel %vm3111_vm3, %v3036_v5, %v5212_v19  ;;  %v239_v41 = vld [vmem:[%s10745_s0 + $0x1aa] sm:$0xff] }
 0x121   :  { %5700 = vrot.lane.b32.xlu0 %v5699_v10, %s6614_s17  ;;  %v3119_v7 = vsel %vm3111_vm3, %v3037_v6, %v5213_v8  ;;  %v3200_v35 = vsel %vm3193_vm4, %v3118_v56, %v5417_v1  ;;  %v238_v8 = vld [vmem:[%s10745_s0 + $0x1a2] sm:$0xff]  ;;  %v5018_v6 = vunpack.i.h.bf16 %v7189_v47 }
 0x122   :  { %v3608_v51 = vsel %vm3603_vm9, %v3526_v26, %v5412_v21  ;;  %v3609_v63 = vsel %vm3603_vm9, %v3527_v38, %v5413_v27  ;;  %v5426_v60 = vpop.permute.xlu1 %5425  ;;  %v3201_v14 = vsel %vm3193_vm4, %v3119_v7, %v5418_v9  ;;  %v5734_v21 = vpack.i.bf16 %v460_v55, %v459_v31  ;;  %v540_v9 = vld [vmem:[%s10745_s0 + $0xf6] sm:$0xff]  ;;  %v541_v1 = vld [vmem:[%s10745_s0 + $0xfe] sm:$0xff] }
 0x123   :  { %v5421_v17 = vpop.permute.xlu0 %5420  ;;  %v3687_v40 = vpack.c.bf16 %v3609_v63, %v3608_v51  ;;  %v5428_v52 = vunpack.i.h.bf16 %v5426_v60  ;;  %v5427_v2 = vunpack.i.l.bf16 %v5426_v60  ;;  %v5744_v7 = vpack.i.bf16 %v239_v41, %v238_v8 }
 0x124   :  { %v5423_v61 = vunpack.i.h.bf16 %v5421_v17  ;;  %v5422_v43 = vunpack.i.l.bf16 %v5421_v17  ;;  %5715 = vrot.lane.b32.xlu1 %v6869_v25, %s6609_s23  ;;  %v378_v25 = vld [vmem:[%s10745_s0 + $0xf4] sm:$0xff]  ;;  %v5017_v17 = vunpack.i.l.bf16 %v7189_v47  ;;  %v5217_v31 = vunpack.i.l.bf16 %v7486_v57 }
 0x125   :  { %5710 = vrot.lane.b32.xlu0 %v5709_v0, %s6615_s22  ;;  %4815 = vmatmul.mubr.msk.bf16.gmra.mxu0 %vm3753_vm10, %v3687_v40  ;;  %v7879_v42 = vpack.i.bf16 %v379_v39, %v378_v25  ;;  %v32_v40 = vld [vmem:[%s10745_s0 + $0x40] sm:$0xff]  ;;  %v240_v47 = vld [vmem:[%s10745_s0 + $0x1b2] sm:$0xff] }
 0x126   :  { %v3282_v13 = vsel %vm3275_vm5, %v3200_v35, %v5422_v43  ;;  %v3283_v4 = vsel %vm3275_vm5, %v3201_v14, %v5423_v61  ;;  %v5436_v62 = vpop.permute.xlu1 %5435  ;;  %4818 = vmatprep.mubr.msk.bf16.mxu0 %vm6611_vm1, %v10837_v20  ;;  %v5739_v61 = vpack.i.bf16 %v541_v1, %v540_v9  ;;  %v5218_v43 = vunpack.i.h.bf16 %v7486_v57 }
 0x127   :  { %v5431_v0 = vpop.permute.xlu0 %5430  ;;  %v5438_v26 = vunpack.i.h.bf16 %v5436_v62  ;;  %v5437_v38 = vunpack.i.l.bf16 %v5436_v62  ;;  %v3364_v5 = vsel %vm3357_vm6, %v3282_v13, %v5427_v2  ;;  %v3038_v62 = vsel %vm3029_vm2, %v32_v40, %v5017_v17 }
 0x128   :  { %v5433_v19 = vunpack.i.h.bf16 %v5431_v0  ;;  %v5432_v27 = vunpack.i.l.bf16 %v5431_v0  ;;  %5725 = vrot.lane.b32.xlu1 %v5699_v10, %s6610_s9  ;;  %v3365_v10 = vsel %vm3357_vm6, %v3283_v4, %v5428_v52  ;;  %v241_v52 = vld [vmem:[%s10745_s0 + $0x1ba] sm:$0xff] }
 0x129   :  { %5720 = vrot.lane.b32.xlu0 %v5719_v15, %s6612_s13  ;;  %v33_v15 = vld [vmem:[%s10745_s0 + $0x48] sm:$0xff] }
 0x12a   :  { %v3446_v51 = vsel %vm3439_vm7, %v3364_v5, %v5432_v27  ;;  %v3447_v63 = vsel %vm3439_vm7, %v3365_v10, %v5433_v19  ;;  %v5446_v60 = vpop.permute.xlu1 %5445  ;;  %v3039_v0 = vsel %vm3029_vm2, %v33_v15, %v5018_v6  ;;  %v7920_v27 = vpack.i.bf16 %v241_v52, %v240_v47  ;;  %v298_v6 = vld [vmem:[%s10745_s0 + $0xfb] sm:$0xff] }
 0x12b   :  { %v5441_v56 = vpop.permute.xlu0 %5440  ;;  %v5448_v2 = vunpack.i.h.bf16 %v5446_v60  ;;  %v5447_v55 = vunpack.i.l.bf16 %v5446_v60  ;;  %v3528_v25 = vsel %vm3521_vm8, %v3446_v51, %v5437_v38  ;;  %v3529_v39 = vsel %vm3521_vm8, %v3447_v63, %v5438_v26  ;;  %v321_v26 = vld [vmem:[%s10745_s0 + $0x1b3] sm:$0xff]  ;;  %v322_v63 = vld [vmem:[%s10745_s0 + $0x1bb] sm:$0xff] }
 0x12c   :  { %v5443_v35 = vunpack.i.h.bf16 %v5441_v56  ;;  %v5442_v14 = vunpack.i.l.bf16 %v5441_v56  ;;  %5735 = vrot.lane.b32.xlu1 %v5734_v21, %s6613_s16  ;;  %v3120_v21 = vsel %vm3111_vm3, %v3038_v62, %v5217_v31  ;;  %v3121_v41 = vsel %vm3111_vm3, %v3039_v0, %v5218_v43  ;;  %v297_v60 = vld [vmem:[%s10745_s0 + $0xf3] sm:$0xff] }
 0x12d   :  { %5730 = vrot.lane.b32.xlu0 %v7879_v42, %s6614_s17  ;;  %v3202_v38 = vsel %vm3193_vm4, %v3120_v21, %v5447_v55  ;;  %v3203_v5 = vsel %vm3193_vm4, %v3121_v41, %v5448_v2  ;;  %v5764_v43 = vpack.i.bf16 %v322_v63, %v321_v26  ;;  %v5759_v31 = vpack.i.bf16 %v298_v6, %v297_v60  ;;  %v34_v62 = vld [vmem:[%s10745_s0 + $0x50] sm:$0xff]  ;;  %v35_v0 = vld [vmem:[%s10745_s0 + $0x58] sm:$0xff]  ;;  %v380_v26 = vld [vmem:[%s10745_s0 + $0x104] sm:$0xff] }
 0x12e   :  { %v3610_v57 = vsel %vm3603_vm9, %v3528_v25, %v5442_v14  ;;  %v3611_v13 = vsel %vm3603_vm9, %v3529_v39, %v5443_v35  ;;  %v5456_v4 = vpop.permute.xlu1 %5455  ;;  %v402_v35 = vld [vmem:[%s10745_s0 + $0x1b4] sm:$0xff]  ;;  %v403_v14 = vld [vmem:[%s10745_s0 + $0x1bc] sm:$0xff]  ;;  %v5022_v25 = vunpack.i.l.bf16 %v7187_v44  ;;  %v5223_v21 = vunpack.i.h.bf16 %v7513_v23 }
 0x12f   :  { %v5451_v8 = vpop.permute.xlu0 %5450  ;;  %v3688_v19 = vpack.c.bf16 %v3611_v13, %v3610_v57  ;;  %v5458_v10 = vunpack.i.h.bf16 %v5456_v4  ;;  %v5457_v51 = vunpack.i.l.bf16 %v5456_v4  ;;  %v5023_v4 = vunpack.i.h.bf16 %v7187_v44 }
 0x130   :  { %v5453_v9 = vunpack.i.h.bf16 %v5451_v8  ;;  %v5452_v1 = vunpack.i.l.bf16 %v5451_v8  ;;  %5745 = vrot.lane.b32.xlu1 %v5744_v7, %s6607_s10  ;;  %v5222_v41 = vunpack.i.l.bf16 %v7513_v23  ;;  %v3040_v63 = vsel %vm3029_vm2, %v34_v62, %v5022_v25 }
 0x131   :  { %5740 = vrot.lane.b32.xlu0 %v5739_v61, %s6615_s22  ;;  %4819 = vmatmul.mubr.msk.bf16.gmra.mxu0 %vm3753_vm10, %v3688_v19  ;;  %v5774_v19 = vpack.i.bf16 %v403_v14, %v402_v35 }
 0x132   :  { %v3284_v17 = vsel %vm3275_vm5, %v3202_v38, %v5452_v1  ;;  %v3285_v40 = vsel %vm3275_vm5, %v3203_v5, %v5453_v9  ;;  %v5466_v56 = vpop.permute.xlu1 %5465  ;;  %4822 = vmatprep.mubr.msk.bf16.mxu0 %vm6611_vm1, %v10837_v20  ;;  %v405_v1 = vld [vmem:[%s10745_s0 + $0x1cc] sm:$0xff] }
 0x133   :  { %v5461_v7 = vpop.permute.xlu0 %5460  ;;  %v5468_v47 = vunpack.i.h.bf16 %v5466_v56  ;;  %v5467_v52 = vunpack.i.l.bf16 %v5466_v56  ;;  %v3366_v2 = vsel %vm3357_vm6, %v3284_v17, %v5457_v51  ;;  %v3367_v55 = vsel %vm3357_vm6, %v3285_v40, %v5458_v10  ;;  %v381_v38 = vld [vmem:[%s10745_s0 + $0x10c] sm:$0xff] }
 0x134   :  { %v5463_v61 = vunpack.i.h.bf16 %v5461_v7  ;;  %v5462_v15 = vunpack.i.l.bf16 %v5461_v7  ;;  %5755 = vrot.lane.b32.xlu1 %v7920_v27, %s6609_s23  ;;  %v3041_v40 = vsel %vm3029_vm2, %v35_v0, %v5023_v4 }
 0x135   :  { %5750 = vrot.lane.b32.xlu0 %v6897_v36, %s6609_s23  ;;  %v404_v36 = vld [vmem:[%s10745_s0 + $0x1c4] sm:$0xff]  ;;  %v3123_v35 = vsel %vm3111_vm3, %v3041_v40, %v5223_v21 }
 0x136   :  { %v3448_v39 = vsel %vm3439_vm7, %v3366_v2, %v5462_v15  ;;  %v3449_v57 = vsel %vm3439_vm7, %v3367_v55, %v5463_v61  ;;  %v5476_v13 = vpop.permute.xlu1 %5475  ;;  %v7989_v61 = vpack.i.bf16 %v405_v1, %v404_v36  ;;  %v7991_v15 = vpack.i.bf16 %v381_v38, %v380_v26  ;;  %v543_v1 = vld [vmem:[%s10745_s0 + $0x10e] sm:$0xff] }
 0x137   :  { %v5471_v8 = vpop.permute.xlu0 %5470  ;;  %v5478_v5 = vunpack.i.h.bf16 %v5476_v13  ;;  %v5477_v10 = vunpack.i.l.bf16 %v5476_v13  ;;  %v3530_v23 = vsel %vm3521_vm8, %v3448_v39, %v5467_v52  ;;  %v3531_v51 = vsel %vm3521_vm8, %v3449_v57, %v5468_v47  ;;  %v485_v47 = vld [vmem:[%s10745_s0 + $0x1c5] sm:$0xff]  ;;  %v486_v39 = vld [vmem:[%s10745_s0 + $0x1cd] sm:$0xff] }
 0x138   :  { %v5473_v9 = vunpack.i.h.bf16 %v5471_v8  ;;  %v5472_v44 = vunpack.i.l.bf16 %v5471_v8  ;;  %5765 = vrot.lane.b32.xlu1 %v5764_v43, %s6612_s13  ;;  %v3122_v43 = vsel %vm3111_vm3, %v3040_v63, %v5222_v41  ;;  %v461_v57 = vld [vmem:[%s10745_s0 + $0x105] sm:$0xff]  ;;  %v462_v13 = vld [vmem:[%s10745_s0 + $0x10d] sm:$0xff]  ;;  %v5794_v21 = vpack.i.bf16 %v486_v39, %v485_v47 }
 0x139   :  { %5760 = vrot.lane.b32.xlu0 %v5759_v31, %s6612_s13  ;;  %v3204_v52 = vsel %vm3193_vm4, %v3122_v43, %v5477_v10  ;;  %v3205_v2 = vsel %vm3193_vm4, %v3123_v35, %v5478_v5  ;;  %v566_v8 = vld [vmem:[%s10745_s0 + $0x1c6] sm:$0xff]  ;;  %v5789_v41 = vpack.i.bf16 %v462_v13, %v461_v57  ;;  %v5228_v35 = vunpack.i.h.bf16 %v7505_v50 }
 0x13a   :  { %v3612_v60 = vsel %vm3603_vm9, %v3530_v23, %v5472_v44  ;;  %v3613_v6 = vsel %vm3603_vm9, %v3531_v51, %v5473_v9  ;;  %v5486_v17 = vpop.permute.xlu1 %5485  ;;  %v567_v9 = vld [vmem:[%s10745_s0 + $0x1ce] sm:$0xff]  ;;  %v542_v44 = vld [vmem:[%s10745_s0 + $0x106] sm:$0xff] }
 0x13b   :  { %v5481_v56 = vpop.permute.xlu0 %5480  ;;  %v3689_v7 = vpack.c.bf16 %v3613_v6, %v3612_v60  ;;  %v5488_v55 = vunpack.i.h.bf16 %v5486_v17  ;;  %v5487_v25 = vunpack.i.l.bf16 %v5486_v17  ;;  %v5028_v60 = vunpack.i.h.bf16 %v7202_v54  ;;  %v37_v43 = vld [vmem:[%s10745_s0 + $0x68] sm:$0xff] }
 0x13c   :  { %v5483_v31 = vunpack.i.h.bf16 %v5481_v56  ;;  %v5482_v14 = vunpack.i.l.bf16 %v5481_v56  ;;  %5775 = vrot.lane.b32.xlu1 %v5774_v19, %s6610_s9  ;;  %v5027_v6 = vunpack.i.l.bf16 %v7202_v54  ;;  %v5804_v40 = vpack.i.bf16 %v567_v9, %v566_v8 }
 0x13d   :  { %5770 = vrot.lane.b32.xlu0 %v7879_v42, %s6610_s9  ;;  %4823 = vmatmul.mubr.msk.bf16.gmra.mxu0 %vm3753_vm10, %v3689_v7  ;;  %v5799_v56 = vpack.i.bf16 %v543_v1, %v542_v44  ;;  %v36_v7 = vld [vmem:[%s10745_s0 + $0x60] sm:$0xff]  ;;  %v300_v1 = vld [vmem:[%s10745_s0 + $0x10b] sm:$0xff] }
 0x13e   :  { %v3286_v4 = vsel %vm3275_vm5, %v3204_v52, %v5482_v14  ;;  %v3287_v62 = vsel %vm3275_vm5, %v3205_v2, %v5483_v31  ;;  %v5496_v0 = vpop.permute.xlu1 %5495  ;;  %4826 = vmatprep.mubr.msk.bf16.mxu0 %vm6611_vm1, %v10837_v20  ;;  %v5227_v31 = vunpack.i.l.bf16 %v7505_v50  ;;  %v3042_v13 = vsel %vm3029_vm2, %v36_v7, %v5027_v6 }
 0x13f   :  { %v5491_v42 = vpop.permute.xlu0 %5490  ;;  %v5498_v26 = vunpack.i.h.bf16 %v5496_v0  ;;  %v5497_v38 = vunpack.i.l.bf16 %v5496_v0  ;;  %v3368_v5 = vsel %vm3357_vm6, %v3286_v4, %v5487_v25  ;;  %v3369_v10 = vsel %vm3357_vm6, %v3287_v62, %v5488_v55 }
 0x140   :  { %v5493_v19 = vunpack.i.h.bf16 %v5491_v42  ;;  %v5492_v36 = vunpack.i.l.bf16 %v5491_v42  ;;  %5785 = vrot.lane.b32.xlu1 %v7989_v61, %s6614_s17  ;;  %v3043_v50 = vsel %vm3029_vm2, %v37_v43, %v5028_v60  ;;  %v3124_v0 = vsel %vm3111_vm3, %v3042_v13, %v5227_v31 }
 0x141   :  { %5780 = vrot.lane.b32.xlu0 %v7991_v15, %s6614_s17  ;;  %v3125_v42 = vsel %vm3111_vm3, %v3043_v50, %v5228_v35 }
 0x142   :  { %v3450_v23 = vsel %vm3439_vm7, %v3368_v5, %v5492_v36  ;;  %v3451_v51 = vsel %vm3439_vm7, %v3369_v10, %v5493_v19  ;;  %v5506_v63 = vpop.permute.xlu1 %5505  ;;  %v299_v36 = vld [vmem:[%s10745_s0 + $0x103] sm:$0xff] }
 0x143   :  { %v5501_v17 = vpop.permute.xlu0 %5500  ;;  %v5508_v54 = vunpack.i.h.bf16 %v5506_v63  ;;  %v5507_v52 = vunpack.i.l.bf16 %v5506_v63  ;;  %v3532_v2 = vsel %vm3521_vm8, %v3450_v23, %v5497_v38  ;;  %v3533_v55 = vsel %vm3521_vm8, %v3451_v51, %v5498_v26  ;;  %v242_v26 = vld [vmem:[%s10745_s0 + $0x1c2] sm:$0xff]  ;;  %v243_v38 = vld [vmem:[%s10745_s0 + $0x1ca] sm:$0xff] }
 0x144   :  { %v5503_v14 = vunpack.i.h.bf16 %v5501_v17  ;;  %v5502_v47 = vunpack.i.l.bf16 %v5501_v17  ;;  %5795 = vrot.lane.b32.xlu1 %v5794_v21, %s6613_s16  ;;  %v5824_v6 = vpack.i.bf16 %v300_v1, %v299_v36  ;;  %v8080_v17 = vpack.i.bf16 %v243_v38, %v242_v26 }
 0x145   :  { %5790 = vrot.lane.b32.xlu0 %v5789_v41, %s6613_s16  ;;  %v3206_v21 = vsel %vm3193_vm4, %v3124_v0, %v5507_v52  ;;  %v3207_v41 = vsel %vm3193_vm4, %v3125_v42, %v5508_v54  ;;  %v5033_v52 = vunpack.i.h.bf16 %v7199_v53 }
 0x146   :  { %v3614_v25 = vsel %vm3603_vm9, %v3532_v2, %v5502_v47  ;;  %v3615_v39 = vsel %vm3603_vm9, %v3533_v55, %v5503_v14  ;;  %v5516_v57 = vpop.permute.xlu1 %5515  ;;  %v38_v2 = vld [vmem:[%s10745_s0 + $0x70] sm:$0xff] }
 0x147   :  { %v5511_v4 = vpop.permute.xlu0 %5510  ;;  %v3690_v62 = vpack.c.bf16 %v3615_v39, %v3614_v25  ;;  %v5518_v9 = vunpack.i.h.bf16 %v5516_v57  ;;  %v5517_v44 = vunpack.i.l.bf16 %v5516_v57  ;;  %v39_v39 = vld [vmem:[%s10745_s0 + $0x78] sm:$0xff]  ;;  %v5232_v57 = vunpack.i.l.bf16 %v7525_v32 }
 0x148   :  { %v5513_v8 = vunpack.i.h.bf16 %v5511_v4  ;;  %v5512_v19 = vunpack.i.l.bf16 %v5511_v4  ;;  %5805 = vrot.lane.b32.xlu1 %v5804_v40, %s6615_s22  ;;  %v323_v40 = vld [vmem:[%s10745_s0 + $0x1c3] sm:$0xff] }
 0x149   :  { %5800 = vrot.lane.b32.xlu0 %v5799_v56, %s6615_s22  ;;  %4827 = vmatmul.mubr.msk.bf16.gmra.mxu0 %vm3753_vm10, %v3690_v62  ;;  %v324_v56 = vld [vmem:[%s10745_s0 + $0x1cb] sm:$0xff]  ;;  %v383_v4 = vld [vmem:[%s10745_s0 + $0x11c] sm:$0xff] }
 0x14a   :  { %v3288_v5 = vsel %vm3275_vm5, %v3206_v21, %v5512_v19  ;;  %v3289_v10 = vsel %vm3275_vm5, %v3207_v41, %v5513_v8  ;;  %v5526_v23 = vpop.permute.xlu1 %5525  ;;  %4830 = vmatprep.mubr.msk.bf16.mxu0 %vm6611_vm1, %v10837_v20  ;;  %v5829_v25 = vpack.i.bf16 %v324_v56, %v323_v40  ;;  %v3045_v41 = vsel %vm3029_vm2, %v39_v39, %v5033_v52  ;;  %v464_v40 = vld [vmem:[%s10745_s0 + $0x11d] sm:$0xff] }
 0x14b   :  { %v5521_v51 = vpop.permute.xlu0 %5520  ;;  %v5528_v7 = vunpack.i.h.bf16 %v5526_v23  ;;  %v5527_v43 = vunpack.i.l.bf16 %v5526_v23  ;;  %v3370_v35 = vsel %vm3357_vm6, %v3288_v5, %v5517_v44  ;;  %v3371_v31 = vsel %vm3357_vm6, %v3289_v10, %v5518_v9  ;;  %v463_v23 = vld [vmem:[%s10745_s0 + $0x115] sm:$0xff] }
 0x14c   :  { %v5523_v63 = vunpack.i.h.bf16 %v5521_v51  ;;  %v5522_v60 = vunpack.i.l.bf16 %v5521_v51  ;;  %5815 = vrot.lane.b32.xlu1 %v6882_v30, %s6609_s23  ;;  %v5032_v30 = vunpack.i.l.bf16 %v7199_v53  ;;  %v382_v53 = vld [vmem:[%s10745_s0 + $0x114] sm:$0xff]  ;;  %v407_v56 = vld [vmem:[%s10745_s0 + $0x1dc] sm:$0xff] }
 0x14d   :  { %5810 = vrot.lane.b32.xlu0 %v7920_v27, %s6607_s10  ;;  %v5233_v27 = vunpack.i.h.bf16 %v7525_v32  ;;  %v8119_v1 = vpack.i.bf16 %v383_v4, %v382_v53  ;;  %v544_v52 = vld [vmem:[%s10745_s0 + $0x116] sm:$0xff]  ;;  %v5037_v53 = vunpack.i.l.bf16 %v7227_v3 }
 0x14e   :  { %v3452_v14 = vsel %vm3439_vm7, %v3370_v35, %v5522_v60  ;;  %v3453_v47 = vsel %vm3439_vm7, %v3371_v31, %v5523_v63  ;;  %v5536_v54 = vpop.permute.xlu1 %5535  ;;  %v3044_v32 = vsel %vm3029_vm2, %v38_v2, %v5032_v30 }
 0x14f   :  { %v5531_v55 = vpop.permute.xlu0 %5530  ;;  %v5538_v62 = vunpack.i.h.bf16 %v5536_v54  ;;  %v5537_v0 = vunpack.i.l.bf16 %v5536_v54  ;;  %v3534_v42 = vsel %vm3521_vm8, %v3452_v14, %v5527_v43  ;;  %v3535_v8 = vsel %vm3521_vm8, %v3453_v47, %v5528_v7 }
 0x150   :  { %v5533_v13 = vunpack.i.h.bf16 %v5531_v55  ;;  %v5532_v50 = vunpack.i.l.bf16 %v5531_v55  ;;  %5825 = vrot.lane.b32.xlu1 %v5824_v6, %s6612_s13  ;;  %v3126_v26 = vsel %vm3111_vm3, %v3044_v32, %v5232_v57  ;;  %v3127_v38 = vsel %vm3111_vm3, %v3045_v41, %v5233_v27  ;;  %v545_v27 = vld [vmem:[%s10745_s0 + $0x11e] sm:$0xff]  ;;  %v487_v57 = vld [vmem:[%s10745_s0 + $0x1d5] sm:$0xff] }
 0x151   :  { %5820 = vrot.lane.b32.xlu0 %v8080_v17, %s6609_s23  ;;  %v3208_v51 = vsel %vm3193_vm4, %v3126_v26, %v5537_v0  ;;  %v3209_v63 = vsel %vm3193_vm4, %v3127_v38, %v5538_v62  ;;  %v5854_v47 = vpack.i.bf16 %v464_v40, %v463_v23  ;;  %v40_v0 = vld [vmem:[%s10745_s0 + $0x80] sm:$0xff]  ;;  %v5237_v32 = vunpack.i.l.bf16 %v7517_v33 }
 0x152   :  { %v3616_v19 = vsel %vm3603_vm9, %v3534_v42, %v5532_v50  ;;  %v3617_v36 = vsel %vm3603_vm9, %v3535_v8, %v5533_v13  ;;  %v5546_v21 = vpop.permute.xlu1 %5545  ;;  %v488_v13 = vld [vmem:[%s10745_s0 + $0x1dd] sm:$0xff]  ;;  %v5038_v50 = vunpack.i.h.bf16 %v7227_v3  ;;  %v41_v42 = vld [vmem:[%s10745_s0 + $0x88] sm:$0xff]  ;;  %v5238_v8 = vunpack.i.h.bf16 %v7517_v33 }
 0x153   :  { %v5541_v9 = vpop.permute.xlu0 %5540  ;;  %v3691_v44 = vpack.c.bf16 %v3617_v36, %v3616_v19  ;;  %v5548_v60 = vunpack.i.h.bf16 %v5546_v21  ;;  %v5547_v6 = vunpack.i.l.bf16 %v5546_v21  ;;  %v5864_v21 = vpack.i.bf16 %v545_v27, %v544_v52  ;;  %v568_v33 = vld [vmem:[%s10745_s0 + $0x1d6] sm:$0xff] }
 0x154   :  { %v5543_v5 = vunpack.i.h.bf16 %v5541_v9  ;;  %v5542_v10 = vunpack.i.l.bf16 %v5541_v9  ;;  %5835 = vrot.lane.b32.xlu1 %v7991_v15, %s6610_s9  ;;  %v406_v15 = vld [vmem:[%s10745_s0 + $0x1d4] sm:$0xff]  ;;  %v5859_v41 = vpack.i.bf16 %v488_v13, %v487_v57  ;;  %v3047_v23 = vsel %vm3029_vm2, %v41_v42, %v5038_v50 }
 0x155   :  { %5830 = vrot.lane.b32.xlu0 %v5829_v25, %s6612_s13  ;;  %4831 = vmatmul.mubr.msk.bf16.gmra.mxu0 %vm3753_vm10, %v3691_v44  ;;  %v8147_v54 = vpack.i.bf16 %v407_v56, %v406_v15  ;;  %v3129_v40 = vsel %vm3111_vm3, %v3047_v23, %v5238_v8  ;;  %v244_v52 = vld [vmem:[%s10745_s0 + $0x1d2] sm:$0xff]  ;;  %v326_v42 = vld [vmem:[%s10745_s0 + $0x1db] sm:$0xff] }
 0x156   :  { %v3290_v7 = vsel %vm3275_vm5, %v3208_v51, %v5542_v10  ;;  %v3291_v43 = vsel %vm3275_vm5, %v3209_v63, %v5543_v5  ;;  %v5556_v35 = vpop.permute.xlu1 %5555  ;;  %4834 = vmatprep.mubr.msk.bf16.mxu0 %vm6611_vm1, %v10837_v20  ;;  %v569_v5 = vld [vmem:[%s10745_s0 + $0x1de] sm:$0xff]  ;;  %v3046_v10 = vsel %vm3029_vm2, %v40_v0, %v5037_v53  ;;  %v325_v53 = vld [vmem:[%s10745_s0 + $0x1d3] sm:$0xff] }
 0x157   :  { %v5551_v31 = vpop.permute.xlu0 %5550  ;;  %v5558_v2 = vunpack.i.h.bf16 %v5556_v35  ;;  %v5557_v55 = vunpack.i.l.bf16 %v5556_v35  ;;  %v3372_v25 = vsel %vm3357_vm6, %v3290_v7, %v5547_v6  ;;  %v3373_v39 = vsel %vm3357_vm6, %v3291_v43, %v5548_v60  ;;  %v302_v8 = vld [vmem:[%s10745_s0 + $0x11b] sm:$0xff] }
 0x158   :  { %v5553_v30 = vunpack.i.h.bf16 %v5551_v31  ;;  %v5552_v14 = vunpack.i.l.bf16 %v5551_v31  ;;  %5845 = vrot.lane.b32.xlu1 %v8119_v1, %s6614_s17  ;;  %v3128_v6 = vsel %vm3111_vm3, %v3046_v10, %v5237_v32  ;;  %v5869_v35 = vpack.i.bf16 %v569_v5, %v568_v33 }
 0x159   :  { %5840 = vrot.lane.b32.xlu0 %v7989_v61, %s6610_s9  ;;  %v5043_v32 = vunpack.i.h.bf16 %v7219_v59  ;;  %v5894_v5 = vpack.i.bf16 %v326_v42, %v325_v53 }
 0x15a   :  { %v3454_v4 = vsel %vm3439_vm7, %v3372_v25, %v5552_v14  ;;  %v3455_v61 = vsel %vm3439_vm7, %v3373_v39, %v5553_v30  ;;  %v5566_v62 = vpop.permute.xlu1 %5565 }
 0x15b   :  { %v5561_v19 = vpop.permute.xlu0 %5560  ;;  %v5568_v9 = vunpack.i.h.bf16 %v5566_v62  ;;  %v5567_v44 = vunpack.i.l.bf16 %v5566_v62  ;;  %v3536_v26 = vsel %vm3521_vm8, %v3454_v4, %v5557_v55  ;;  %v3537_v38 = vsel %vm3521_vm8, %v3455_v61, %v5558_v2  ;;  %v245_v2 = vld [vmem:[%s10745_s0 + $0x1da] sm:$0xff] }
 0x15c   :  { %v5563_v36 = vunpack.i.h.bf16 %v5561_v19  ;;  %v5562_v3 = vunpack.i.l.bf16 %v5561_v19  ;;  %5855 = vrot.lane.b32.xlu1 %v5854_v47, %s6613_s16  ;;  %v8211_v50 = vpack.i.bf16 %v245_v2, %v244_v52  ;;  %v5042_v19 = vunpack.i.l.bf16 %v7219_v59 }
 0x15d   :  { %5850 = vrot.lane.b32.xlu0 %v8147_v54, %s6614_s17  ;;  %v3210_v31 = vsel %vm3193_vm4, %v3128_v6, %v5567_v44  ;;  %v3211_v30 = vsel %vm3193_vm4, %v3129_v40, %v5568_v9  ;;  %v43_v9 = vld [vmem:[%s10745_s0 + $0x98] sm:$0xff]  ;;  %v5243_v44 = vunpack.i.h.bf16 %v7537_v48 }
 0x15e   :  { %v3618_v51 = vsel %vm3603_vm9, %v3536_v26, %v5562_v3  ;;  %v3619_v63 = vsel %vm3603_vm9, %v3537_v38, %v5563_v36  ;;  %v5576_v60 = vpop.permute.xlu1 %5575  ;;  %v5242_v26 = vunpack.i.l.bf16 %v7537_v48  ;;  %v3049_v48 = vsel %vm3029_vm2, %v43_v9, %v5043_v32 }
 0x15f   :  { %v5571_v15 = vpop.permute.xlu0 %5570  ;;  %v3692_v56 = vpack.c.bf16 %v3619_v63, %v3618_v51  ;;  %v5578_v14 = vunpack.i.h.bf16 %v5576_v60  ;;  %v5577_v47 = vunpack.i.l.bf16 %v5576_v60  ;;  %v5047_v9 = vunpack.i.l.bf16 %v7251_v16 }
 0x160   :  { %v5573_v7 = vunpack.i.h.bf16 %v5571_v15  ;;  %v5572_v43 = vunpack.i.l.bf16 %v5571_v15  ;;  %5865 = vrot.lane.b32.xlu1 %v5864_v21, %s6615_s22 }
 0x161   :  { %5860 = vrot.lane.b32.xlu0 %v5859_v41, %s6613_s16  ;;  %4835 = vmatmul.mubr.msk.bf16.gmra.mxu0 %vm3753_vm10, %v3692_v56  ;;  %v42_v41 = vld [vmem:[%s10745_s0 + $0x90] sm:$0xff] }
 0x162   :  { %v3292_v55 = vsel %vm3275_vm5, %v3210_v31, %v5572_v43  ;;  %v3293_v25 = vsel %vm3275_vm5, %v3211_v30, %v5573_v7  ;;  %v5586_v39 = vpop.permute.xlu1 %5585  ;;  %4838 = vmatprep.mubr.msk.bf16.mxu0 %vm6611_vm1, %v10837_v20  ;;  %v3048_v6 = vsel %vm3029_vm2, %v42_v41, %v5042_v19  ;;  %v3131_v43 = vsel %vm3111_vm3, %v3049_v48, %v5243_v44 }
 0x163   :  { %v5581_v27 = vpop.permute.xlu0 %5580  ;;  %v5588_v4 = vunpack.i.h.bf16 %v5586_v39  ;;  %v5587_v61 = vunpack.i.l.bf16 %v5586_v39  ;;  %v3374_v62 = vsel %vm3357_vm6, %v3292_v55, %v5577_v47  ;;  %v3375_v0 = vsel %vm3357_vm6, %v3293_v25, %v5578_v14  ;;  %v409_v25 = vld [vmem:[%s10745_s0 + $0x1ec] sm:$0xff]  ;;  %v384_v39 = vld [vmem:[%s10745_s0 + $0x124] sm:$0xff] }
 0x164   :  { %v5583_v57 = vunpack.i.h.bf16 %v5581_v27  ;;  %v5582_v13 = vunpack.i.l.bf16 %v5581_v27  ;;  %5875 = vrot.lane.b32.xlu1 %v8080_v17, %s6607_s10  ;;  %v301_v17 = vld [vmem:[%s10745_s0 + $0x113] sm:$0xff]  ;;  %v3130_v7 = vsel %vm3111_vm3, %v3048_v6, %v5242_v26  ;;  %v5048_v41 = vunpack.i.h.bf16 %v7251_v16 }
 0x165   :  { %5870 = vrot.lane.b32.xlu0 %v5869_v35, %s6615_s22  ;;  %v5889_v10 = vpack.i.bf16 %v302_v8, %v301_v17  ;;  %v385_v27 = vld [vmem:[%s10745_s0 + $0x12c] sm:$0xff] }
 0x166   :  { %v3456_v36 = vsel %vm3439_vm7, %v3374_v62, %v5582_v13  ;;  %v3457_v3 = vsel %vm3439_vm7, %v3375_v0, %v5583_v57  ;;  %v5596_v21 = vpop.permute.xlu1 %5595  ;;  %v8277_v42 = vpack.i.bf16 %v385_v27, %v384_v39  ;;  %v489_v17 = vld [vmem:[%s10745_s0 + $0x1e5] sm:$0xff] }
 0x167   :  { %v5591_v38 = vpop.permute.xlu0 %5590  ;;  %v5598_v23 = vunpack.i.h.bf16 %v5596_v21  ;;  %v5597_v51 = vunpack.i.l.bf16 %v5596_v21  ;;  %v3538_v63 = vsel %vm3521_vm8, %v3456_v36, %v5587_v61  ;;  %v3539_v60 = vsel %vm3521_vm8, %v3457_v3, %v5588_v4  ;;  %v465_v3 = vld [vmem:[%s10745_s0 + $0x125] sm:$0xff]  ;;  %v466_v21 = vld [vmem:[%s10745_s0 + $0x12d] sm:$0xff] }
 0x168   :  { %v5593_v33 = vunpack.i.h.bf16 %v5591_v38  ;;  %v5592_v59 = vunpack.i.l.bf16 %v5591_v38  ;;  %5885 = vrot.lane.b32.xlu1 %v8211_v50, %s6609_s23  ;;  %v44_v38 = vld [vmem:[%s10745_s0 + $0xa0] sm:$0xff] }
 0x169   :  { %5880 = vrot.lane.b32.xlu0 %v6923_v46, %s6609_s23  ;;  %v408_v46 = vld [vmem:[%s10745_s0 + $0x1e4] sm:$0xff]  ;;  %v3212_v47 = vsel %vm3193_vm4, %v3130_v7, %v5597_v51  ;;  %v3213_v52 = vsel %vm3193_vm4, %v3131_v43, %v5598_v23  ;;  %v547_v7 = vld [vmem:[%s10745_s0 + $0x12e] sm:$0xff]  ;;  %v3050_v43 = vsel %vm3029_vm2, %v44_v38, %v5047_v9  ;;  %v5052_v38 = vunpack.i.l.bf16 %v7243_v11 }
 0x16a   :  { %v3620_v40 = vsel %vm3603_vm9, %v3538_v63, %v5592_v59  ;;  %v3621_v15 = vsel %vm3603_vm9, %v3539_v60, %v5593_v33  ;;  %v5606_v56 = vpop.permute.xlu1 %5605  ;;  %v8275_v0 = vpack.i.bf16 %v409_v25, %v408_v46  ;;  %v45_v33 = vld [vmem:[%s10745_s0 + $0xa8] sm:$0xff]  ;;  %v5248_v59 = vunpack.i.h.bf16 %v7529_v29 }
 0x16b   :  { %v5601_v35 = vpop.permute.xlu0 %5600  ;;  %v3693_v31 = vpack.c.bf16 %v3621_v15, %v3620_v40  ;;  %v5608_v2 = vunpack.i.h.bf16 %v5606_v56  ;;  %v5607_v55 = vunpack.i.l.bf16 %v5606_v56  ;;  %v5919_v63 = vpack.i.bf16 %v466_v21, %v465_v3  ;;  %v570_v60 = vld [vmem:[%s10745_s0 + $0x1e6] sm:$0xff] }
 0x16c   :  { %v5603_v30 = vunpack.i.h.bf16 %v5601_v35  ;;  %v5602_v14 = vunpack.i.l.bf16 %v5601_v35  ;;  %5895 = vrot.lane.b32.xlu1 %v5894_v5, %s6612_s13  ;;  %v5247_v5 = vunpack.i.l.bf16 %v7529_v29  ;;  %v571_v29 = vld [vmem:[%s10745_s0 + $0x1ee] sm:$0xff]  ;;  %v546_v56 = vld [vmem:[%s10745_s0 + $0x126] sm:$0xff]  ;;  %v3051_v35 = vsel %vm3029_vm2, %v45_v33, %v5048_v41 }
 0x16d   :  { %5890 = vrot.lane.b32.xlu0 %v5889_v10, %s6612_s13  ;;  %4839 = vmatmul.mubr.msk.bf16.gmra.mxu0 %vm3753_vm10, %v3693_v31  ;;  %v5934_v39 = vpack.i.bf16 %v571_v29, %v570_v60  ;;  %v5929_v27 = vpack.i.bf16 %v547_v7, %v546_v56  ;;  %v304_v9 = vld [vmem:[%s10745_s0 + $0x12b] sm:$0xff] }
 0x16e   :  { %v3294_v57 = vsel %vm3275_vm5, %v3212_v47, %v5602_v14  ;;  %v3295_v13 = vsel %vm3275_vm5, %v3213_v52, %v5603_v30  ;;  %v5616_v53 = vpop.permute.xlu1 %5615  ;;  %4842 = vmatprep.mubr.msk.bf16.mxu0 %vm6611_vm1, %v10837_v20  ;;  %v3132_v46 = vsel %vm3111_vm3, %v3050_v43, %v5247_v5  ;;  %v3133_v47 = vsel %vm3111_vm3, %v3051_v35, %v5248_v59 }
 0x16f   :  { %v5611_v4 = vpop.permute.xlu0 %5610  ;;  %v5618_v8 = vunpack.i.h.bf16 %v5616_v53  ;;  %v5617_v32 = vunpack.i.l.bf16 %v5616_v53  ;;  %v3376_v19 = vsel %vm3357_vm6, %v3294_v57, %v5607_v55  ;;  %v3377_v36 = vsel %vm3357_vm6, %v3295_v13, %v5608_v2 }
 0x170   :  { %v5613_v61 = vunpack.i.h.bf16 %v5611_v4  ;;  %v5612_v62 = vunpack.i.l.bf16 %v5611_v4  ;;  %5905 = vrot.lane.b32.xlu1 %v8147_v54, %s6610_s9  ;;  %v490_v54 = vld [vmem:[%s10745_s0 + $0x1ed] sm:$0xff] }
 0x171   :  { %5900 = vrot.lane.b32.xlu0 %v8119_v1, %s6610_s9  ;;  %v5924_v51 = vpack.i.bf16 %v490_v54, %v489_v17 }
 0x172   :  { %v3458_v44 = vsel %vm3439_vm7, %v3376_v19, %v5612_v62  ;;  %v3459_v1 = vsel %vm3439_vm7, %v3377_v36, %v5613_v61  ;;  %v5626_v26 = vpop.permute.xlu1 %5625  ;;  %v303_v36 = vld [vmem:[%s10745_s0 + $0x123] sm:$0xff] }
 0x173   :  { %v5621_v10 = vpop.permute.xlu0 %5620  ;;  %v5628_v6 = vunpack.i.h.bf16 %v5626_v26  ;;  %v5627_v48 = vunpack.i.l.bf16 %v5626_v26  ;;  %v3540_v40 = vsel %vm3521_vm8, %v3458_v44, %v5617_v32  ;;  %v3541_v15 = vsel %vm3521_vm8, %v3459_v1, %v5618_v8  ;;  %v246_v44 = vld [vmem:[%s10745_s0 + $0x1e2] sm:$0xff]  ;;  %v247_v1 = vld [vmem:[%s10745_s0 + $0x1ea] sm:$0xff] }
 0x174   :  { %v5623_v23 = vunpack.i.h.bf16 %v5621_v10  ;;  %v5622_v16 = vunpack.i.l.bf16 %v5621_v10  ;;  %5915 = vrot.lane.b32.xlu1 %v8275_v0, %s6614_s17  ;;  %v5053_v26 = vunpack.i.h.bf16 %v7243_v11  ;;  %v46_v10 = vld [vmem:[%s10745_s0 + $0xb0] sm:$0xff] }
 0x175   :  { %5910 = vrot.lane.b32.xlu0 %v8277_v42, %s6614_s17  ;;  %v3214_v57 = vsel %vm3193_vm4, %v3132_v46, %v5627_v48  ;;  %v3215_v13 = vsel %vm3193_vm4, %v3133_v47, %v5628_v6  ;;  %v5954_v6 = vpack.i.bf16 %v304_v9, %v303_v36  ;;  %v8370_v48 = vpack.i.bf16 %v247_v1, %v246_v44  ;;  %v467_v36 = vld [vmem:[%s10745_s0 + $0x135] sm:$0xff]  ;;  %v468_v9 = vld [vmem:[%s10745_s0 + $0x13d] sm:$0xff] }
 0x176   :  { %v3622_v31 = vsel %vm3603_vm9, %v3540_v40, %v5622_v16  ;;  %v3623_v30 = vsel %vm3603_vm9, %v3541_v15, %v5623_v23  ;;  %v5636_v14 = vpop.permute.xlu1 %5635  ;;  %v47_v23 = vld [vmem:[%s10745_s0 + $0xb8] sm:$0xff]  ;;  %v5253_v16 = vunpack.i.h.bf16 %v7556_v49  ;;  %v3052_v7 = vsel %vm3029_vm2, %v46_v10, %v5052_v38  ;;  %v49_v10 = vld [vmem:[%s10745_s0 + $0xc8] sm:$0xff] }
 0x177   :  { %v5631_v52 = vpop.permute.xlu0 %5630  ;;  %v3694_v2 = vpack.c.bf16 %v3623_v30, %v3622_v31  ;;  %v5638_v53 = vunpack.i.h.bf16 %v5636_v14  ;;  %v5637_v4 = vunpack.i.l.bf16 %v5636_v14  ;;  %v3053_v43 = vsel %vm3029_vm2, %v47_v23, %v5053_v26  ;;  %v411_v44 = vld [vmem:[%s10745_s0 + $0x1fc] sm:$0xff] }
 0x178   :  { %v5633_v55 = vunpack.i.h.bf16 %v5631_v52  ;;  %v5632_v25 = vunpack.i.l.bf16 %v5631_v52  ;;  %5925 = vrot.lane.b32.xlu1 %v5924_v51, %s6613_s16  ;;  %v5252_v51 = vunpack.i.l.bf16 %v7556_v49  ;;  %v327_v49 = vld [vmem:[%s10745_s0 + $0x1e3] sm:$0xff]  ;;  %v5058_v1 = vunpack.i.h.bf16 %v7267_v28 }
 0x179   :  { %5920 = vrot.lane.b32.xlu0 %v5919_v63, %s6613_s16  ;;  %4843 = vmatmul.mubr.msk.bf16.gmra.mxu0 %vm3753_vm10, %v3694_v2  ;;  %v5057_v26 = vunpack.i.l.bf16 %v7267_v28  ;;  %v5258_v23 = vunpack.i.h.bf16 %v7548_v37 }
 0x17a   :  { %v3296_v61 = vsel %vm3275_vm5, %v3214_v57, %v5632_v25  ;;  %v3297_v62 = vsel %vm3275_vm5, %v3215_v13, %v5633_v55  ;;  %v5646_v17 = vpop.permute.xlu1 %5645  ;;  %4846 = vmatprep.mubr.msk.bf16.mxu0 %vm6611_vm1, %v10837_v20  ;;  %v3134_v14 = vsel %vm3111_vm3, %v3052_v7, %v5252_v51  ;;  %v386_v13 = vld [vmem:[%s10745_s0 + $0x134] sm:$0xff] }
 0x17b   :  { %v5641_v8 = vpop.permute.xlu0 %5640  ;;  %v5648_v54 = vunpack.i.h.bf16 %v5646_v17  ;;  %v5647_v3 = vunpack.i.l.bf16 %v5646_v17  ;;  %v3378_v21 = vsel %vm3357_vm6, %v3296_v61, %v5637_v4  ;;  %v3379_v41 = vsel %vm3357_vm6, %v3297_v62, %v5638_v53  ;;  %v387_v53 = vld [vmem:[%s10745_s0 + $0x13c] sm:$0xff] }
 0x17c   :  { %v5643_v32 = vunpack.i.h.bf16 %v5641_v8  ;;  %v5642_v19 = vunpack.i.l.bf16 %v5641_v8  ;;  %5935 = vrot.lane.b32.xlu1 %v5934_v39, %s6615_s22 }
 0x17d   :  { %5930 = vrot.lane.b32.xlu0 %v5929_v27, %s6615_s22 }
 0x17e   :  { %v3460_v33 = vsel %vm3439_vm7, %v3378_v21, %v5642_v19  ;;  %v3461_v59 = vsel %vm3439_vm7, %v3379_v41, %v5643_v32  ;;  %v5656_v5 = vpop.permute.xlu1 %5655  ;;  %v8406_v19 = vpack.i.bf16 %v387_v53, %v386_v13  ;;  %v572_v13 = vld [vmem:[%s10745_s0 + $0x1f6] sm:$0xff]  ;;  %v573_v53 = vld [vmem:[%s10745_s0 + $0x1fe] sm:$0xff] }
 0x17f   :  { %v5651_v63 = vpop.permute.xlu0 %5650  ;;  %v5658_v40 = vunpack.i.h.bf16 %v5656_v5  ;;  %v5657_v15 = vunpack.i.l.bf16 %v5656_v5  ;;  %v3542_v29 = vsel %vm3521_vm8, %v3460_v33, %v5647_v3  ;;  %v3543_v56 = vsel %vm3521_vm8, %v3461_v59, %v5648_v54  ;;  %v48_v5 = vld [vmem:[%s10745_s0 + $0xc0] sm:$0xff] }
 0x180   :  { %v5653_v60 = vunpack.i.h.bf16 %v5651_v63  ;;  %v5652_v11 = vunpack.i.l.bf16 %v5651_v63  ;;  %5945 = vrot.lane.b32.xlu1 %v6921_v45, %s6609_s23  ;;  %v328_v45 = vld [vmem:[%s10745_s0 + $0x1eb] sm:$0xff]  ;;  %v3054_v7 = vsel %vm3029_vm2, %v48_v5, %v5057_v26  ;;  %v51_v5 = vld [vmem:[%s10745_s0 + $0xd8] sm:$0xff] }
 0x181   :  { %5940 = vrot.lane.b32.xlu0 %v8211_v50, %s6607_s10  ;;  %v3135_v50 = vsel %vm3111_vm3, %v3053_v43, %v5253_v16  ;;  %v5959_v55 = vpack.i.bf16 %v328_v45, %v327_v49  ;;  %v3216_v25 = vsel %vm3193_vm4, %v3134_v14, %v5657_v15  ;;  %v5257_v16 = vunpack.i.l.bf16 %v7548_v37  ;;  %v549_v37 = vld [vmem:[%s10745_s0 + $0x13e] sm:$0xff]  ;;  %v491_v49 = vld [vmem:[%s10745_s0 + $0x1f5] sm:$0xff] }
 0x182   :  { %v3624_v35 = vsel %vm3603_vm9, %v3542_v29, %v5652_v11  ;;  %v3625_v31 = vsel %vm3603_vm9, %v3543_v56, %v5653_v60  ;;  %v5666_v30 = vpop.permute.xlu1 %5665  ;;  %v3217_v39 = vsel %vm3193_vm4, %v3135_v50, %v5658_v40  ;;  %v5984_v60 = vpack.i.bf16 %v468_v9, %v467_v36  ;;  %v492_v45 = vld [vmem:[%s10745_s0 + $0x1fd] sm:$0xff]  ;;  %v248_v9 = vld [vmem:[%s10745_s0 + $0x1f2] sm:$0xff] }
 0x183   :  { %v5661_v46 = vpop.permute.xlu0 %5660  ;;  %v3695_v47 = vpack.c.bf16 %v3625_v31, %v3624_v35  ;;  %v5668_v27 = vunpack.i.h.bf16 %v5666_v30  ;;  %v5667_v57 = vunpack.i.l.bf16 %v5666_v30  ;;  %v3055_v43 = vsel %vm3029_vm2, %v49_v10, %v5058_v1 }
 0x184   :  { %v5663_v52 = vunpack.i.h.bf16 %v5661_v46  ;;  %v5662_v2 = vunpack.i.l.bf16 %v5661_v46  ;;  %5955 = vrot.lane.b32.xlu1 %v5954_v6, %s6612_s13  ;;  %v548_v6 = vld [vmem:[%s10745_s0 + $0x136] sm:$0xff]  ;;  %v3136_v30 = vsel %vm3111_vm3, %v3054_v7, %v5257_v16  ;;  %v3137_v14 = vsel %vm3111_vm3, %v3055_v43, %v5258_v23 }
 0x185   :  { %5950 = vrot.lane.b32.xlu0 %v8370_v48, %s6609_s23  ;;  %4847 = vmatmul.mubr.msk.bf16.gmra.mxu0 %vm3753_vm10, %v3695_v47  ;;  %v5999_v36 = vpack.i.bf16 %v573_v53, %v572_v13  ;;  %v5062_v1 = vunpack.i.l.bf16 %v7259_v22  ;;  %v5263_v10 = vunpack.i.h.bf16 %v7568_v18  ;;  %v5262_v23 = vunpack.i.l.bf16 %v7568_v18  ;;  %v330_v18 = vld [vmem:[%s10745_s0 + $0x1fb] sm:$0xff] }
 0x186   :  { %v3298_v4 = vsel %vm3275_vm5, %v3216_v25, %v5662_v2  ;;  %v3299_v61 = vsel %vm3275_vm5, %v3217_v39, %v5663_v52  ;;  %v5676_v62 = vpop.permute.xlu1 %5675  ;;  %4850 = vmatprep.mubr.msk.bf16.mxu0 %vm6611_vm1, %v10837_v20  ;;  %v5994_v2 = vpack.i.bf16 %v549_v37, %v548_v6 }
 0x187   :  { %v5671_v17 = vpop.permute.xlu0 %5670  ;;  %v5678_v54 = vunpack.i.h.bf16 %v5676_v62  ;;  %v5677_v3 = vunpack.i.l.bf16 %v5676_v62  ;;  %v3380_v21 = vsel %vm3357_vm6, %v3298_v4, %v5667_v57  ;;  %v3381_v41 = vsel %vm3357_vm6, %v3299_v61, %v5668_v27 }
 0x188   :  { %v5673_v8 = vunpack.i.h.bf16 %v5671_v17  ;;  %v5672_v32 = vunpack.i.l.bf16 %v5671_v17  ;;  %5965 = vrot.lane.b32.xlu1 %v8277_v42, %s6610_s9  ;;  %v410_v42 = vld [vmem:[%s10745_s0 + $0x1f4] sm:$0xff] }
 0x189   :  { %5960 = vrot.lane.b32.xlu0 %v5959_v55, %s6612_s13  ;;  %v8437_v11 = vpack.i.bf16 %v411_v44, %v410_v42  ;;  %v5989_v55 = vpack.i.bf16 %v492_v45, %v491_v49  ;;  %v249_v42 = vld [vmem:[%s10745_s0 + $0x1fa] sm:$0xff]  ;;  %v5063_v44 = vunpack.i.h.bf16 %v7259_v22 }
 0x18a   :  { %v3462_v38 = vsel %vm3439_vm7, %v3380_v21, %v5672_v32  ;;  %v3463_v33 = vsel %vm3439_vm7, %v3381_v41, %v5673_v8  ;;  %v5686_v59 = vpop.permute.xlu1 %5685 }
 0x18b   :  { %v5681_v51 = vpop.permute.xlu0 %5680  ;;  %v5688_v40 = vunpack.i.h.bf16 %v5686_v59  ;;  %v5687_v15 = vunpack.i.l.bf16 %v5686_v59  ;;  %v3544_v29 = vsel %vm3521_vm8, %v3462_v38, %v5677_v3  ;;  %v3545_v56 = vsel %vm3521_vm8, %v3463_v33, %v5678_v54  ;;  %v50_v59 = vld [vmem:[%s10745_s0 + $0xd0] sm:$0xff] }
 0x18c   :  { %v5683_v63 = vunpack.i.h.bf16 %v5681_v51  ;;  %v5682_v28 = vunpack.i.l.bf16 %v5681_v51  ;;  %5975 = vrot.lane.b32.xlu1 %v8406_v19, %s6614_s17  ;;  %v3057_v37 = vsel %vm3029_vm2, %v51_v5, %v5063_v44 }
 0x18d   :  { %5970 = vrot.lane.b32.xlu0 %v8275_v0, %s6610_s9  ;;  %v3218_v25 = vsel %vm3193_vm4, %v3136_v30, %v5687_v15  ;;  %v3219_v39 = vsel %vm3193_vm4, %v3137_v14, %v5688_v40 }
 0x18e   :  { %v3626_v35 = vsel %vm3603_vm9, %v3544_v29, %v5682_v28  ;;  %v3627_v0 = vsel %vm3603_vm9, %v3545_v56, %v5683_v63  ;;  %v5696_v31 = vpop.permute.xlu1 %5695  ;;  %v8501_v63 = vpack.i.bf16 %v249_v42, %v248_v9  ;;  %v329_v28 = vld [vmem:[%s10745_s0 + $0x1f3] sm:$0xff]  ;;  %v306_v29 = vld [vmem:[%s10745_s0 + $0x13b] sm:$0xff]  ;;  %v3056_v56 = vsel %vm3029_vm2, %v50_v59, %v5062_v1 }
 0x18f   :  { %v5691_v50 = vpop.permute.xlu0 %5690  ;;  %v3696_v46 = vpack.c.bf16 %v3627_v0, %v3626_v35  ;;  %v5698_v27 = vunpack.i.h.bf16 %v5696_v31  ;;  %v5697_v57 = vunpack.i.l.bf16 %v5696_v31  ;;  %v3138_v43 = vsel %vm3111_vm3, %v3056_v56, %v5262_v23  ;;  %v494_v59 = vld [vmem:[%s10745_s0 + $0x20d] sm:$0xff] }
 0x190   :  { %v5693_v47 = vunpack.i.h.bf16 %v5691_v50  ;;  %v5692_v52 = vunpack.i.l.bf16 %v5691_v50  ;;  %5985 = vrot.lane.b32.xlu1 %v5984_v60, %s6613_s16  ;;  %v3139_v35 = vsel %vm3111_vm3, %v3057_v37, %v5263_v10  ;;  %v6024_v50 = vpack.i.bf16 %v330_v18, %v329_v28  ;;  %v470_v23 = vld [vmem:[%s10745_s0 + $0x14d] sm:$0xff]  ;;  %v52_v37 = vld [vmem:[%s10745_s0 + $0xe0] sm:$0xff] }
 0x191   :  { %5980 = vrot.lane.b32.xlu0 %v8437_v11, %s6614_s17  ;;  %4851 = vmatmul.mubr.msk.bf16.gmra.mxu0 %vm3753_vm10, %v3696_v46  ;;  %v5127_v18 = vunpack.i.l.bf16 %v7365_v12  ;;  %v551_v56 = vld [vmem:[%s10745_s0 + $0x14e] sm:$0xff] }
 0x192   :  { %v3300_v4 = vsel %vm3275_vm5, %v3218_v25, %v5692_v52  ;;  %v3301_v61 = vsel %vm3275_vm5, %v3219_v39, %v5693_v47  ;;  %v5706_v62 = vpop.permute.xlu1 %5705  ;;  %4854 = vmatprep.mubr.msk.bf16.mxu0 %vm6611_vm1, %v10837_v20 }
 0x193   :  { %v5701_v17 = vpop.permute.xlu0 %5700  ;;  %v5708_v54 = vunpack.i.h.bf16 %v5706_v62  ;;  %v5707_v3 = vunpack.i.l.bf16 %v5706_v62  ;;  %v3382_v21 = vsel %vm3357_vm6, %v3300_v4, %v5697_v57  ;;  %v3383_v41 = vsel %vm3357_vm6, %v3301_v61, %v5698_v27 }
 0x194   :  { %v5703_v8 = vunpack.i.h.bf16 %v5701_v17  ;;  %v5702_v32 = vunpack.i.l.bf16 %v5701_v17  ;;  %5995 = vrot.lane.b32.xlu1 %v5994_v2, %s6615_s22  ;;  %v412_v17 = vld [vmem:[%s10745_s0 + $0x204] sm:$0xff] }
 0x195   :  { %5990 = vrot.lane.b32.xlu0 %v5989_v55, %s6613_s16 }
 0x196   :  { %v3464_v26 = vsel %vm3439_vm7, %v3382_v21, %v5702_v32  ;;  %v3465_v38 = vsel %vm3439_vm7, %v3383_v41, %v5703_v8  ;;  %v5716_v33 = vpop.permute.xlu1 %5715  ;;  %v413_v8 = vld [vmem:[%s10745_s0 + $0x20c] sm:$0xff] }
 0x197   :  { %v5711_v16 = vpop.permute.xlu0 %5710  ;;  %v5718_v60 = vunpack.i.h.bf16 %v5716_v33  ;;  %v5717_v6 = vunpack.i.l.bf16 %v5716_v33  ;;  %v3546_v40 = vsel %vm3521_vm8, %v3464_v26, %v5707_v3  ;;  %v3547_v15 = vsel %vm3521_vm8, %v3465_v38, %v5708_v54  ;;  %v388_v3 = vld [vmem:[%s10745_s0 + $0x144] sm:$0xff]  ;;  %v389_v21 = vld [vmem:[%s10745_s0 + $0x14c] sm:$0xff] }
 0x198   :  { %v5713_v51 = vunpack.i.h.bf16 %v5711_v16  ;;  %v5712_v22 = vunpack.i.l.bf16 %v5711_v16  ;;  %6005 = vrot.lane.b32.xlu1 %v8370_v48, %s6607_s10  ;;  %v305_v48 = vld [vmem:[%s10745_s0 + $0x133] sm:$0xff]  ;;  %v8557_v44 = vpack.i.bf16 %v413_v8, %v412_v17  ;;  %v8563_v38 = vpack.i.bf16 %v389_v21, %v388_v3  ;;  %v493_v33 = vld [vmem:[%s10745_s0 + $0x205] sm:$0xff] }
 0x199   :  { %6000 = vrot.lane.b32.xlu0 %v5999_v36, %s6615_s22  ;;  %v6019_v46 = vpack.i.bf16 %v306_v29, %v305_v48  ;;  %v3220_v47 = vsel %vm3193_vm4, %v3138_v43, %v5717_v6  ;;  %v3221_v52 = vsel %vm3193_vm4, %v3139_v35, %v5718_v60  ;;  %v574_v60 = vld [vmem:[%s10745_s0 + $0x206] sm:$0xff]  ;;  %v575_v6 = vld [vmem:[%s10745_s0 + $0x20e] sm:$0xff] }
 0x19a   :  { %v3628_v49 = vsel %vm3603_vm9, %v3546_v40, %v5712_v22  ;;  %v3629_v45 = vsel %vm3603_vm9, %v3547_v15, %v5713_v51  ;;  %v5726_v7 = vpop.permute.xlu1 %5725  ;;  %v6054_v22 = vpack.i.bf16 %v494_v59, %v493_v33  ;;  %v5068_v40 = vunpack.i.h.bf16 %v7279_v34  ;;  %v550_v29 = vld [vmem:[%s10745_s0 + $0x146] sm:$0xff] }
 0x19b   :  { %v5721_v0 = vpop.permute.xlu0 %5720  ;;  %v3697_v31 = vpack.c.bf16 %v3629_v45, %v3628_v49  ;;  %v5728_v2 = vunpack.i.h.bf16 %v5726_v7  ;;  %v5727_v55 = vunpack.i.l.bf16 %v5726_v7  ;;  %v5067_v15 = vunpack.i.l.bf16 %v7279_v34  ;;  %v53_v34 = vld [vmem:[%s10745_s0 + $0xe8] sm:$0xff]  ;;  %v76_v45 = vld [vmem:[%s10745_s0 + $0x1a0] sm:$0xff] }
 0x19c   :  { %v5723_v30 = vunpack.i.h.bf16 %v5721_v0  ;;  %v5722_v14 = vunpack.i.l.bf16 %v5721_v0  ;;  %6015 = vrot.lane.b32.xlu1 %v8501_v63, %s6609_s23  ;;  %v5128_v49 = vunpack.i.h.bf16 %v7365_v12  ;;  %v5267_v7 = vunpack.i.l.bf16 %v7560_v24  ;;  %v77_v35 = vld [vmem:[%s10745_s0 + $0x1a8] sm:$0xff] }
 0x19d   :  { %6010 = vrot.lane.b32.xlu0 %v6952_v58, %s6609_s23  ;;  %4855 = vmatmul.mubr.msk.bf16.gmra.mxu0 %vm3753_vm10, %v3697_v31  ;;  %v5268_v0 = vunpack.i.h.bf16 %v7560_v24  ;;  %v6064_v31 = vpack.i.bf16 %v575_v6, %v574_v60  ;;  %v6059_v12 = vpack.i.bf16 %v551_v56, %v550_v29  ;;  %v3082_v24 = vsel %vm3029_vm2, %v76_v45, %v5127_v18 }
 0x19e   :  { %v3302_v25 = vsel %vm3275_vm5, %v3220_v47, %v5722_v14  ;;  %v3303_v39 = vsel %vm3275_vm5, %v3221_v52, %v5723_v30  ;;  %v5736_v27 = vpop.permute.xlu1 %5735  ;;  %4858 = vmatprep.mubr.msk.bf16.mxu0 %vm6611_vm1, %v10837_v20  ;;  %v307_v30 = vld [vmem:[%s10745_s0 + $0x143] sm:$0xff]  ;;  %v308_v14 = vld [vmem:[%s10745_s0 + $0x14b] sm:$0xff] }
 0x19f   :  { %v5731_v57 = vpop.permute.xlu0 %5730  ;;  %v5738_v4 = vunpack.i.h.bf16 %v5736_v27  ;;  %v5737_v61 = vunpack.i.l.bf16 %v5736_v27  ;;  %v3384_v62 = vsel %vm3357_vm6, %v3302_v25, %v5727_v55  ;;  %v3385_v58 = vsel %vm3357_vm6, %v3303_v39, %v5728_v2  ;;  %v250_v52 = vld [vmem:[%s10745_s0 + $0x202] sm:$0xff]  ;;  %v251_v2 = vld [vmem:[%s10745_s0 + $0x20a] sm:$0xff] }
 0x1a0   :  { %v5733_v13 = vunpack.i.h.bf16 %v5731_v57  ;;  %v5732_v53 = vunpack.i.l.bf16 %v5731_v57  ;;  %6025 = vrot.lane.b32.xlu1 %v6024_v50, %s6612_s13  ;;  %v3058_v50 = vsel %vm3029_vm2, %v52_v37, %v5067_v15  ;;  %v8644_v55 = vld [vmem:[%s10745_s0 + $0x203] sm:$0xff]  ;;  %v3083_v25 = vsel %vm3029_vm2, %v77_v35, %v5128_v49 }
 0x1a1   :  { %6020 = vrot.lane.b32.xlu0 %v6019_v46, %s6612_s13  ;;  %v3059_v46 = vsel %vm3029_vm2, %v53_v34, %v5068_v40  ;;  %v3140_v39 = vsel %vm3111_vm3, %v3058_v50, %v5267_v7 }
 0x1a2   :  { %v3466_v32 = vsel %vm3439_vm7, %v3384_v62, %v5732_v53  ;;  %v3467_v36 = vsel %vm3439_vm7, %v3385_v58, %v5733_v13  ;;  %v8547_v54 = vpop.permute.xlu1 %5745  ;;  %v8653_v53 = vld [vmem:[%s10745_s0 + $0x20b] sm:$0xff]  ;;  %v3141_v62 = vsel %vm3111_vm3, %v3059_v46, %v5268_v0 }
 0x1a3   :  { %v5741_v41 = vpop.permute.xlu0 %5740  ;;  %v3548_v1 = vsel %vm3521_vm8, %v3466_v32, %v5737_v61  ;;  %v3549_v26 = vsel %vm3521_vm8, %v3467_v36, %v5738_v4  ;;  %v5748_v27 = vunpack.i.h.bf16 %v8547_v54  ;;  %v5747_v57 = vunpack.i.l.bf16 %v8547_v54  ;;  %v390_v4 = vld [vmem:[%s10745_s0 + $0x154] sm:$0xff]  ;;  %v391_v61 = vld [vmem:[%s10745_s0 + $0x15c] sm:$0xff] }
 0x1a4   :  { %v5743_v9 = vunpack.i.h.bf16 %v5741_v41  ;;  %v5742_v42 = vunpack.i.l.bf16 %v5741_v41  ;;  %6035 = vrot.lane.b32.xlu1 %v8437_v11, %s6610_s9  ;;  %v6084_v36 = vpack.i.bf16 %v308_v14, %v307_v30  ;;  %v8668_v54 = vpack.i.bf16 %v251_v2, %v250_v52 }
 0x1a5   :  { %6030 = vrot.lane.b32.xlu0 %v8406_v19, %s6610_s9  ;;  %v469_v19 = vld [vmem:[%s10745_s0 + $0x145] sm:$0xff]  ;;  %v6089_v21 = vpack.i.bf16 %v8653_v53, %v8644_v55  ;;  %v8672_v41 = vpack.i.bf16 %v391_v61, %v390_v4  ;;  %v471_v61 = vld [vmem:[%s10745_s0 + $0x155] sm:$0xff] }
 0x1a6   :  { %v3630_v11 = vsel %vm3603_vm9, %v3548_v1, %v5742_v42  ;;  %v3631_v5 = vsel %vm3603_vm9, %v3549_v26, %v5743_v9  ;;  %v8573_v10 = vpop.permute.xlu1 %5755  ;;  %v6049_v28 = vpack.i.bf16 %v470_v23, %v469_v19  ;;  %v3164_v9 = vsel %vm3111_vm3, %v3082_v24, %v5747_v57  ;;  %v10838_v19 = vld [vmem:[#allocation2_spill] sm:$0xff] }
 0x1a7   :  { %v8581_v16 = vpop.permute.xlu0 %5750  ;;  %v3698_v51 = vpack.c.bf16 %v3631_v5, %v3630_v11  ;;  %v5758_v58 = vunpack.i.h.bf16 %v8573_v10  ;;  %v5757_v17 = vunpack.i.l.bf16 %v8573_v10  ;;  %v3165_v42 = vsel %vm3111_vm3, %v3083_v25, %v5748_v27 }
 0x1a8   :  { %6045 = vrot.lane.b32.xlu1 %v8557_v44, %s6614_s17  ;;  %v5753_v8 = vunpack.i.h.bf16 %v8581_v16  ;;  %v5752_v32 = vunpack.i.l.bf16 %v8581_v16 }
 0x1a9   :  { %6040 = vrot.lane.b32.xlu0 %v8563_v38, %s6614_s17  ;;  %4859 = vmatmul.mubr.msk.bf16.gmra.mxu0 %vm3753_vm10, %v3698_v51  ;;  %v3246_v59 = vsel %vm3193_vm4, %v3164_v9, %v5757_v17  ;;  %v3247_v11 = vsel %vm3193_vm4, %v3165_v42, %v5758_v58 }
 0x1aa   :  { %v8597_v48 = vpop.permute.xlu1 %5765  ;;  %4862 = vmatprep.mubr.msk.bf16.mxu0 %vm6611_vm1, %v10837_v20  ;;  %v3222_v23 = vsel %vm3193_vm4, %v3140_v39, %v5752_v32  ;;  %v3223_v16 = vsel %vm3193_vm4, %v3141_v62, %v5753_v8  ;;  %v472_v62 = vld [vmem:[%s10745_s0 + $0x15d] sm:$0xff]  ;;  %v414_v32 = vld [vmem:[%s10745_s0 + $0x214] sm:$0xff] }
 0x1ab   :  { %v8618_v43 = vpop.permute.xlu0 %5760  ;;  %v5768_v1 = vunpack.i.h.bf16 %v8597_v48  ;;  %v5767_v26 = vunpack.i.l.bf16 %v8597_v48  ;;  %v6114_v9 = vpack.i.bf16 %v472_v62, %v471_v61 }
 0x1ac   :  { %6055 = vrot.lane.b32.xlu1 %v6054_v22, %s6613_s16  ;;  %v5763_v5 = vunpack.i.h.bf16 %v8618_v43  ;;  %v5762_v10 = vunpack.i.l.bf16 %v8618_v43 }
 0x1ad   :  { %6050 = vrot.lane.b32.xlu0 %v6049_v28, %s6613_s16  ;;  %v3328_v18 = vsel %vm3275_vm5, %v3246_v59, %v5767_v26  ;;  %v3329_v48 = vsel %vm3275_vm5, %v3247_v11, %v5768_v1  ;;  %v552_v1 = vld [vmem:[%s10745_s0 + $0x156] sm:$0xff]  ;;  %v553_v26 = vld [vmem:[%s10745_s0 + $0x15e] sm:$0xff] }
 0x1ae   :  { %v5776_v47 = vpop.permute.xlu1 %5775  ;;  %v3304_v34 = vsel %vm3275_vm5, %v3222_v23, %v5762_v10  ;;  %v3305_v49 = vsel %vm3275_vm5, %v3223_v16, %v5763_v5  ;;  %v495_v59 = vld [vmem:[%s10745_s0 + $0x215] sm:$0xff]  ;;  %v6124_v5 = vpack.i.bf16 %v553_v26, %v552_v1 }
 0x1af   :  { %v5771_v13 = vpop.permute.xlu0 %5770  ;;  %v5778_v51 = vunpack.i.h.bf16 %v5776_v47  ;;  %v5777_v22 = vunpack.i.l.bf16 %v5776_v47  ;;  %v10839_v10 = vld [vmem:[#allocation8_spill] sm:$0xff] }
 0x1b0   :  { %6065 = vrot.lane.b32.xlu1 %v6064_v31, %s6615_s22  ;;  %v5773_v28 = vunpack.i.h.bf16 %v5771_v13  ;;  %v5772_v60 = vunpack.i.l.bf16 %v5771_v13  ;;  %v5072_v23 = vunpack.i.l.bf16 %v10839_v10  ;;  %v54_v16 = vld [vmem:[%s10745_s0 + $0xf0] sm:$0xff] }
 0x1b1   :  { %6060 = vrot.lane.b32.xlu0 %v6059_v12, %s6615_s22  ;;  %v3411_v43 = vsel %vm3357_vm6, %v3329_v48, %v5778_v51  ;;  %v55_v51 = vld [vmem:[%s10745_s0 + $0xf8] sm:$0xff] }
 0x1b2   :  { %v5786_v3 = vpop.permute.xlu1 %5785  ;;  %v3386_v31 = vsel %vm3357_vm6, %v3304_v34, %v5772_v60  ;;  %v3387_v12 = vsel %vm3357_vm6, %v3305_v49, %v5773_v28 }
 0x1b3   :  { %v5781_v33 = vpop.permute.xlu0 %5780  ;;  %v5788_v6 = vunpack.i.h.bf16 %v5786_v3  ;;  %v5787_v40 = vunpack.i.l.bf16 %v5786_v3 }
 0x1b4   :  { %6075 = vrot.lane.b32.xlu1 %v10838_v19, %s6609_s23  ;;  %v5783_v29 = vunpack.i.h.bf16 %v5781_v33  ;;  %v5782_v56 = vunpack.i.l.bf16 %v5781_v33  ;;  %v5073_v19 = vunpack.i.h.bf16 %v10839_v10 }
 0x1b5   :  { %6070 = vrot.lane.b32.xlu0 %v8501_v63, %s6607_s10  ;;  %v3410_v63 = vsel %vm3357_vm6, %v3328_v18, %v5777_v22  ;;  %v3493_v14 = vsel %vm3439_vm7, %v3411_v43, %v5788_v6  ;;  %v10840_v22 = vld [vmem:[#allocation19_spill] sm:$0xff]  ;;  %v3060_v43 = vsel %vm3029_vm2, %v54_v16, %v5072_v23  ;;  %v10843_v16 = vld [vmem:[#allocation4_spill] sm:$0xff] }
 0x1b6   :  { %v5796_v15 = vpop.permute.xlu1 %5795  ;;  %v3492_v30 = vsel %vm3439_vm7, %v3410_v63, %v5787_v40  ;;  %v3468_v46 = vsel %vm3439_vm7, %v3386_v31, %v5782_v56  ;;  %v3469_v24 = vsel %vm3439_vm7, %v3387_v12, %v5783_v29  ;;  %v5132_v28 = vunpack.i.l.bf16 %v10840_v22  ;;  %v78_v40 = vld [vmem:[%s10745_s0 + $0x1b0] sm:$0xff]  ;;  %v577_v56 = vld [vmem:[%s10745_s0 + $0x21e] sm:$0xff] }
 0x1b7   :  { %v5791_v37 = vpop.permute.xlu0 %5790  ;;  %v5798_v45 = vunpack.i.h.bf16 %v5796_v15  ;;  %v5797_v7 = vunpack.i.l.bf16 %v5796_v15  ;;  %v5133_v6 = vunpack.i.h.bf16 %v10840_v22  ;;  %v10841_v15 = vld [vmem:[#allocation34_spill] sm:$0xff]  ;;  %v576_v29 = vld [vmem:[%s10745_s0 + $0x216] sm:$0xff] }
 0x1b8   :  { %6085 = vrot.lane.b32.xlu1 %v6084_v36, %s6612_s13  ;;  %v5793_v35 = vunpack.i.h.bf16 %v5791_v37  ;;  %v5792_v0 = vunpack.i.l.bf16 %v5791_v37  ;;  %v415_v36 = vld [vmem:[%s10745_s0 + $0x21c] sm:$0xff]  ;;  %v5272_v18 = vunpack.i.l.bf16 %v10841_v15  ;;  %v5273_v34 = vunpack.i.h.bf16 %v10841_v15  ;;  %v8797_v63 = vld [vmem:[%s10745_s0 + $0x213] sm:$0xff] }
 0x1b9   :  { %6080 = vrot.lane.b32.xlu0 %v8668_v54, %s6609_s23  ;;  %v3574_v55 = vsel %vm3521_vm8, %v3492_v30, %v5797_v7  ;;  %v3575_v25 = vsel %vm3521_vm8, %v3493_v14, %v5798_v45  ;;  %v8736_v42 = vpack.i.bf16 %v415_v36, %v414_v32  ;;  %v79_v37 = vld [vmem:[%s10745_s0 + $0x1b8] sm:$0xff]  ;;  %v6129_v31 = vpack.i.bf16 %v577_v56, %v576_v29 }
 0x1ba   :  { %v5806_v50 = vpop.permute.xlu1 %5805  ;;  %v3550_v57 = vsel %vm3521_vm8, %v3468_v46, %v5792_v0  ;;  %v3551_v13 = vsel %vm3521_vm8, %v3469_v24, %v5793_v35  ;;  %v252_v45 = vld [vmem:[%s10745_s0 + $0x212] sm:$0xff]  ;;  %v253_v7 = vld [vmem:[%s10745_s0 + $0x21a] sm:$0xff]  ;;  %v3061_v35 = vsel %vm3029_vm2, %v55_v51, %v5073_v19  ;;  %v3084_v0 = vsel %vm3029_vm2, %v78_v40, %v5132_v28 }
 0x1bb   :  { %v5808_v47 = vunpack.i.h.bf16 %v5806_v50  ;;  %v5807_v52 = vunpack.i.l.bf16 %v5806_v50  ;;  %v5801_v2 = vpop.permute.xlu0 %5800  ;;  %v334_v12 = vld [vmem:[%s10745_s0 + $0x21b] sm:$0xff]  ;;  %v8809_v30 = vld [vmem:[%s10745_s0 + $0x153] sm:$0xff]  ;;  %v3085_v50 = vsel %vm3029_vm2, %v79_v37, %v5133_v6  ;;  %v3142_v46 = vsel %vm3111_vm3, %v3060_v43, %v5272_v18 }
 0x1bc   :  { %v5803_v39 = vunpack.i.h.bf16 %v5801_v2  ;;  %v5802_v27 = vunpack.i.l.bf16 %v5801_v2  ;;  %6095 = vrot.lane.b32.xlu1 %v8563_v38, %s6610_s9  ;;  %v8814_v14 = vld [vmem:[%s10745_s0 + $0x15b] sm:$0xff]  ;;  %v3143_v2 = vsel %vm3111_vm3, %v3061_v35, %v5273_v34  ;;  %v417_v43 = vld [vmem:[%s10745_s0 + $0x22c] sm:$0xff] }
 0x1bd   :  { %v3656_v53 = vsel %vm3603_vm9, %v3574_v55, %v5807_v52  ;;  %v3657_v4 = vsel %vm3603_vm9, %v3575_v25, %v5808_v47  ;;  %6090 = vrot.lane.b32.xlu0 %v6089_v21, %s6612_s13 }
 0x1be   :  { %v3632_v38 = vsel %vm3603_vm9, %v3550_v57, %v5802_v27  ;;  %v3633_v58 = vsel %vm3603_vm9, %v3551_v13, %v5803_v39  ;;  %v8720_v17 = vpop.permute.xlu1 %5815  ;;  %v3711_v8 = vpack.c.bf16 %v3657_v4, %v3656_v53  ;;  %v8825_v27 = vpack.i.bf16 %v253_v7, %v252_v45 }
 0x1bf   :  { %v8728_v3 = vpop.permute.xlu0 %5810  ;;  %v3699_v21 = vpack.c.bf16 %v3633_v58, %v3632_v38  ;;  %v5818_v24 = vunpack.i.h.bf16 %v8720_v17  ;;  %v5817_v47 = vunpack.i.l.bf16 %v8720_v17  ;;  %v6154_v53 = vpack.i.bf16 %v334_v12, %v8797_v63  ;;  %v416_v63 = vld [vmem:[%s10745_s0 + $0x224] sm:$0xff] }
 0x1c0   :  { %6105 = vrot.lane.b32.xlu1 %v8672_v41, %s6614_s17  ;;  %4911 = vmatmul.mubr.msk.bf16.vlgmr.msra.gmra.mxu1 %vm3753_vm10, %v3711_v8  ;;  %v5813_v55 = vunpack.i.h.bf16 %v8728_v3  ;;  %v5812_v25 = vunpack.i.l.bf16 %v8728_v3  ;;  %v6149_v4 = vpack.i.bf16 %v8814_v14, %v8809_v30 }
 0x1c1   :  { %6100 = vrot.lane.b32.xlu0 %v8557_v44, %s6610_s9  ;;  %4863 = vmatmul.mubr.msk.bf16.gmra.mxu0 %vm3753_vm10, %v3699_v21  ;;  %v496_v44 = vld [vmem:[%s10745_s0 + $0x21d] sm:$0xff]  ;;  %v3224_v58 = vsel %vm3193_vm4, %v3142_v46, %v5817_v47  ;;  %v3225_v17 = vsel %vm3193_vm4, %v3143_v2, %v5818_v24  ;;  %v393_v47 = vld [vmem:[%s10745_s0 + $0x16c] sm:$0xff] }
 0x1c2   :  { %v8744_v33 = vpop.permute.xlu1 %5825  ;;  %4866 = vmatprep.mubr.msk.bf16.mxu0 %vm6611_vm1, %v10837_v20  ;;  %4914 = vmatprep.mubr.msk.bf16.mxu1 %vm6611_vm1, %v10837_v20  ;;  %v6119_v60 = vpack.i.bf16 %v496_v44, %v495_v59  ;;  %v3166_v36 = vsel %vm3111_vm3, %v3084_v0, %v5812_v25  ;;  %v3167_v3 = vsel %vm3111_vm3, %v3085_v50, %v5813_v55  ;;  %v392_v24 = vld [vmem:[%s10745_s0 + $0x164] sm:$0xff] }
 0x1c3   :  { %v8756_v11 = vpop.permute.xlu0 %5820  ;;  %v5828_v57 = vunpack.i.h.bf16 %v8744_v33  ;;  %v5827_v13 = vunpack.i.l.bf16 %v8744_v33  ;;  %v8885_v25 = vpack.i.bf16 %v417_v43, %v416_v63  ;;  %v312_v63 = vld [vmem:[%s10745_s0 + $0x16b] sm:$0xff] }
 0x1c4   :  { %6115 = vrot.lane.b32.xlu1 %v6114_v9, %s6613_s16  ;;  %v5823_v61 = vunpack.i.h.bf16 %v8756_v11  ;;  %v5822_v62 = vunpack.i.l.bf16 %v8756_v11 }
 0x1c5   :  { %6110 = vrot.lane.b32.xlu0 %v8736_v42, %s6614_s17  ;;  %v3306_v33 = vsel %vm3275_vm5, %v3224_v58, %v5827_v13  ;;  %v3307_v59 = vsel %vm3275_vm5, %v3225_v17, %v5828_v57  ;;  %v8898_v58 = vpack.i.bf16 %v393_v47, %v392_v24  ;;  %v497_v17 = vld [vmem:[%s10745_s0 + $0x225] sm:$0xff] }
 0x1c6   :  { %v5836_v48 = vpop.permute.xlu1 %5835  ;;  %v3249_v10 = vsel %vm3193_vm4, %v3167_v3, %v5823_v61 }
 0x1c7   :  { %v8785_v49 = vpop.permute.xlu0 %5830  ;;  %v5838_v8 = vunpack.i.h.bf16 %v5836_v48  ;;  %v5837_v32 = vunpack.i.l.bf16 %v5836_v48 }
 0x1c8   :  { %6125 = vrot.lane.b32.xlu1 %v6124_v5, %s6615_s22  ;;  %v3248_v5 = vsel %vm3193_vm4, %v3166_v36, %v5822_v62  ;;  %v5833_v19 = vunpack.i.h.bf16 %v8785_v49  ;;  %v5832_v23 = vunpack.i.l.bf16 %v8785_v49  ;;  %v474_v36 = vld [vmem:[%s10745_s0 + $0x16d] sm:$0xff] }
 0x1c9   :  { %6120 = vrot.lane.b32.xlu0 %v6119_v60, %s6613_s16  ;;  %v3388_v22 = vsel %vm3357_vm6, %v3306_v33, %v5837_v32  ;;  %v3389_v28 = vsel %vm3357_vm6, %v3307_v59, %v5838_v8  ;;  %v578_v59 = vld [vmem:[%s10745_s0 + $0x226] sm:$0xff] }
 0x1ca   :  { %v5846_v52 = vpop.permute.xlu1 %5845  ;;  %v3330_v30 = vsel %vm3275_vm5, %v3248_v5, %v5832_v23  ;;  %v3331_v14 = vsel %vm3275_vm5, %v3249_v10, %v5833_v19  ;;  %v10845_v19 = vld [vmem:[#allocation21_spill] sm:$0xff] }
 0x1cb   :  { %v8823_v39 = vpop.permute.xlu0 %5840  ;;  %v5848_v21 = vunpack.i.h.bf16 %v5846_v52  ;;  %v5847_v9 = vunpack.i.l.bf16 %v5846_v52  ;;  %v5137_v23 = vunpack.i.l.bf16 %v10845_v19 }
 0x1cc   :  { %6135 = vrot.lane.b32.xlu1 %v8668_v54, %s6607_s10  ;;  %v5843_v60 = vunpack.i.h.bf16 %v8823_v39  ;;  %v5842_v6 = vunpack.i.l.bf16 %v8823_v39 }
 0x1cd   :  { %6130 = vrot.lane.b32.xlu0 %v6129_v31, %s6615_s22  ;;  %v8837_v38 = vpop.f32.mrf.mxu0  ;;  %v3470_v15 = vsel %vm3439_vm7, %v3388_v22, %v5847_v9  ;;  %v3471_v18 = vsel %vm3439_vm7, %v3389_v28, %v5848_v21  ;;  %v554_v22 = vld [vmem:[%s10745_s0 + $0x166] sm:$0xff]  ;;  %v555_v28 = vld [vmem:[%s10745_s0 + $0x16e] sm:$0xff] }
 0x1ce   :  { %10842 = vst [vmem:[#allocation2_spill] sm:$0xff] %v8837_v38  ;;  %v5856_v54 = vpop.permute.xlu1 %5855  ;;  %v3412_v52 = vsel %vm3357_vm6, %v3330_v30, %v5842_v6  ;;  %v3413_v2 = vsel %vm3357_vm6, %v3331_v14, %v5843_v60  ;;  %v56_v60 = vld [vmem:[%s10745_s0 + $0x100] sm:$0xff]  ;;  %v57_v6 = vld [vmem:[%s10745_s0 + $0x108] sm:$0xff] }
 0x1cf   :  { %v5851_v1 = vpop.permute.xlu0 %5850  ;;  %v4808_v26 = vpop.f32.mrf.mxu0  ;;  %v5858_v44 = vunpack.i.h.bf16 %v5856_v54  ;;  %v5857_v11 = vunpack.i.l.bf16 %v5856_v54  ;;  %v473_v54 = vld [vmem:[%s10745_s0 + $0x165] sm:$0xff] }
 0x1d0   :  { %6145 = vrot.lane.b32.xlu1 %v8825_v27, %s6609_s23  ;;  %v5853_v45 = vunpack.i.h.bf16 %v5851_v1  ;;  %v5852_v7 = vunpack.i.l.bf16 %v5851_v1  ;;  %v6179_v33 = vpack.i.bf16 %v474_v36, %v473_v54  ;;  %v255_v30 = vld [vmem:[%s10745_s0 + $0x22a] sm:$0xff] }
 0x1d1   :  { %6140 = vrot.lane.b32.xlu0 %v10843_v16, %s6609_s23  ;;  %v8853_v51 = vpop.f32.mrf.mxu0  ;;  %v3552_v34 = vsel %vm3521_vm8, %v3470_v15, %v5857_v11  ;;  %v3553_v49 = vsel %vm3521_vm8, %v3471_v18, %v5858_v44  ;;  %v579_v44 = vld [vmem:[%s10745_s0 + $0x22e] sm:$0xff]  ;;  %v10844_v11 = vld [vmem:[#allocation10_spill] sm:$0xff]  ;;  %v10846_v18 = vld [vmem:[#allocation33_spill] sm:$0xff] }
 0x1d2   :  { %v5866_v40 = vpop.permute.xlu1 %5865  ;;  %v3494_v39 = vsel %vm3439_vm7, %v3412_v52, %v5852_v7  ;;  %v3495_v57 = vsel %vm3439_vm7, %v3413_v2, %v5853_v45  ;;  %v5078_v5 = vunpack.i.h.bf16 %v10844_v11  ;;  %v5077_v10 = vunpack.i.l.bf16 %v10844_v11  ;;  %v80_v15 = vld [vmem:[%s10745_s0 + $0x1c0] sm:$0xff] }
 0x1d3   :  { %v5868_v48 = vunpack.i.h.bf16 %v5866_v40  ;;  %v5867_v29 = vunpack.i.l.bf16 %v5866_v40  ;;  %v5861_v56 = vpop.permute.xlu0 %5860  ;;  %v4809_v37 = vpop.f32.mrf.mxu0  ;;  %v5138_v40 = vunpack.i.h.bf16 %v10845_v19  ;;  %v6189_v45 = vpack.i.bf16 %v555_v28, %v554_v22  ;;  %v311_v7 = vld [vmem:[%s10745_s0 + $0x163] sm:$0xff] }
 0x1d4   :  { %6155 = vrot.lane.b32.xlu1 %v6154_v53, %s6612_s13  ;;  %v5863_v31 = vunpack.i.h.bf16 %v5861_v56  ;;  %v5862_v12 = vunpack.i.l.bf16 %v5861_v56  ;;  %v81_v37 = vld [vmem:[%s10745_s0 + $0x1c8] sm:$0xff]  ;;  %v3062_v43 = vsel %vm3029_vm2, %v56_v60, %v5077_v10 }
 0x1d5   :  { %v3634_v35 = vsel %vm3603_vm9, %v3552_v34, %v5867_v29  ;;  %v3635_v0 = vsel %vm3603_vm9, %v3553_v49, %v5868_v48  ;;  %6150 = vrot.lane.b32.xlu0 %v6149_v4, %s6612_s13  ;;  %v5277_v48 = vunpack.i.l.bf16 %v10846_v18  ;;  %v5278_v34 = vunpack.i.h.bf16 %v10846_v18  ;;  %v8983_v14 = vld [vmem:[%s10745_s0 + $0x223] sm:$0xff] }
 0x1d6   :  { %v8875_v50 = vpop.permute.xlu1 %5875  ;;  %v3700_v46 = vpack.c.bf16 %v3635_v0, %v3634_v35  ;;  %v3576_v4 = vsel %vm3521_vm8, %v3494_v39, %v5862_v12  ;;  %v3577_v61 = vsel %vm3521_vm8, %v3495_v57, %v5863_v31  ;;  %v6194_v49 = vpack.i.bf16 %v579_v44, %v578_v59  ;;  %v254_v12 = vld [vmem:[%s10745_s0 + $0x222] sm:$0xff]  ;;  %v394_v39 = vld [vmem:[%s10745_s0 + $0x174] sm:$0xff] }
 0x1d7   :  { %v5871_v55 = vpop.permute.xlu0 %5870  ;;  %v3063_v35 = vsel %vm3029_vm2, %v57_v6, %v5078_v5  ;;  %v3086_v0 = vsel %vm3029_vm2, %v80_v15, %v5137_v23  ;;  %v3144_v24 = vsel %vm3111_vm3, %v3062_v43, %v5277_v48  ;;  %v5878_v47 = vunpack.i.h.bf16 %v8875_v50  ;;  %v395_v57 = vld [vmem:[%s10745_s0 + $0x17c] sm:$0xff]  ;;  %v10847_v10 = vld [vmem:[#allocation3_spill] sm:$0xff] }
 0x1d8   :  { %v5873_v13 = vunpack.i.h.bf16 %v5871_v55  ;;  %v5872_v53 = vunpack.i.l.bf16 %v5871_v55  ;;  %6165 = vrot.lane.b32.xlu1 %v8736_v42, %s6610_s9  ;;  %4867 = vmatmul.mubr.msk.bf16.gmra.mxu0 %vm3753_vm10, %v3700_v46  ;;  %v498_v42 = vld [vmem:[%s10745_s0 + $0x22d] sm:$0xff]  ;;  %v3087_v46 = vsel %vm3029_vm2, %v81_v37, %v5138_v40  ;;  %v5877_v52 = vunpack.i.l.bf16 %v8875_v50 }
 0x1d9   :  { %6160 = vrot.lane.b32.xlu0 %v8672_v41, %s6610_s9  ;;  %v8896_v62 = vpop.f32.mrf.mxu0  ;;  %4870 = vmatprep.mubr.msk.bf16.mxu0 %vm6611_vm1, %v10837_v20  ;;  %v6184_v1 = vpack.i.bf16 %v498_v42, %v497_v17  ;;  %v8992_v55 = vld [vmem:[%s10745_s0 + $0x22b] sm:$0xff]  ;;  %v6214_v42 = vpack.i.bf16 %v312_v63, %v311_v7  ;;  %v9013_v36 = vpack.i.bf16 %v395_v57, %v394_v39 }
 0x1da   :  { %v3658_v8 = vsel %vm3603_vm9, %v3576_v4, %v5872_v53  ;;  %v3659_v32 = vsel %vm3603_vm9, %v3577_v61, %v5873_v13  ;;  %v8910_v41 = vpop.permute.xlu1 %5885  ;;  %v3145_v13 = vsel %vm3111_vm3, %v3063_v35, %v5278_v34  ;;  %v6219_v54 = vpack.i.bf16 %v8992_v55, %v8983_v14 }
 0x1db   :  { %v8918_v3 = vpop.permute.xlu0 %5880  ;;  %v4812_v21 = vpop.f32.mrf.mxu0  ;;  %v3712_v9 = vpack.c.bf16 %v3659_v32, %v3658_v8  ;;  %v5888_v53 = vunpack.i.h.bf16 %v8910_v41  ;;  %v5887_v50 = vunpack.i.l.bf16 %v8910_v41  ;;  %v9009_v8 = vpack.i.bf16 %v255_v30, %v254_v12 }
 0x1dc   :  { %6175 = vrot.lane.b32.xlu1 %v8885_v25, %s6614_s17  ;;  %v5883_v4 = vunpack.i.h.bf16 %v8918_v3  ;;  %v5882_v61 = vunpack.i.l.bf16 %v8918_v3  ;;  %v3168_v41 = vsel %vm3111_vm3, %v3086_v0, %v5877_v52  ;;  %v3169_v21 = vsel %vm3111_vm3, %v3087_v46, %v5878_v47 }
 0x1dd   :  { %6170 = vrot.lane.b32.xlu0 %v8898_v58, %s6614_s17  ;;  %v8924_v26 = vpop.f32.mrf.mxu0  ;;  %4915 = vmatmul.mubr.msk.bf16.gmra.mxu1 %vm3753_vm10, %v3712_v9  ;;  %v3250_v59 = vsel %vm3193_vm4, %v3168_v41, %v5887_v50  ;;  %v3251_v44 = vsel %vm3193_vm4, %v3169_v21, %v5888_v53  ;;  %v475_v21 = vld [vmem:[%s10745_s0 + $0x175] sm:$0xff] }
 0x1de   :  { %v8936_v16 = vpop.permute.xlu1 %5895  ;;  %4918 = vmatprep.mubr.msk.bf16.mxu1 %vm6611_vm1, %v10837_v20  ;;  %v3226_v19 = vsel %vm3193_vm4, %v3144_v24, %v5882_v61  ;;  %v3227_v23 = vsel %vm3193_vm4, %v3145_v13, %v5883_v4 }
 0x1df   :  { %v8957_v29 = vpop.permute.xlu0 %5890  ;;  %v4813_v56 = vpop.f32.mrf.mxu0  ;;  %v5898_v9 = vunpack.i.h.bf16 %v8936_v16  ;;  %v5897_v3 = vunpack.i.l.bf16 %v8936_v16 }
 0x1e0   :  { %6185 = vrot.lane.b32.xlu1 %v6184_v1, %s6613_s16  ;;  %v5893_v11 = vunpack.i.h.bf16 %v8957_v29  ;;  %v5892_v5 = vunpack.i.l.bf16 %v8957_v29 }
 0x1e1   :  { %6180 = vrot.lane.b32.xlu0 %v6179_v33, %s6613_s16  ;;  %v3332_v48 = vsel %vm3275_vm5, %v3250_v59, %v5897_v3  ;;  %v3333_v29 = vsel %vm3275_vm5, %v3251_v44, %v5898_v9  ;;  %v419_v59 = vld [vmem:[%s10745_s0 + $0x23c] sm:$0xff] }
 0x1e2   :  { %v5906_v31 = vpop.permute.xlu1 %5905  ;;  %v3309_v7 = vsel %vm3275_vm5, %v3227_v23, %v5893_v11 }
 0x1e3   :  { %v5901_v2 = vpop.permute.xlu0 %5900  ;;  %v5908_v22 = vunpack.i.h.bf16 %v5906_v31  ;;  %v5907_v28 = vunpack.i.l.bf16 %v5906_v31 }
 0x1e4   :  { %6195 = vrot.lane.b32.xlu1 %v6194_v49, %s6615_s22  ;;  %v5903_v60 = vunpack.i.h.bf16 %v5901_v2  ;;  %v5902_v6 = vunpack.i.l.bf16 %v5901_v2 }
 0x1e5   :  { %6190 = vrot.lane.b32.xlu0 %v6189_v45, %s6615_s22  ;;  %v9007_v17 = vpop.f32.mrf.mxu0  ;;  %v3308_v45 = vsel %vm3275_vm5, %v3226_v19, %v5892_v5  ;;  %v3414_v43 = vsel %vm3357_vm6, %v3332_v48, %v5907_v28  ;;  %v3415_v35 = vsel %vm3357_vm6, %v3333_v29, %v5908_v22  ;;  %v556_v22 = vld [vmem:[%s10745_s0 + $0x176] sm:$0xff]  ;;  %v557_v28 = vld [vmem:[%s10745_s0 + $0x17e] sm:$0xff] }
 0x1e6   :  { %v5916_v32 = vpop.permute.xlu1 %5915  ;;  %v3390_v12 = vsel %vm3357_vm6, %v3308_v45, %v5902_v6  ;;  %v3391_v30 = vsel %vm3357_vm6, %v3309_v7, %v5903_v60  ;;  %v500_v6 = vld [vmem:[%s10745_s0 + $0x23d] sm:$0xff] }
 0x1e7   :  { %v5911_v1 = vpop.permute.xlu0 %5910  ;;  %v4816_v33 = vpop.f32.mrf.mxu0  ;;  %v5918_v40 = vunpack.i.h.bf16 %v5916_v32  ;;  %v5917_v15 = vunpack.i.l.bf16 %v5916_v32  ;;  %v10848_v48 = vld [vmem:[#allocation9_spill] sm:$0xff] }
 0x1e8   :  { %6205 = vrot.lane.b32.xlu1 %v10847_v10, %s6609_s23  ;;  %v5913_v56 = vunpack.i.h.bf16 %v5911_v1  ;;  %v5912_v37 = vunpack.i.l.bf16 %v5911_v1  ;;  %v5083_v29 = vunpack.i.h.bf16 %v10848_v48 }
 0x1e9   :  { %6200 = vrot.lane.b32.xlu0 %v8825_v27, %s6607_s10  ;;  %v9029_v16 = vpop.f32.mrf.mxu0  ;;  %v3496_v14 = vsel %vm3439_vm7, %v3414_v43, %v5917_v15  ;;  %v3497_v46 = vsel %vm3439_vm7, %v3415_v35, %v5918_v40  ;;  %v10850_v43 = vld [vmem:[#allocation36_spill] sm:$0xff] }
 0x1ea   :  { %v5926_v18 = vpop.permute.xlu1 %5925  ;;  %v3472_v47 = vsel %vm3439_vm7, %v3390_v12, %v5912_v37  ;;  %v3473_v52 = vsel %vm3439_vm7, %v3391_v30, %v5913_v56  ;;  %v5082_v56 = vunpack.i.l.bf16 %v10848_v48  ;;  %v58_v37 = vld [vmem:[%s10745_s0 + $0x110] sm:$0xff]  ;;  %v5282_v35 = vunpack.i.l.bf16 %v10850_v43  ;;  %v581_v12 = vld [vmem:[%s10745_s0 + $0x23e] sm:$0xff] }
 0x1eb   :  { %v5921_v34 = vpop.permute.xlu0 %5920  ;;  %v4817_v49 = vpop.f32.mrf.mxu0  ;;  %v5928_v27 = vunpack.i.h.bf16 %v5926_v18  ;;  %v5927_v63 = vunpack.i.l.bf16 %v5926_v18  ;;  %v6254_v18 = vpack.i.bf16 %v557_v28, %v556_v22  ;;  %v83_v30 = vld [vmem:[%s10745_s0 + $0x1d8] sm:$0xff] }
 0x1ec   :  { %6215 = vrot.lane.b32.xlu1 %v6214_v42, %s6612_s13  ;;  %v5923_v0 = vunpack.i.h.bf16 %v5921_v34  ;;  %v5922_v31 = vunpack.i.l.bf16 %v5921_v34  ;;  %v59_v34 = vld [vmem:[%s10745_s0 + $0x118] sm:$0xff]  ;;  %v10849_v49 = vld [vmem:[#allocation20_spill] sm:$0xff] }
 0x1ed   :  { %6210 = vrot.lane.b32.xlu0 %v9009_v8, %s6609_s23  ;;  %v3578_v57 = vsel %vm3521_vm8, %v3496_v14, %v5927_v63  ;;  %v3579_v13 = vsel %vm3521_vm8, %v3497_v46, %v5928_v27  ;;  %v5142_v45 = vunpack.i.l.bf16 %v10849_v49  ;;  %v5143_v27 = vunpack.i.h.bf16 %v10849_v49  ;;  %v82_v63 = vld [vmem:[%s10745_s0 + $0x1d0] sm:$0xff] }
 0x1ee   :  { %v5936_v24 = vpop.permute.xlu1 %5935  ;;  %v3554_v4 = vsel %vm3521_vm8, %v3472_v47, %v5922_v31  ;;  %v3555_v61 = vsel %vm3521_vm8, %v3473_v52, %v5923_v0  ;;  %v580_v31 = vld [vmem:[%s10745_s0 + $0x236] sm:$0xff]  ;;  %v5283_v14 = vunpack.i.h.bf16 %v10850_v43 }
 0x1ef   :  { %v5938_v2 = vunpack.i.h.bf16 %v5936_v24  ;;  %v5937_v55 = vunpack.i.l.bf16 %v5936_v24  ;;  %v5931_v39 = vpop.permute.xlu0 %5930  ;;  %v256_v24 = vld [vmem:[%s10745_s0 + $0x232] sm:$0xff]  ;;  %v257_v47 = vld [vmem:[%s10745_s0 + $0x23a] sm:$0xff] }
 0x1f0   :  { %v5933_v53 = vunpack.i.h.bf16 %v5931_v39  ;;  %v5932_v50 = vunpack.i.l.bf16 %v5931_v39  ;;  %6225 = vrot.lane.b32.xlu1 %v8898_v58, %s6610_s9  ;;  %v476_v58 = vld [vmem:[%s10745_s0 + $0x17d] sm:$0xff]  ;;  %v9146_v52 = vld [vmem:[%s10745_s0 + $0x233] sm:$0xff]  ;;  %v3088_v39 = vsel %vm3029_vm2, %v82_v63, %v5142_v45 }
 0x1f1   :  { %v3660_v42 = vsel %vm3603_vm9, %v3578_v57, %v5937_v55  ;;  %v3661_v32 = vsel %vm3603_vm9, %v3579_v13, %v5938_v2  ;;  %6220 = vrot.lane.b32.xlu0 %v6219_v54, %s6612_s13  ;;  %v9055_v41 = vpop.f32.mrf.mxu0  ;;  %v418_v54 = vld [vmem:[%s10745_s0 + $0x234] sm:$0xff]  ;;  %v6244_v10 = vpack.i.bf16 %v476_v58, %v475_v21  ;;  %v3064_v2 = vsel %vm3029_vm2, %v58_v37, %v5082_v56 }
 0x1f2   :  { %v3636_v9 = vsel %vm3603_vm9, %v3554_v4, %v5932_v50  ;;  %v3637_v3 = vsel %vm3603_vm9, %v3555_v61, %v5933_v53  ;;  %v9065_v1 = vpop.permute.xlu1 %5945  ;;  %v3713_v33 = vpack.c.bf16 %v3661_v32, %v3660_v42  ;;  %v9083_v23 = vpack.i.bf16 %v419_v59, %v418_v54  ;;  %v338_v53 = vld [vmem:[%s10745_s0 + $0x23b] sm:$0xff]  ;;  %v9160_v50 = vld [vmem:[%s10745_s0 + $0x173] sm:$0xff] }
 0x1f3   :  { %v9073_v44 = vpop.permute.xlu0 %5940  ;;  %v4820_v11 = vpop.f32.mrf.mxu0  ;;  %v3701_v5 = vpack.c.bf16 %v3637_v3, %v3636_v9  ;;  %v3065_v55 = vsel %vm3029_vm2, %v59_v34, %v5083_v29  ;;  %v6259_v13 = vpack.i.bf16 %v581_v12, %v580_v31  ;;  %v9165_v4 = vld [vmem:[%s10745_s0 + $0x17b] sm:$0xff]  ;;  %v3089_v61 = vsel %vm3029_vm2, %v83_v30, %v5143_v27 }
 0x1f4   :  { %6235 = vrot.lane.b32.xlu1 %v9013_v36, %s6614_s17  ;;  %4919 = vmatmul.mubr.msk.bf16.gmra.mxu1 %vm3753_vm10, %v3713_v33  ;;  %v3146_v42 = vsel %vm3111_vm3, %v3064_v2, %v5282_v35  ;;  %v5948_v32 = vunpack.i.h.bf16 %v9065_v1  ;;  %v5947_v21 = vunpack.i.l.bf16 %v9065_v1  ;;  %v3147_v9 = vsel %vm3111_vm3, %v3065_v55, %v5283_v14  ;;  %v10851_v31 = vld [vmem:[#allocation6_spill] sm:$0xff] }
 0x1f5   :  { %6230 = vrot.lane.b32.xlu0 %v8885_v25, %s6610_s9  ;;  %v9080_v19 = vpop.f32.mrf.mxu0  ;;  %4871 = vmatmul.mubr.msk.bf16.gmra.mxu0 %vm3753_vm10, %v3701_v5  ;;  %v499_v25 = vld [vmem:[%s10745_s0 + $0x235] sm:$0xff]  ;;  %v5943_v3 = vunpack.i.h.bf16 %v9073_v44  ;;  %v5942_v33 = vunpack.i.l.bf16 %v9073_v44  ;;  %v9176_v11 = vpack.i.bf16 %v257_v47, %v256_v24  ;;  %v6284_v1 = vpack.i.bf16 %v338_v53, %v9146_v52 }
 0x1f6   :  { %v9091_v60 = vpop.permute.xlu1 %5955  ;;  %4874 = vmatprep.mubr.msk.bf16.mxu0 %vm6611_vm1, %v10837_v20  ;;  %4922 = vmatprep.mubr.msk.bf16.mxu1 %vm6611_vm1, %v10837_v20  ;;  %v6249_v7 = vpack.i.bf16 %v500_v6, %v499_v25  ;;  %v6279_v22 = vpack.i.bf16 %v9165_v4, %v9160_v50  ;;  %v3228_v6 = vsel %vm3193_vm4, %v3146_v42, %v5947_v21  ;;  %v421_v42 = vld [vmem:[%s10745_s0 + $0x24c] sm:$0xff] }
 0x1f7   :  { %v9103_v40 = vpop.permute.xlu0 %5950  ;;  %v4821_v15 = vpop.f32.mrf.mxu0  ;;  %v5958_v5 = vunpack.i.h.bf16 %v9091_v60  ;;  %v3170_v48 = vsel %vm3111_vm3, %v3088_v39, %v5942_v33  ;;  %v3171_v29 = vsel %vm3111_vm3, %v3089_v61, %v5943_v3  ;;  %v420_v61 = vld [vmem:[%s10745_s0 + $0x244] sm:$0xff] }
 0x1f8   :  { %6245 = vrot.lane.b32.xlu1 %v6244_v10, %s6613_s16  ;;  %v5957_v10 = vunpack.i.l.bf16 %v9091_v60  ;;  %v5953_v28 = vunpack.i.h.bf16 %v9103_v40  ;;  %v5952_v44 = vunpack.i.l.bf16 %v9103_v40  ;;  %v3229_v60 = vsel %vm3193_vm4, %v3147_v9, %v5948_v32 }
 0x1f9   :  { %6240 = vrot.lane.b32.xlu0 %v9083_v23, %s6614_s17  ;;  %v3311_v45 = vsel %vm3275_vm5, %v3229_v60, %v5958_v5  ;;  %v9238_v60 = vpack.i.bf16 %v421_v42, %v420_v61  ;;  %v10854_v61 = vld [vmem:[#allocation35_spill] sm:$0xff] }
 0x1fa   :  { %v9122_v0 = vpop.permute.xlu1 %5965  ;;  %v3310_v49 = vsel %vm3275_vm5, %v3228_v6, %v5957_v10  ;;  %v3252_v63 = vsel %vm3193_vm4, %v3170_v48, %v5952_v44  ;;  %v3253_v43 = vsel %vm3193_vm4, %v3171_v29, %v5953_v28  ;;  %v396_v10 = vld [vmem:[%s10745_s0 + $0x184] sm:$0xff]  ;;  %v5287_v42 = vunpack.i.l.bf16 %v10854_v61 }
 0x1fb   :  { %v9134_v46 = vpop.permute.xlu0 %5960  ;;  %v5968_v15 = vunpack.i.h.bf16 %v9122_v0 }
 0x1fc   :  { %6255 = vrot.lane.b32.xlu1 %v6254_v18, %s6615_s22  ;;  %v5963_v35 = vunpack.i.h.bf16 %v9134_v46 }
 0x1fd   :  { %6250 = vrot.lane.b32.xlu0 %v6249_v7, %s6613_s16  ;;  %v9152_v57 = vpop.f32.mrf.mxu0  ;;  %v3393_v30 = vsel %vm3357_vm6, %v3311_v45, %v5968_v15 }
 0x1fe   :  { %v5976_v58 = vpop.permute.xlu1 %5975 }
 0x1ff   :  { %v9174_v54 = vpop.permute.xlu0 %5970  ;;  %v4824_v59 = vpop.f32.mrf.mxu0  ;;  %v5978_v56 = vunpack.i.h.bf16 %v5976_v58  ;;  %v5977_v37 = vunpack.i.l.bf16 %v5976_v58 }
 0x200   :  { %6265 = vrot.lane.b32.xlu1 %v9009_v8, %s6607_s10  ;;  %v5967_v8 = vunpack.i.l.bf16 %v9122_v0  ;;  %v5962_v0 = vunpack.i.l.bf16 %v9134_v46  ;;  %v5973_v14 = vunpack.i.h.bf16 %v9174_v54  ;;  %v5972_v24 = vunpack.i.l.bf16 %v9174_v54 }
 0x201   :  { %6260 = vrot.lane.b32.xlu0 %v6259_v13, %s6615_s22  ;;  %v9188_v25 = vpop.f32.mrf.mxu0  ;;  %v3475_v2 = vsel %vm3439_vm7, %v3393_v30, %v5978_v56  ;;  %v3335_v54 = vsel %vm3275_vm5, %v3253_v43, %v5963_v35  ;;  %v583_v30 = vld [vmem:[%s10745_s0 + $0x24e] sm:$0xff] }
 0x202   :  { %v5986_v18 = vpop.permute.xlu1 %5985  ;;  %v3392_v12 = vsel %vm3357_vm6, %v3310_v49, %v5967_v8  ;;  %v3334_v33 = vsel %vm3275_vm5, %v3252_v63, %v5962_v0 }
 0x203   :  { %v5981_v40 = vpop.permute.xlu0 %5980  ;;  %v4825_v34 = vpop.f32.mrf.mxu0  ;;  %v5988_v7 = vunpack.i.h.bf16 %v5986_v18  ;;  %v5987_v27 = vunpack.i.l.bf16 %v5986_v18  ;;  %v3474_v52 = vsel %vm3439_vm7, %v3392_v12, %v5977_v37  ;;  %v3416_v28 = vsel %vm3357_vm6, %v3334_v33, %v5972_v24  ;;  %v582_v12 = vld [vmem:[%s10745_s0 + $0x246] sm:$0xff] }
 0x204   :  { %6275 = vrot.lane.b32.xlu1 %v9176_v11, %s6609_s23  ;;  %v5983_v50 = vunpack.i.h.bf16 %v5981_v40  ;;  %v5982_v4 = vunpack.i.l.bf16 %v5981_v40  ;;  %v501_v34 = vld [vmem:[%s10745_s0 + $0x245] sm:$0xff] }
 0x205   :  { %6270 = vrot.lane.b32.xlu0 %v10851_v31, %s6609_s23  ;;  %v3556_v46 = vsel %vm3521_vm8, %v3474_v52, %v5987_v27  ;;  %v3557_v53 = vsel %vm3521_vm8, %v3475_v2, %v5988_v7  ;;  %v477_v7 = vld [vmem:[%s10745_s0 + $0x185] sm:$0xff]  ;;  %v478_v27 = vld [vmem:[%s10745_s0 + $0x18d] sm:$0xff] }
 0x206   :  { %v5996_v47 = vpop.permute.xlu1 %5995  ;;  %v3498_v15 = vsel %vm3439_vm7, %v3416_v28, %v5982_v4  ;;  %v6309_v31 = vpack.i.bf16 %v478_v27, %v477_v7  ;;  %v10853_v52 = vld [vmem:[#allocation23_spill] sm:$0xff]  ;;  %v84_v4 = vld [vmem:[%s10745_s0 + $0x1e0] sm:$0xff] }
 0x207   :  { %v5998_v55 = vunpack.i.h.bf16 %v5996_v47  ;;  %v5997_v39 = vunpack.i.l.bf16 %v5996_v47  ;;  %v5991_v13 = vpop.permute.xlu0 %5990  ;;  %v5147_v2 = vunpack.i.l.bf16 %v10853_v52  ;;  %v399_v7 = vld [vmem:[%s10745_s0 + $0x19c] sm:$0xff] }
 0x208   :  { %6285 = vrot.lane.b32.xlu1 %v6284_v1, %s6612_s13  ;;  %v5993_v58 = vunpack.i.h.bf16 %v5991_v13  ;;  %v5992_v9 = vunpack.i.l.bf16 %v5991_v13  ;;  %v397_v1 = vld [vmem:[%s10745_s0 + $0x18c] sm:$0xff] }
 0x209   :  { %v3638_v32 = vsel %vm3603_vm9, %v3556_v46, %v5997_v39  ;;  %v3639_v21 = vsel %vm3603_vm9, %v3557_v53, %v5998_v55  ;;  %6280 = vrot.lane.b32.xlu0 %v6279_v22, %s6612_s13  ;;  %v9224_v3 = vpop.f32.mrf.mxu0  ;;  %v3417_v22 = vsel %vm3357_vm6, %v3335_v54, %v5973_v14  ;;  %v9251_v40 = vpack.i.bf16 %v397_v1, %v396_v10  ;;  %v10852_v14 = vld [vmem:[#allocation12_spill] sm:$0xff]  ;;  %v558_v39 = vld [vmem:[%s10745_s0 + $0x186] sm:$0xff] }
 0x20a   :  { %v9228_v59 = vpop.permute.xlu1 %6005  ;;  %v3702_v5 = vpack.c.bf16 %v3639_v21, %v3638_v32  ;;  %v3499_v8 = vsel %vm3439_vm7, %v3417_v22, %v5983_v50  ;;  %v3580_v29 = vsel %vm3521_vm8, %v3498_v15, %v5992_v9  ;;  %v5088_v24 = vunpack.i.h.bf16 %v10852_v14  ;;  %v559_v13 = vld [vmem:[%s10745_s0 + $0x18e] sm:$0xff]  ;;  %v60_v46 = vld [vmem:[%s10745_s0 + $0x120] sm:$0xff] }
 0x20b   :  { %v6001_v44 = vpop.permute.xlu0 %6000  ;;  %v4828_v6 = vpop.f32.mrf.mxu0  ;;  %v3581_v56 = vsel %vm3521_vm8, %v3499_v8, %v5993_v58  ;;  %v5087_v47 = vunpack.i.l.bf16 %v10852_v14  ;;  %v61_v53 = vld [vmem:[%s10745_s0 + $0x128] sm:$0xff]  ;;  %v5148_v50 = vunpack.i.h.bf16 %v10853_v52  ;;  %v5288_v58 = vunpack.i.h.bf16 %v10854_v61  ;;  %v10855_v61 = vld [vmem:[#allocation5_spill] sm:$0xff] }
 0x20c   :  { %v6003_v18 = vunpack.i.h.bf16 %v6001_v44  ;;  %v6002_v48 = vunpack.i.l.bf16 %v6001_v44  ;;  %6295 = vrot.lane.b32.xlu1 %v9083_v23, %s6610_s9  ;;  %4875 = vmatmul.mubr.msk.bf16.gmra.mxu0 %vm3753_vm10, %v3702_v5  ;;  %v502_v23 = vld [vmem:[%s10745_s0 + $0x24d] sm:$0xff]  ;;  %v6324_v9 = vpack.i.bf16 %v583_v30, %v582_v12  ;;  %v6319_v54 = vpack.i.bf16 %v559_v13, %v558_v39  ;;  %v315_v5 = vld [vmem:[%s10745_s0 + $0x183] sm:$0xff] }
 0x20d   :  { %6290 = vrot.lane.b32.xlu0 %v9013_v36, %s6610_s9  ;;  %v9249_v37 = vpop.f32.mrf.mxu0  ;;  %4878 = vmatprep.mubr.msk.bf16.mxu0 %vm6611_vm1, %v10837_v20  ;;  %v6314_v0 = vpack.i.bf16 %v502_v23, %v501_v34  ;;  %v85_v21 = vld [vmem:[%s10745_s0 + $0x1e8] sm:$0xff]  ;;  %v3066_v1 = vsel %vm3029_vm2, %v60_v46, %v5087_v47  ;;  %v3067_v28 = vsel %vm3029_vm2, %v61_v53, %v5088_v24 }
 0x20e   :  { %v3662_v49 = vsel %vm3603_vm9, %v3580_v29, %v6002_v48  ;;  %v3663_v45 = vsel %vm3603_vm9, %v3581_v56, %v6003_v18  ;;  %v9263_v36 = vpop.permute.xlu1 %6015  ;;  %v316_v10 = vld [vmem:[%s10745_s0 + $0x18b] sm:$0xff]  ;;  %v3090_v22 = vsel %vm3029_vm2, %v84_v4, %v5147_v2  ;;  %v258_v6 = vld [vmem:[%s10745_s0 + $0x242] sm:$0xff]  ;;  %v3091_v18 = vsel %vm3029_vm2, %v85_v21, %v5148_v50 }
 0x20f   :  { %v9271_v63 = vpop.permute.xlu0 %6010  ;;  %v4829_v43 = vpop.f32.mrf.mxu0  ;;  %v3714_v35 = vpack.c.bf16 %v3663_v45, %v3662_v49  ;;  %v259_v15 = vld [vmem:[%s10745_s0 + $0x24a] sm:$0xff]  ;;  %v3148_v48 = vsel %vm3111_vm3, %v3066_v1, %v5287_v42  ;;  %v6008_v29 = vunpack.i.h.bf16 %v9228_v59  ;;  %v6007_v56 = vunpack.i.l.bf16 %v9228_v59  ;;  %v398_v45 = vld [vmem:[%s10745_s0 + $0x194] sm:$0xff] }
 0x210   :  { %6305 = vrot.lane.b32.xlu1 %v9238_v60, %s6614_s17  ;;  %v9336_v8 = vld [vmem:[%s10745_s0 + $0x243] sm:$0xff]  ;;  %v9345_v49 = vld [vmem:[%s10745_s0 + $0x24b] sm:$0xff]  ;;  %v3149_v27 = vsel %vm3111_vm3, %v3067_v28, %v5288_v58  ;;  %v6018_v43 = vunpack.i.h.bf16 %v9263_v36  ;;  %v6017_v59 = vunpack.i.l.bf16 %v9263_v36  ;;  %v6344_v12 = vpack.i.bf16 %v316_v10, %v315_v5 }
 0x211   :  { %6300 = vrot.lane.b32.xlu0 %v9251_v40, %s6614_s17  ;;  %4923 = vmatmul.mubr.msk.bf16.gmra.mxu1 %vm3753_vm10, %v3714_v35  ;;  %v6013_v35 = vunpack.i.h.bf16 %v9271_v63  ;;  %v9362_v30 = vpack.i.bf16 %v259_v15, %v258_v6  ;;  %v6349_v24 = vpack.i.bf16 %v9345_v49, %v9336_v8  ;;  %v9366_v47 = vpack.i.bf16 %v399_v7, %v398_v45 }
 0x212   :  { %v9287_v55 = vpop.permute.xlu1 %6025  ;;  %4926 = vmatprep.mubr.msk.bf16.mxu1 %vm6611_vm1, %v10837_v20  ;;  %v3172_v36 = vsel %vm3111_vm3, %v3090_v22, %v6007_v56  ;;  %v3173_v52 = vsel %vm3111_vm3, %v3091_v18, %v6008_v29 }
 0x213   :  { %v9308_v32 = vpop.permute.xlu0 %6020  ;;  %v6028_v2 = vunpack.i.h.bf16 %v9287_v55  ;;  %v3254_v46 = vsel %vm3193_vm4, %v3172_v36, %v6017_v59  ;;  %v3255_v53 = vsel %vm3193_vm4, %v3173_v52, %v6018_v43  ;;  %v3231_v21 = vsel %vm3193_vm4, %v3149_v27, %v6013_v35 }
 0x214   :  { %6315 = vrot.lane.b32.xlu1 %v6314_v0, %s6613_s16  ;;  %v6012_v0 = vunpack.i.l.bf16 %v9271_v63  ;;  %v6027_v63 = vunpack.i.l.bf16 %v9287_v55  ;;  %v6023_v50 = vunpack.i.h.bf16 %v9308_v32  ;;  %v6022_v4 = vunpack.i.l.bf16 %v9308_v32 }
 0x215   :  { %6310 = vrot.lane.b32.xlu0 %v6309_v31, %s6613_s16  ;;  %v9316_v33 = vpop.f32.mrf.mxu0  ;;  %v3337_v32 = vsel %vm3275_vm5, %v3255_v53, %v6028_v2 }
 0x216   :  { %v6036_v44 = vpop.permute.xlu1 %6035  ;;  %v3230_v42 = vsel %vm3193_vm4, %v3148_v48, %v6012_v0  ;;  %v3336_v28 = vsel %vm3275_vm5, %v3254_v46, %v6027_v63  ;;  %v3313_v18 = vsel %vm3275_vm5, %v3231_v21, %v6023_v50 }
 0x217   :  { %v6031_v34 = vpop.permute.xlu0 %6030  ;;  %v4832_v23 = vpop.f32.mrf.mxu0  ;;  %v6038_v58 = vunpack.i.h.bf16 %v6036_v44  ;;  %v3312_v8 = vsel %vm3275_vm5, %v3230_v42, %v6022_v4 }
 0x218   :  { %6325 = vrot.lane.b32.xlu1 %v6324_v9, %s6615_s22  ;;  %v6037_v9 = vunpack.i.l.bf16 %v6036_v44  ;;  %v6033_v55 = vunpack.i.h.bf16 %v6031_v34 }
 0x219   :  { %6320 = vrot.lane.b32.xlu0 %v6319_v54, %s6615_s22  ;;  %v9360_v31 = vpop.f32.mrf.mxu0  ;;  %v6032_v54 = vunpack.i.l.bf16 %v6031_v34  ;;  %v3419_v29 = vsel %vm3357_vm6, %v3337_v32, %v6038_v58  ;;  %v560_v32 = vld [vmem:[%s10745_s0 + $0x196] sm:$0xff] }
 0x21a   :  { %v6046_v14 = vpop.permute.xlu1 %6045  ;;  %v3395_v45 = vsel %vm3357_vm6, %v3313_v18, %v6033_v55  ;;  %v423_v55 = vld [vmem:[%s10745_s0 + $0x25c] sm:$0xff]  ;;  %v10856_v18 = vld [vmem:[#allocation11_spill] sm:$0xff] }
 0x21b   :  { %v6041_v39 = vpop.permute.xlu0 %6040  ;;  %v4833_v13 = vpop.f32.mrf.mxu0  ;;  %v6048_v5 = vunpack.i.h.bf16 %v6046_v14  ;;  %v6047_v10 = vunpack.i.l.bf16 %v6046_v14  ;;  %v3394_v49 = vsel %vm3357_vm6, %v3312_v8, %v6032_v54 }
 0x21c   :  { %6335 = vrot.lane.b32.xlu1 %v10855_v61, %s6609_s23  ;;  %v6043_v22 = vunpack.i.h.bf16 %v6041_v39  ;;  %v6042_v6 = vunpack.i.l.bf16 %v6041_v39  ;;  %v479_v61 = vld [vmem:[%s10745_s0 + $0x195] sm:$0xff] }
 0x21d   :  { %6330 = vrot.lane.b32.xlu0 %v9176_v11, %s6607_s10  ;;  %v3418_v11 = vsel %vm3357_vm6, %v3336_v28, %v6037_v9  ;;  %v3501_v27 = vsel %vm3439_vm7, %v3419_v29, %v6048_v5  ;;  %v62_v29 = vld [vmem:[%s10745_s0 + $0x130] sm:$0xff] }
 0x21e   :  { %v6056_v1 = vpop.permute.xlu1 %6055  ;;  %v3500_v7 = vsel %vm3439_vm7, %v3418_v11, %v6047_v10  ;;  %v3476_v59 = vsel %vm3439_vm7, %v3394_v49, %v6042_v6  ;;  %v3477_v35 = vsel %vm3439_vm7, %v3395_v45, %v6043_v22  ;;  %v561_v22 = vld [vmem:[%s10745_s0 + $0x19e] sm:$0xff]  ;;  %v5093_v11 = vunpack.i.h.bf16 %v10856_v18 }
 0x21f   :  { %v6051_v15 = vpop.permute.xlu0 %6050  ;;  %v6058_v44 = vunpack.i.h.bf16 %v6056_v1  ;;  %v6057_v48 = vunpack.i.l.bf16 %v6056_v1 }
 0x220   :  { %6345 = vrot.lane.b32.xlu1 %v6344_v12, %s6612_s13  ;;  %v6053_v56 = vunpack.i.h.bf16 %v6051_v15  ;;  %v6052_v34 = vunpack.i.l.bf16 %v6051_v15  ;;  %v503_v15 = vld [vmem:[%s10745_s0 + $0x255] sm:$0xff] }
 0x221   :  { %6340 = vrot.lane.b32.xlu0 %v9362_v30, %s6609_s23  ;;  %v9391_v23 = vpop.f32.mrf.mxu0  ;;  %v3582_v52 = vsel %vm3521_vm8, %v3500_v7, %v6057_v48  ;;  %v3583_v2 = vsel %vm3521_vm8, %v3501_v27, %v6058_v44  ;;  %v5092_v44 = vunpack.i.l.bf16 %v10856_v18  ;;  %v6384_v48 = vpack.i.bf16 %v561_v22, %v560_v32  ;;  %v86_v7 = vld [vmem:[%s10745_s0 + $0x1f0] sm:$0xff]  ;;  %v9532_v18 = vld [vmem:[%s10745_s0 + $0x265] sm:$0xff] }
 0x222   :  { %v6066_v43 = vpop.permute.xlu1 %6065  ;;  %v3558_v13 = vsel %vm3521_vm8, %v3476_v59, %v6052_v34  ;;  %v3559_v46 = vsel %vm3521_vm8, %v3477_v35, %v6053_v56  ;;  %v63_v56 = vld [vmem:[%s10745_s0 + $0x138] sm:$0xff]  ;;  %v10857_v34 = vld [vmem:[#allocation22_spill] sm:$0xff] }
 0x223   :  { %v6068_v0 = vunpack.i.h.bf16 %v6066_v43  ;;  %v6067_v12 = vunpack.i.l.bf16 %v6066_v43  ;;  %v6061_v14 = vpop.permute.xlu0 %6060  ;;  %v4836_v36 = vpop.f32.mrf.mxu0  ;;  %v5153_v49 = vunpack.i.h.bf16 %v10857_v34  ;;  %v5152_v45 = vunpack.i.l.bf16 %v10857_v34  ;;  %v87_v59 = vld [vmem:[%s10745_s0 + $0x1f8] sm:$0xff]  ;;  %v10859_v35 = vld [vmem:[#allocation38_spill] sm:$0xff] }
 0x224   :  { %v6063_v63 = vunpack.i.h.bf16 %v6061_v14  ;;  %v6062_v39 = vunpack.i.l.bf16 %v6061_v14  ;;  %6355 = vrot.lane.b32.xlu1 %v9251_v40, %s6610_s9  ;;  %v480_v40 = vld [vmem:[%s10745_s0 + $0x19d] sm:$0xff] }
 0x225   :  { %v3664_v53 = vsel %vm3603_vm9, %v3582_v52, %v6067_v12  ;;  %v3665_v50 = vsel %vm3603_vm9, %v3583_v2, %v6068_v0  ;;  %6350 = vrot.lane.b32.xlu0 %v6349_v24, %s6612_s13  ;;  %v9408_v4 = vpop.f32.mrf.mxu0  ;;  %v422_v24 = vld [vmem:[%s10745_s0 + $0x254] sm:$0xff]  ;;  %v6374_v1 = vpack.i.bf16 %v480_v40, %v479_v61  ;;  %v5293_v0 = vunpack.i.h.bf16 %v10859_v35  ;;  %v585_v52 = vld [vmem:[%s10745_s0 + $0x25e] sm:$0xff] }
 0x226   :  { %v3640_v42 = vsel %vm3603_vm9, %v3558_v13, %v6062_v39  ;;  %v3641_v21 = vsel %vm3603_vm9, %v3559_v46, %v6063_v63  ;;  %v9418_v58 = vpop.permute.xlu1 %6075  ;;  %v3715_v9 = vpack.c.bf16 %v3665_v50, %v3664_v53  ;;  %v9434_v28 = vpack.i.bf16 %v423_v55, %v422_v24  ;;  %v584_v36 = vld [vmem:[%s10745_s0 + $0x256] sm:$0xff]  ;;  %v424_v24 = vld [vmem:[%s10745_s0 + $0x264] sm:$0xff]  ;;  %v425_v55 = vld [vmem:[%s10745_s0 + $0x26c] sm:$0xff] }
 0x227   :  { %v9426_v54 = vpop.permute.xlu0 %6070  ;;  %v4837_v5 = vpop.f32.mrf.mxu0  ;;  %v3703_v10 = vpack.c.bf16 %v3641_v21, %v3640_v42  ;;  %v5292_v12 = vunpack.i.l.bf16 %v10859_v35  ;;  %v341_v39 = vld [vmem:[%s10745_s0 + $0x253] sm:$0xff]  ;;  %v3068_v13 = vsel %vm3029_vm2, %v62_v29, %v5092_v44  ;;  %v342_v46 = vld [vmem:[%s10745_s0 + $0x25b] sm:$0xff]  ;;  %v3069_v61 = vsel %vm3029_vm2, %v63_v56, %v5093_v11 }
 0x228   :  { %6365 = vrot.lane.b32.xlu1 %v9366_v47, %s6614_s17  ;;  %4927 = vmatmul.mubr.msk.bf16.gmra.mxu1 %vm3753_vm10, %v3715_v9  ;;  %v260_v53 = vld [vmem:[%s10745_s0 + $0x252] sm:$0xff]  ;;  %v261_v50 = vld [vmem:[%s10745_s0 + $0x25a] sm:$0xff]  ;;  %v3092_v40 = vsel %vm3029_vm2, %v86_v7, %v5152_v45  ;;  %v3093_v42 = vsel %vm3029_vm2, %v87_v59, %v5153_v49  ;;  %v6389_v9 = vpack.i.bf16 %v585_v52, %v584_v36  ;;  %v9518_v5 = vld [vmem:[%s10745_s0 + $0x266] sm:$0xff]  ;;  %v6078_v32 = vunpack.i.h.bf16 %v9418_v58 }
 0x229   :  { %6360 = vrot.lane.b32.xlu0 %v9238_v60, %s6610_s9  ;;  %4879 = vmatmul.mubr.msk.bf16.gmra.mxu0 %vm3753_vm10, %v3703_v10  ;;  %v504_v60 = vld [vmem:[%s10745_s0 + $0x25d] sm:$0xff]  ;;  %v3150_v10 = vsel %vm3111_vm3, %v3068_v13, %v5292_v12  ;;  %v6077_v22 = vunpack.i.l.bf16 %v9418_v58  ;;  %v9537_v44 = vld [vmem:[%s10745_s0 + $0x26d] sm:$0xff]  ;;  %v6072_v58 = vunpack.i.l.bf16 %v9426_v54  ;;  %v6404_v56 = vpack.i.bf16 %v342_v46, %v341_v39 }
 0x22a   :  { %v9442_v6 = vpop.permute.xlu1 %6085  ;;  %4882 = vmatprep.mubr.msk.bf16.mxu0 %vm6611_vm1, %v10837_v20  ;;  %4930 = vmatprep.mubr.msk.bf16.mxu1 %vm6611_vm1, %v10837_v20  ;;  %v6379_v43 = vpack.i.bf16 %v504_v60, %v503_v15  ;;  %v9527_v60 = vld [vmem:[%s10745_s0 + $0x26e] sm:$0xff]  ;;  %v9543_v34 = vpack.i.bf16 %v261_v50, %v260_v53  ;;  %v9549_v7 = vpack.i.bf16 %v425_v55, %v424_v24 }
 0x22b   :  { %v9454_v8 = vpop.permute.xlu0 %6080  ;;  %v6088_v49 = vunpack.i.h.bf16 %v9442_v6  ;;  %v6087_v45 = vunpack.i.l.bf16 %v9442_v6  ;;  %v6419_v35 = vpack.i.bf16 %v9537_v44, %v9532_v18  ;;  %v3174_v52 = vsel %vm3111_vm3, %v3092_v40, %v6072_v58 }
 0x22c   :  { %6375 = vrot.lane.b32.xlu1 %v6374_v1, %s6613_s16  ;;  %v3151_v1 = vsel %vm3111_vm3, %v3069_v61, %v5293_v0  ;;  %v6082_v59 = vunpack.i.l.bf16 %v9454_v8  ;;  %v3232_v0 = vsel %vm3193_vm4, %v3150_v10, %v6077_v22 }
 0x22d   :  { %6370 = vrot.lane.b32.xlu0 %v9434_v28, %s6614_s17  ;;  %v9472_v27 = vpop.f32.mrf.mxu0  ;;  %v3233_v6 = vsel %vm3193_vm4, %v3151_v1, %v6078_v32  ;;  %v3314_v46 = vsel %vm3275_vm5, %v3232_v0, %v6087_v45 }
 0x22e   :  { %10858 = vst [vmem:[#allocation8_spill] sm:$0xff] %v9472_v27  ;;  %v9479_v14 = vpop.permute.xlu1 %6095  ;;  %v3315_v53 = vsel %vm3275_vm5, %v3233_v6, %v6088_v49 }
 0x22f   :  { %v9487_v2 = vpop.permute.xlu0 %6090  ;;  %v4840_v63 = vpop.f32.mrf.mxu0  ;;  %v6097_v12 = vunpack.i.l.bf16 %v9479_v14 }
 0x230   :  { %6385 = vrot.lane.b32.xlu1 %v6384_v48, %s6615_s22  ;;  %v6073_v48 = vunpack.i.h.bf16 %v9426_v54  ;;  %v6424_v54 = vpack.i.bf16 %v9527_v60, %v9518_v5  ;;  %v6093_v24 = vunpack.i.h.bf16 %v9487_v2  ;;  %v6092_v40 = vunpack.i.l.bf16 %v9487_v2 }
 0x231   :  { %6380 = vrot.lane.b32.xlu0 %v6379_v43, %s6613_s16  ;;  %v9507_v21 = vpop.f32.mrf.mxu0  ;;  %v6083_v43 = vunpack.i.h.bf16 %v9454_v8  ;;  %v3396_v55 = vsel %vm3357_vm6, %v3314_v46, %v6097_v12 }
 0x232   :  { %v6106_v15 = vpop.permute.xlu1 %6105  ;;  %v3175_v8 = vsel %vm3111_vm3, %v3093_v42, %v6073_v48 }
 0x233   :  { %v9541_v11 = vpop.permute.xlu0 %6100  ;;  %v4841_v29 = vpop.f32.mrf.mxu0  ;;  %v6108_v63 = vunpack.i.h.bf16 %v6106_v15  ;;  %v6107_v39 = vunpack.i.l.bf16 %v6106_v15 }
 0x234   :  { %6395 = vrot.lane.b32.xlu1 %v9362_v30, %s6607_s10  ;;  %v6098_v30 = vunpack.i.h.bf16 %v9479_v14  ;;  %v3257_v14 = vsel %vm3193_vm4, %v3175_v8, %v6083_v43  ;;  %v6103_v10 = vunpack.i.h.bf16 %v9541_v11  ;;  %v6102_v1 = vunpack.i.l.bf16 %v9541_v11 }
 0x235   :  { %6390 = vrot.lane.b32.xlu0 %v6389_v9, %s6615_s22  ;;  %v3256_v9 = vsel %vm3193_vm4, %v3174_v52, %v6082_v59  ;;  %v3478_v22 = vsel %vm3439_vm7, %v3396_v55, %v6107_v39  ;;  %v3339_v6 = vsel %vm3275_vm5, %v3257_v14, %v6093_v24 }
 0x236   :  { %v6116_v36 = vpop.permute.xlu1 %6115  ;;  %v3397_v5 = vsel %vm3357_vm6, %v3315_v53, %v6098_v30  ;;  %v3338_v0 = vsel %vm3275_vm5, %v3256_v9, %v6092_v40  ;;  %v3421_v52 = vsel %vm3357_vm6, %v3339_v6, %v6103_v10  ;;  %v318_v9 = vld [vmem:[%s10745_s0 + $0x19b] sm:$0xff]  ;;  %v263_v40 = vld [vmem:[%s10745_s0 + $0x26a] sm:$0xff] }
 0x237   :  { %v6111_v13 = vpop.permute.xlu0 %6110  ;;  %v6118_v50 = vunpack.i.h.bf16 %v6116_v36  ;;  %v6117_v61 = vunpack.i.l.bf16 %v6116_v36  ;;  %v3479_v15 = vsel %vm3439_vm7, %v3397_v5, %v6108_v63  ;;  %v3420_v36 = vsel %vm3357_vm6, %v3338_v0, %v6102_v1  ;;  %v10860_v10 = vld [vmem:[#allocation7_spill] sm:$0xff] }
 0x238   :  { %6405 = vrot.lane.b32.xlu1 %v6404_v56, %s6612_s13  ;;  %v6113_v29 = vunpack.i.h.bf16 %v6111_v13  ;;  %v6112_v56 = vunpack.i.l.bf16 %v6111_v13 }
 0x239   :  { %6400 = vrot.lane.b32.xlu0 %v9543_v34, %s6609_s23  ;;  %v9573_v42 = vpop.f32.mrf.mxu0  ;;  %v3560_v48 = vsel %vm3521_vm8, %v3478_v22, %v6117_v61  ;;  %v3561_v58 = vsel %vm3521_vm8, %v3479_v15, %v6118_v50  ;;  %v317_v61 = vld [vmem:[%s10745_s0 + $0x193] sm:$0xff]  ;;  %v10861_v15 = vld [vmem:[#allocation14_spill] sm:$0xff] }
 0x23a   :  { %v6126_v32 = vpop.permute.xlu1 %6125  ;;  %v3502_v39 = vsel %vm3439_vm7, %v3420_v36, %v6112_v56  ;;  %v3503_v13 = vsel %vm3439_vm7, %v3421_v52, %v6113_v29  ;;  %v6444_v1 = vpack.i.bf16 %v318_v9, %v317_v61  ;;  %v344_v56 = vld [vmem:[%s10745_s0 + $0x26b] sm:$0xff] }
 0x23b   :  { %v6128_v60 = vunpack.i.h.bf16 %v6126_v32  ;;  %v6127_v2 = vunpack.i.l.bf16 %v6126_v32  ;;  %v6121_v18 = vpop.permute.xlu0 %6120  ;;  %v4844_v44 = vpop.f32.mrf.mxu0  ;;  %v400_v52 = vld [vmem:[%s10745_s0 + $0x1a4] sm:$0xff] }
 0x23c   :  { %6415 = vrot.lane.b32.xlu1 %v9549_v7, %s6614_s17  ;;  %v6123_v45 = vunpack.i.h.bf16 %v6121_v18  ;;  %v6122_v43 = vunpack.i.l.bf16 %v6121_v18  ;;  %v64_v18 = vld [vmem:[%s10745_s0 + $0x140] sm:$0xff]  ;;  %v10862_v44 = vld [vmem:[#allocation25_spill] sm:$0xff] }
 0x23d   :  { %v3642_v11 = vsel %vm3603_vm9, %v3560_v48, %v6127_v2  ;;  %v3643_v49 = vsel %vm3603_vm9, %v3561_v58, %v6128_v60  ;;  %6410 = vrot.lane.b32.xlu0 %v9434_v28, %s6610_s9  ;;  %v9589_v59 = vpop.f32.mrf.mxu0  ;;  %v5098_v60 = vunpack.i.h.bf16 %v10861_v15  ;;  %v5097_v2 = vunpack.i.l.bf16 %v10861_v15 }
 0x23e   :  { %v9593_v30 = vpop.permute.xlu1 %6135  ;;  %v3704_v12 = vpack.c.bf16 %v3643_v49, %v3642_v11  ;;  %v3584_v53 = vsel %vm3521_vm8, %v3502_v39, %v6122_v43  ;;  %v3585_v50 = vsel %vm3521_vm8, %v3503_v13, %v6123_v45  ;;  %v5158_v48 = vunpack.i.h.bf16 %v10862_v44  ;;  %v65_v11 = vld [vmem:[%s10745_s0 + $0x148] sm:$0xff]  ;;  %v88_v49 = vld [vmem:[%s10745_s0 + $0x200] sm:$0xff]  ;;  %v10863_v43 = vld [vmem:[#allocation37_spill] sm:$0xff] }
 0x23f   :  { %v6131_v8 = vpop.permute.xlu0 %6130  ;;  %v4845_v63 = vpop.f32.mrf.mxu0  ;;  %v5157_v58 = vunpack.i.l.bf16 %v10862_v44  ;;  %v89_v45 = vld [vmem:[%s10745_s0 + $0x208] sm:$0xff]  ;;  %v5298_v0 = vunpack.i.h.bf16 %v10863_v43  ;;  %v5297_v6 = vunpack.i.l.bf16 %v10863_v43  ;;  %v3071_v61 = vsel %vm3029_vm2, %v65_v11, %v5098_v60  ;;  %v9716_v44 = vld [vmem:[%s10745_s0 + $0x27d] sm:$0xff] }
 0x240   :  { %v6133_v28 = vunpack.i.h.bf16 %v6131_v8  ;;  %v6132_v46 = vunpack.i.l.bf16 %v6131_v8  ;;  %6425 = vrot.lane.b32.xlu1 %v6424_v54, %s6615_s22  ;;  %4883 = vmatmul.mubr.msk.bf16.gmra.mxu0 %vm3753_vm10, %v3704_v12  ;;  %v401_v8 = vld [vmem:[%s10745_s0 + $0x1ac] sm:$0xff]  ;;  %v6138_v15 = vunpack.i.h.bf16 %v9593_v30  ;;  %v6137_v60 = vunpack.i.l.bf16 %v9593_v30 }
 0x241   :  { %6420 = vrot.lane.b32.xlu0 %v6419_v35, %s6613_s16  ;;  %4886 = vmatprep.mubr.msk.bf16.mxu0 %vm6611_vm1, %v10837_v20  ;;  %v262_v35 = vld [vmem:[%s10745_s0 + $0x262] sm:$0xff]  ;;  %v3094_v9 = vsel %vm3029_vm2, %v88_v49, %v5157_v58 }
 0x242   :  { %v3666_v54 = vsel %vm3603_vm9, %v3584_v53, %v6132_v46  ;;  %v3667_v14 = vsel %vm3603_vm9, %v3585_v50, %v6133_v28  ;;  %v9614_v24 = vpop.permute.xlu1 %6145  ;;  %v9631_v22 = vpack.i.bf16 %v263_v40, %v262_v35  ;;  %v9673_v63 = vld [vmem:[%s10745_s0 + $0x1a5] sm:$0xff]  ;;  %v9682_v28 = vld [vmem:[%s10745_s0 + $0x1ad] sm:$0xff]  ;;  %v427_v53 = vld [vmem:[%s10745_s0 + $0x27c] sm:$0xff]  ;;  %v3070_v50 = vsel %vm3029_vm2, %v64_v18, %v5097_v2 }
 0x243   :  { %v9622_v55 = vpop.permute.xlu0 %6140  ;;  %v3716_v5 = vpack.c.bf16 %v3667_v14, %v3666_v54  ;;  %v426_v46 = vld [vmem:[%s10745_s0 + $0x274] sm:$0xff]  ;;  %v3095_v54 = vsel %vm3029_vm2, %v89_v45, %v5158_v48  ;;  %v9697_v35 = vld [vmem:[%s10745_s0 + $0x1a6] sm:$0xff]  ;;  %v9726_v58 = vld [vmem:[%s10745_s0 + $0x27e] sm:$0xff]  ;;  %v6147_v30 = vunpack.i.l.bf16 %v9614_v24  ;;  %v6474_v45 = vpack.i.bf16 %v9682_v28, %v9673_v63 }
 0x244   :  { %6435 = vrot.lane.b32.xlu1 %v10860_v10, %s6609_s23  ;;  %v9702_v40 = vld [vmem:[%s10745_s0 + $0x1ae] sm:$0xff]  ;;  %v3152_v10 = vsel %vm3111_vm3, %v3070_v50, %v5297_v6  ;;  %v9721_v48 = vld [vmem:[%s10745_s0 + $0x276] sm:$0xff]  ;;  %v6143_v11 = vunpack.i.h.bf16 %v9622_v55  ;;  %v6142_v49 = vunpack.i.l.bf16 %v9622_v55  ;;  %v9739_v43 = vpack.i.bf16 %v427_v53, %v426_v46 }
 0x245   :  { %6430 = vrot.lane.b32.xlu0 %v9543_v34, %s6607_s10  ;;  %v9628_v32 = vpop.f32.mrf.mxu0  ;;  %4931 = vmatmul.mubr.msk.bf16.gmra.mxu1 %vm3753_vm10, %v3716_v5  ;;  %v343_v34 = vld [vmem:[%s10745_s0 + $0x263] sm:$0xff]  ;;  %v9707_v5 = vld [vmem:[%s10745_s0 + $0x275] sm:$0xff]  ;;  %v6489_v6 = vpack.i.bf16 %v9726_v58, %v9721_v48  ;;  %v3177_v55 = vsel %vm3111_vm3, %v3095_v54, %v6138_v15 }
 0x246   :  { %v9640_v29 = vpop.permute.xlu1 %6155  ;;  %4934 = vmatprep.mubr.msk.bf16.mxu1 %vm6611_vm1, %v10837_v20  ;;  %v6449_v13 = vpack.i.bf16 %v344_v56, %v343_v34  ;;  %v6148_v34 = vunpack.i.h.bf16 %v9614_v24  ;;  %v9732_v56 = vpack.i.bf16 %v401_v8, %v400_v52  ;;  %v6484_v24 = vpack.i.bf16 %v9702_v40, %v9697_v35  ;;  %v346_v48 = vld [vmem:[%s10745_s0 + $0x27b] sm:$0xff] }
 0x247   :  { %v9661_v12 = vpop.permute.xlu0 %6150  ;;  %v4848_v36 = vpop.f32.mrf.mxu0  ;;  %v6158_v52 = vunpack.i.h.bf16 %v9640_v29  ;;  %v6157_v8 = vunpack.i.l.bf16 %v9640_v29  ;;  %v3234_v50 = vsel %vm3193_vm4, %v3152_v10, %v6142_v49 }
 0x248   :  { %6445 = vrot.lane.b32.xlu1 %v6444_v1, %s6612_s13  ;;  %v3153_v1 = vsel %vm3111_vm3, %v3071_v61, %v5298_v0  ;;  %v3176_v36 = vsel %vm3111_vm3, %v3094_v9, %v6137_v60  ;;  %v3259_v28 = vsel %vm3193_vm4, %v3177_v55, %v6148_v34  ;;  %v6153_v46 = vunpack.i.h.bf16 %v9661_v12 }
 0x249   :  { %6440 = vrot.lane.b32.xlu0 %v9631_v22, %s6609_s23  ;;  %v9677_v39 = vpop.f32.mrf.mxu0  ;;  %v6152_v53 = vunpack.i.l.bf16 %v9661_v12  ;;  %v3235_v61 = vsel %vm3193_vm4, %v3153_v1, %v6143_v11 }
 0x24a   :  { %v6166_v14 = vpop.permute.xlu1 %6165 }
 0x24b   :  { %v6161_v2 = vpop.permute.xlu0 %6160  ;;  %v4849_v18 = vpop.f32.mrf.mxu0  ;;  %v6168_v9 = vunpack.i.h.bf16 %v6166_v14  ;;  %v6167_v54 = vunpack.i.l.bf16 %v6166_v14  ;;  %v3316_v14 = vsel %vm3275_vm5, %v3234_v50, %v6152_v53 }
 0x24c   :  { %6455 = vrot.lane.b32.xlu1 %v9366_v47, %s6610_s9  ;;  %v6479_v47 = vpack.i.bf16 %v9716_v44, %v9707_v5  ;;  %v6163_v35 = vunpack.i.h.bf16 %v6161_v2  ;;  %v6162_v40 = vunpack.i.l.bf16 %v6161_v2  ;;  %v3341_v18 = vsel %vm3275_vm5, %v3259_v28, %v6158_v52 }
 0x24d   :  { %6450 = vrot.lane.b32.xlu0 %v6449_v13, %s6612_s13  ;;  %v3258_v13 = vsel %vm3193_vm4, %v3176_v36, %v6147_v30  ;;  %v3317_v30 = vsel %vm3275_vm5, %v3235_v61, %v6153_v46  ;;  %v3423_v49 = vsel %vm3357_vm6, %v3341_v18, %v6168_v9 }
 0x24e   :  { %v6176_v0 = vpop.permute.xlu1 %6175  ;;  %v3340_v12 = vsel %vm3275_vm5, %v3258_v13, %v6157_v8  ;;  %v3398_v52 = vsel %vm3357_vm6, %v3316_v14, %v6162_v40  ;;  %v3399_v8 = vsel %vm3357_vm6, %v3317_v30, %v6163_v35 }
 0x24f   :  { %v6171_v63 = vpop.permute.xlu0 %6170  ;;  %v6178_v5 = vunpack.i.h.bf16 %v6176_v0  ;;  %v6177_v15 = vunpack.i.l.bf16 %v6176_v0  ;;  %v3422_v2 = vsel %vm3357_vm6, %v3340_v12, %v6167_v54 }
 0x250   :  { %6465 = vrot.lane.b32.xlu1 %v9732_v56, %s6614_s17  ;;  %v6173_v44 = vunpack.i.h.bf16 %v6171_v63  ;;  %v6172_v10 = vunpack.i.l.bf16 %v6171_v63 }
 0x251   :  { %6460 = vrot.lane.b32.xlu0 %v9549_v7, %s6610_s9  ;;  %v9761_v29 = vpop.f32.mrf.mxu0  ;;  %v3504_v63 = vsel %vm3439_vm7, %v3422_v2, %v6177_v15  ;;  %v3505_v13 = vsel %vm3439_vm7, %v3423_v49, %v6178_v5  ;;  %v6601_v2 = vld [vmem:[%s10745_s0 + $0x1a2] sm:$0xff] }
 0x252   :  { %v6186_v60 = vpop.permute.xlu1 %6185  ;;  %v3480_v28 = vsel %vm3439_vm7, %v3398_v52, %v6172_v10  ;;  %v3481_v46 = vsel %vm3439_vm7, %v3399_v8, %v6173_v44  ;;  %v264_v44 = vld [vmem:[%s10745_s0 + $0x272] sm:$0xff]  ;;  %v265_v10 = vld [vmem:[%s10745_s0 + $0x27a] sm:$0xff] }
 0x253   :  { %v6181_v34 = vpop.permute.xlu0 %6180  ;;  %v4852_v1 = vpop.f32.mrf.mxu0  ;;  %v6188_v7 = vunpack.i.h.bf16 %v6186_v60  ;;  %v6187_v11 = vunpack.i.l.bf16 %v6186_v60 }
 0x254   :  { %6475 = vrot.lane.b32.xlu1 %v6474_v45, %s6613_s16  ;;  %v6183_v0 = vunpack.i.h.bf16 %v6181_v34  ;;  %v6182_v36 = vunpack.i.l.bf16 %v6181_v34 }
 0x255   :  { %6470 = vrot.lane.b32.xlu0 %v9739_v43, %s6614_s17  ;;  %v9772_v55 = vpop.f32.mrf.mxu0  ;;  %v3586_v54 = vsel %vm3521_vm8, %v3504_v63, %v6187_v11  ;;  %v3587_v60 = vsel %vm3521_vm8, %v3505_v13, %v6188_v7  ;;  %v10864_v63 = vld [vmem:[#allocation13_spill] sm:$0xff] }
 0x256   :  { %v6196_v45 = vpop.permute.xlu1 %6195  ;;  %v3562_v35 = vsel %vm3521_vm8, %v3480_v28, %v6182_v36  ;;  %v3563_v5 = vsel %vm3521_vm8, %v3481_v46, %v6183_v0  ;;  %v345_v0 = vld [vmem:[%s10745_s0 + $0x273] sm:$0xff]  ;;  %v320_v36 = vld [vmem:[%s10745_s0 + $0x1ab] sm:$0xff]  ;;  %v5102_v13 = vunpack.i.l.bf16 %v10864_v63  ;;  %v5103_v28 = vunpack.i.h.bf16 %v10864_v63 }
 0x257   :  { %v6198_v53 = vunpack.i.h.bf16 %v6196_v45  ;;  %v6197_v50 = vunpack.i.l.bf16 %v6196_v45  ;;  %v6191_v61 = vpop.permute.xlu0 %6190  ;;  %v4853_v9 = vpop.f32.mrf.mxu0  ;;  %v6514_v45 = vpack.i.bf16 %v346_v48, %v345_v0  ;;  %v66_v46 = vld [vmem:[%s10745_s0 + $0x150] sm:$0xff] }
 0x258   :  { %v6193_v40 = vunpack.i.h.bf16 %v6191_v61  ;;  %v6192_v12 = vunpack.i.l.bf16 %v6191_v61  ;;  %6485 = vrot.lane.b32.xlu1 %v6484_v24, %s6615_s22  ;;  %v9890_v48 = vld [vmem:[%s10745_s0 + $0x1b5] sm:$0xff] }
 0x259   :  { %v3668_v15 = vsel %vm3603_vm9, %v3586_v54, %v6197_v50  ;;  %v3669_v18 = vsel %vm3603_vm9, %v3587_v60, %v6198_v53  ;;  %6480 = vrot.lane.b32.xlu0 %v6479_v47, %s6613_s16  ;;  %v9803_v47 = vpack.i.bf16 %v265_v10, %v264_v44  ;;  %v10865_v53 = vld [vmem:[#allocation24_spill] sm:$0xff]  ;;  %v67_v60 = vld [vmem:[%s10745_s0 + $0x158] sm:$0xff] }
 0x25a   :  { %v3717_v34 = vpack.c.bf16 %v3669_v18, %v3668_v15  ;;  %v3644_v24 = vsel %vm3603_vm9, %v3562_v35, %v6192_v12  ;;  %v3645_v1 = vsel %vm3603_vm9, %v3563_v5, %v6193_v40  ;;  %v9796_v14 = vpop.permute.xlu1 %6205  ;;  %v5163_v50 = vunpack.i.h.bf16 %v10865_v53  ;;  %v90_v40 = vld [vmem:[%s10745_s0 + $0x210] sm:$0xff]  ;;  %v91_v12 = vld [vmem:[%s10745_s0 + $0x218] sm:$0xff] }
 0x25b   :  { %v3705_v30 = vpack.c.bf16 %v3645_v1, %v3644_v24  ;;  %v9798_v7 = vpop.permute.xlu0 %6200  ;;  %v5162_v61 = vunpack.i.l.bf16 %v10865_v53  ;;  %v10866_v35 = vld [vmem:[#allocation40_spill] sm:$0xff]  ;;  %v3072_v24 = vsel %vm3029_vm2, %v66_v46, %v5102_v13  ;;  %v6208_v13 = vunpack.i.h.bf16 %v9796_v14 }
 0x25c   :  { %6495 = vrot.lane.b32.xlu1 %v9631_v22, %s6607_s10  ;;  %4935 = vmatmul.mubr.msk.bf16.gmra.mxu1 %vm3753_vm10, %v3717_v34  ;;  %v6602_v22 = vld [vmem:[%s10745_s0 + $0x1aa] sm:$0xff]  ;;  %v5303_v5 = vunpack.i.h.bf16 %v10866_v35  ;;  %v5302_v15 = vunpack.i.l.bf16 %v10866_v35  ;;  %v3097_v0 = vsel %vm3029_vm2, %v91_v12, %v5163_v50  ;;  %v9914_v53 = vld [vmem:[%s10745_s0 + $0x1b6] sm:$0xff]  ;;  %v9919_v50 = vld [vmem:[%s10745_s0 + $0x1be] sm:$0xff] }
 0x25d   :  { %6490 = vrot.lane.b32.xlu0 %v6489_v6, %s6615_s22  ;;  %v9809_v11 = vpop.f32.mrf.mxu0  ;;  %4887 = vmatmul.mubr.msk.bf16.gmra.mxu0 %vm3753_vm10, %v3705_v30  ;;  %v6499_v49 = vpack.i.bf16 %v6602_v22, %v6601_v2  ;;  %v319_v6 = vld [vmem:[%s10745_s0 + $0x1a3] sm:$0xff]  ;;  %v429_v1 = vld [vmem:[%s10745_s0 + $0x28c] sm:$0xff]  ;;  %v3073_v22 = vsel %vm3029_vm2, %v67_v60, %v5103_v28 }
 0x25e   :  { %v9824_v58 = vpop.permute.xlu1 %6215  ;;  %4890 = vmatprep.mubr.msk.bf16.mxu0 %vm6611_vm1, %v10837_v20  ;;  %4938 = vmatprep.mubr.msk.bf16.mxu1 %vm6611_vm1, %v10837_v20  ;;  %v6509_v54 = vpack.i.bf16 %v320_v36, %v319_v6  ;;  %v428_v34 = vld [vmem:[%s10745_s0 + $0x284] sm:$0xff]  ;;  %v9881_v2 = vld [vmem:[%s10745_s0 + $0x28d] sm:$0xff]  ;;  %v3155_v63 = vsel %vm3111_vm3, %v3073_v22, %v5303_v5  ;;  %v6604_v12 = vld [vmem:[%s10745_s0 + $0x1bc] sm:$0xff] }
 0x25f   :  { %v9836_v52 = vpop.permute.xlu0 %6210  ;;  %v4856_v8 = vpop.f32.mrf.mxu0  ;;  %v9876_v30 = vld [vmem:[%s10745_s0 + $0x285] sm:$0xff]  ;;  %v9895_v6 = vld [vmem:[%s10745_s0 + $0x1bd] sm:$0xff]  ;;  %v9909_v46 = vld [vmem:[%s10745_s0 + $0x28e] sm:$0xff]  ;;  %v9925_v60 = vpack.i.bf16 %v429_v1, %v428_v34  ;;  %v6218_v5 = vunpack.i.h.bf16 %v9824_v58 }
 0x260   :  { %6505 = vrot.lane.b32.xlu1 %v9803_v47, %s6609_s23  ;;  %v9900_v36 = vld [vmem:[%s10745_s0 + $0x286] sm:$0xff]  ;;  %v3154_v8 = vsel %vm3111_vm3, %v3072_v24, %v5302_v15  ;;  %v6217_v15 = vunpack.i.l.bf16 %v9824_v58  ;;  %v6213_v34 = vunpack.i.h.bf16 %v9836_v52  ;;  %v6212_v24 = vunpack.i.l.bf16 %v9836_v52 }
 0x261   :  { %6500 = vrot.lane.b32.xlu0 %v6499_v49, %s6609_s23  ;;  %v9848_v9 = vpop.f32.mrf.mxu0  ;;  %v3096_v49 = vsel %vm3029_vm2, %v90_v40, %v5162_v61  ;;  %v6203_v61 = vunpack.i.h.bf16 %v9798_v7  ;;  %v6603_v40 = vld [vmem:[%s10745_s0 + $0x1b4] sm:$0xff]  ;;  %v6554_v58 = vpack.i.bf16 %v9909_v46, %v9900_v36 }
 0x262   :  { %v9861_v18 = vpop.permute.xlu1 %6225  ;;  %v6529_v35 = vpack.i.bf16 %v6604_v12, %v6603_v40 }
 0x263   :  { %v9863_v44 = vpop.permute.xlu0 %6220  ;;  %v4857_v10 = vpop.f32.mrf.mxu0  ;;  %v6228_v22 = vunpack.i.h.bf16 %v9861_v18 }
 0x264   :  { %6515 = vrot.lane.b32.xlu1 %v6514_v45, %s6612_s13  ;;  %v6207_v45 = vunpack.i.l.bf16 %v9796_v14  ;;  %v6202_v14 = vunpack.i.l.bf16 %v9798_v7  ;;  %v6544_v7 = vpack.i.bf16 %v9881_v2, %v9876_v30  ;;  %v6539_v10 = vpack.i.bf16 %v9895_v6, %v9890_v48 }
 0x265   :  { %6510 = vrot.lane.b32.xlu0 %v6509_v54, %s6612_s13  ;;  %v3237_v2 = vsel %vm3193_vm4, %v3155_v63, %v6208_v13  ;;  %v6227_v48 = vunpack.i.l.bf16 %v9861_v18 }
 0x266   :  { %v6236_v28 = vpop.permute.xlu1 %6235  ;;  %v3236_v30 = vsel %vm3193_vm4, %v3154_v8, %v6207_v45  ;;  %v3178_v6 = vsel %vm3111_vm3, %v3096_v49, %v6202_v14  ;;  %v6223_v49 = vunpack.i.h.bf16 %v9863_v44 }
 0x267   :  { %v9923_v54 = vpop.permute.xlu0 %6230  ;;  %v6238_v40 = vunpack.i.h.bf16 %v6236_v28  ;;  %v6237_v12 = vunpack.i.l.bf16 %v6236_v28  ;;  %v3318_v46 = vsel %vm3275_vm5, %v3236_v30, %v6217_v15  ;;  %v3260_v18 = vsel %vm3193_vm4, %v3178_v6, %v6212_v24 }
 0x268   :  { %6525 = vrot.lane.b32.xlu1 %v9739_v43, %s6610_s9  ;;  %v3319_v43 = vsel %vm3275_vm5, %v3237_v2, %v6218_v5  ;;  %v3400_v28 = vsel %vm3357_vm6, %v3318_v46, %v6227_v48  ;;  %v6233_v14 = vunpack.i.h.bf16 %v9923_v54  ;;  %v6232_v5 = vunpack.i.l.bf16 %v9923_v54  ;;  %v9980_v54 = vld [vmem:[%s10745_s0 + $0x282] sm:$0xff] }
 0x269   :  { %6520 = vrot.lane.b32.xlu0 %v9732_v56, %s6610_s9  ;;  %v9945_v1 = vpop.f32.mrf.mxu0  ;;  %v3179_v56 = vsel %vm3111_vm3, %v3097_v0, %v6203_v61  ;;  %v6222_v0 = vunpack.i.l.bf16 %v9863_v44  ;;  %v3401_v61 = vsel %vm3357_vm6, %v3319_v43, %v6228_v22  ;;  %v3482_v24 = vsel %vm3439_vm7, %v3400_v28, %v6237_v12  ;;  %v267_v43 = vld [vmem:[%s10745_s0 + $0x28a] sm:$0xff] }
 0x26a   :  { %v6246_v52 = vpop.permute.xlu1 %6245  ;;  %v3261_v63 = vsel %vm3193_vm4, %v3179_v56, %v6213_v34  ;;  %v3483_v34 = vsel %vm3439_vm7, %v3401_v61, %v6238_v40 }
 0x26b   :  { %v6241_v38 = vpop.permute.xlu0 %6240  ;;  %v4860_v36 = vpop.f32.mrf.mxu0  ;;  %v6248_v8 = vunpack.i.h.bf16 %v6246_v52  ;;  %v6247_v45 = vunpack.i.l.bf16 %v6246_v52 }
 0x26c   :  { %6535 = vrot.lane.b32.xlu1 %v9925_v60, %s6614_s17  ;;  %v6243_v48 = vunpack.i.h.bf16 %v6241_v38  ;;  %v6242_v56 = vunpack.i.l.bf16 %v6241_v38  ;;  %v3342_v38 = vsel %vm3275_vm5, %v3260_v18, %v6222_v0 }
 0x26d   :  { %6530 = vrot.lane.b32.xlu0 %v6529_v35, %s6614_s17  ;;  %v9966_v13 = vpop.f32.mrf.mxu0  ;;  %v3564_v35 = vsel %vm3521_vm8, %v3482_v24, %v6247_v45  ;;  %v3565_v6 = vsel %vm3521_vm8, %v3483_v34, %v6248_v8  ;;  %v3424_v45 = vsel %vm3357_vm6, %v3342_v38, %v6232_v5 }
 0x26e   :  { %v6256_v15 = vpop.permute.xlu1 %6255  ;;  %v3506_v24 = vsel %vm3439_vm7, %v3424_v45, %v6242_v56 }
 0x26f   :  { %v6258_v30 = vunpack.i.h.bf16 %v6256_v15  ;;  %v6257_v2 = vunpack.i.l.bf16 %v6256_v15  ;;  %v6251_v44 = vpop.permute.xlu0 %6250  ;;  %v4861_v52 = vpop.f32.mrf.mxu0  ;;  %v6564_v15 = vpack.i.bf16 %v267_v43, %v9980_v54  ;;  %v10868_v43 = vld [vmem:[#allocation16_spill] sm:$0xff] }
 0x270   :  { %6545 = vrot.lane.b32.xlu1 %v6544_v7, %s6613_s16  ;;  %v6253_v12 = vunpack.i.h.bf16 %v6251_v44  ;;  %v6252_v36 = vunpack.i.l.bf16 %v6251_v44  ;;  %v3343_v7 = vsel %vm3275_vm5, %v3261_v63, %v6223_v49  ;;  %v10867_v49 = vpack.i.bf16 %v9919_v50, %v9914_v53  ;;  %v511_v50 = vld [vmem:[%s10745_s0 + $0x295] sm:$0xff] }
 0x271   :  { %v3646_v22 = vsel %vm3603_vm9, %v3564_v35, %v6257_v2  ;;  %v3647_v40 = vsel %vm3603_vm9, %v3565_v6, %v6258_v30  ;;  %6540 = vrot.lane.b32.xlu0 %v6539_v10, %s6613_s16  ;;  %v3425_v28 = vsel %vm3357_vm6, %v3343_v7, %v6233_v14  ;;  %v348_v2 = vld [vmem:[%s10745_s0 + $0x28b] sm:$0xff]  ;;  %v512_v35 = vld [vmem:[%s10745_s0 + $0x29d] sm:$0xff] }
 0x272   :  { %v3706_v46 = vpack.c.bf16 %v3647_v40, %v3646_v22  ;;  %v9990_v8 = vpop.permute.xlu1 %6265  ;;  %v3507_v34 = vsel %vm3439_vm7, %v3425_v28, %v6243_v48  ;;  %v3588_v18 = vsel %vm3521_vm8, %v3506_v24, %v6252_v36  ;;  %v10032_v48 = vld [vmem:[%s10745_s0 + $0x294] sm:$0xff]  ;;  %v5107_v22 = vunpack.i.l.bf16 %v10868_v43  ;;  %v68_v36 = vld [vmem:[%s10745_s0 + $0x160] sm:$0xff]  ;;  %v69_v7 = vld [vmem:[%s10745_s0 + $0x168] sm:$0xff] }
 0x273   :  { %v6261_v61 = vpop.permute.xlu0 %6260  ;;  %v3589_v63 = vsel %vm3521_vm8, %v3507_v34, %v6253_v12  ;;  %v6584_v40 = vpack.i.bf16 %v512_v35, %v511_v50  ;;  %v5108_v12 = vunpack.i.h.bf16 %v10868_v43  ;;  %v592_v34 = vld [vmem:[%s10745_s0 + $0x296] sm:$0xff] }
 0x274   :  { %v6263_v30 = vunpack.i.h.bf16 %v6261_v61  ;;  %v6262_v10 = vunpack.i.l.bf16 %v6261_v61  ;;  %6555 = vrot.lane.b32.xlu1 %v6554_v58, %s6615_s22  ;;  %4891 = vmatmul.mubr.msk.bf16.gmra.mxu0 %vm3753_vm10, %v3706_v46  ;;  %v347_v58 = vld [vmem:[%s10745_s0 + $0x283] sm:$0xff] }
 0x275   :  { %6550 = vrot.lane.b32.xlu0 %v10867_v49, %s6615_s22  ;;  %4894 = vmatprep.mubr.msk.bf16.mxu0 %vm6611_vm1, %v10837_v20  ;;  %v6569_v53 = vpack.i.bf16 %v348_v2, %v347_v58  ;;  %v10869_v46 = vld [vmem:[#allocation27_spill] sm:$0xff]  ;;  %v6267_v49 = vunpack.i.l.bf16 %v9990_v8 }
 0x276   :  { %v3670_v0 = vsel %vm3603_vm9, %v3588_v18, %v6262_v10  ;;  %v3671_v14 = vsel %vm3603_vm9, %v3589_v63, %v6263_v30  ;;  %v6276_v5 = vpop.permute.xlu1 %6275  ;;  %v5168_v45 = vunpack.i.h.bf16 %v10869_v46  ;;  %v5167_v28 = vunpack.i.l.bf16 %v10869_v46  ;;  %v593_v30 = vld [vmem:[%s10745_s0 + $0x29e] sm:$0xff]  ;;  %v93_v18 = vld [vmem:[%s10745_s0 + $0x228] sm:$0xff] }
 0x277   :  { %v3718_v44 = vpack.c.bf16 %v3671_v14, %v3670_v0  ;;  %v10015_v52 = vpop.permute.xlu0 %6270  ;;  %v92_v10 = vld [vmem:[%s10745_s0 + $0x220] sm:$0xff]  ;;  %v6268_v63 = vunpack.i.h.bf16 %v9990_v8  ;;  %v3074_v14 = vsel %vm3029_vm2, %v68_v36, %v5107_v22  ;;  %v6278_v58 = vunpack.i.h.bf16 %v6276_v5 }
 0x278   :  { %6565 = vrot.lane.b32.xlu1 %v6564_v15, %s6609_s23  ;;  %v6277_v2 = vunpack.i.l.bf16 %v6276_v5  ;;  %v6273_v50 = vunpack.i.h.bf16 %v10015_v52  ;;  %v6272_v35 = vunpack.i.l.bf16 %v10015_v52  ;;  %v6589_v8 = vpack.i.bf16 %v593_v30, %v592_v34 }
 0x279   :  { %6560 = vrot.lane.b32.xlu0 %v9803_v47, %s6607_s10  ;;  %4939 = vmatmul.mubr.msk.bf16.gmra.mxu1 %vm3753_vm10, %v3718_v44  ;;  %v431_v47 = vld [vmem:[%s10745_s0 + $0x29c] sm:$0xff]  ;;  %v3098_v43 = vsel %vm3029_vm2, %v92_v10, %v5167_v28  ;;  %v3099_v22 = vsel %vm3029_vm2, %v93_v18, %v5168_v45 }
 0x27a   :  { %v10027_v6 = vpop.permute.xlu1 %6285  ;;  %4942 = vmatprep.mubr.msk.bf16.mxu1 %vm6611_vm1, %v10837_v20  ;;  %v6579_v38 = vpack.i.bf16 %v431_v47, %v10032_v48 }
 0x27b   :  { %v10039_v56 = vpop.permute.xlu0 %6280  ;;  %v6288_v52 = vunpack.i.h.bf16 %v10027_v6 }
 0x27c   :  { %6575 = vrot.lane.b32.xlu1 %v9925_v60, %s6610_s9  ;;  %v10870_v60 = vld [vmem:[#allocation39_spill] sm:$0xff] }
 0x27d   :  { %6570 = vrot.lane.b32.xlu0 %v6569_v53, %s6612_s13  ;;  %v5308_v61 = vunpack.i.h.bf16 %v10870_v60  ;;  %v5307_v15 = vunpack.i.l.bf16 %v10870_v60  ;;  %v3075_v53 = vsel %vm3029_vm2, %v69_v7, %v5108_v12  ;;  %v3180_v12 = vsel %vm3111_vm3, %v3098_v43, %v6267_v49 }
 0x27e   :  { %v10057_v24 = vpop.permute.xlu1 %6295  ;;  %v3181_v7 = vsel %vm3111_vm3, %v3099_v22, %v6268_v63  ;;  %v3262_v28 = vsel %vm3193_vm4, %v3180_v12, %v6277_v2 }
 0x27f   :  { %v10073_v0 = vpop.permute.xlu0 %6290  ;;  %v3156_v5 = vsel %vm3111_vm3, %v3074_v14, %v5307_v15  ;;  %v3263_v45 = vsel %vm3193_vm4, %v3181_v7, %v6278_v58  ;;  %v6283_v15 = vunpack.i.h.bf16 %v10039_v56  ;;  %v6297_v63 = vunpack.i.l.bf16 %v10057_v24 }
 0x280   :  { %6585 = vrot.lane.b32.xlu1 %v6584_v40, %s6613_s16  ;;  %v10077_v44 = vpop.f32.mrf.mxu1  ;;  %v3157_v40 = vsel %vm3111_vm3, %v3075_v53, %v5308_v61  ;;  %v6282_v61 = vunpack.i.l.bf16 %v10039_v56  ;;  %v3238_v10 = vsel %vm3193_vm4, %v3156_v5, %v6272_v35  ;;  %v349_v56 = vld [vmem:[%s10745_s0 + $0x293] sm:$0xff]  ;;  %v6292_v14 = vunpack.i.l.bf16 %v10073_v0 }
 0x281   :  { %10871 = vst [vmem:[#allocation19_spill] sm:$0xff] %v10077_v44  ;;  %6580 = vrot.lane.b32.xlu0 %v6579_v38, %s6614_s17  ;;  %v10083_v47 = vpop.f32.mrf.mxu0  ;;  %v6287_v38 = vunpack.i.l.bf16 %v10027_v6  ;;  %v3239_v18 = vsel %vm3193_vm4, %v3157_v40, %v6273_v50  ;;  %v6298_v6 = vunpack.i.h.bf16 %v10057_v24  ;;  %v268_v24 = vld [vmem:[%s10745_s0 + $0x292] sm:$0xff] }
 0x282   :  { %v6306_v36 = vpop.permute.xlu1 %6305  ;;  %v4912_v46 = vpop.f32.mrf.mxu1 }
 0x283   :  { %v6301_v60 = vpop.permute.xlu0 %6300  ;;  %v4864_v34 = vpop.f32.mrf.mxu0  ;;  %v6308_v58 = vunpack.i.h.bf16 %v6306_v36  ;;  %v6307_v2 = vunpack.i.l.bf16 %v6306_v36  ;;  %v3344_v35 = vsel %vm3275_vm5, %v3262_v28, %v6287_v38  ;;  %v3320_v46 = vsel %vm3275_vm5, %v3238_v10, %v6282_v61 }
 0x284   :  { %1160 = vrot.lane.b32.xlu1 %v9980_v54, %s6607_s10  ;;  %v10099_v30 = vpop.f32.mrf.mxu1  ;;  %v6293_v54 = vunpack.i.h.bf16 %v10073_v0  ;;  %v6303_v43 = vunpack.i.h.bf16 %v6301_v60  ;;  %v6302_v22 = vunpack.i.l.bf16 %v6301_v60  ;;  %v3321_v0 = vsel %vm3275_vm5, %v3239_v18, %v6283_v15 }
 0x285   :  { %10872 = vst [vmem:[#allocation34_spill] sm:$0xff] %v10099_v30  ;;  %6590 = vrot.lane.b32.xlu0 %v6589_v8, %s6615_s22  ;;  %v10106_v49 = vpop.f32.mrf.mxu0  ;;  %v3345_v8 = vsel %vm3275_vm5, %v3263_v45, %v6288_v52  ;;  %v3426_v7 = vsel %vm3357_vm6, %v3344_v35, %v6297_v63  ;;  %v432_v52 = vld [vmem:[%s10745_s0 + $0x2a4] sm:$0xff]  ;;  %v3402_v60 = vsel %vm3357_vm6, %v3320_v46, %v6292_v14 }
 0x286   :  { %v6316_v53 = vpop.permute.xlu1 %6315  ;;  %v4913_v50 = vpop.f32.mrf.mxu1  ;;  %v3427_v34 = vsel %vm3357_vm6, %v3345_v8, %v6298_v6  ;;  %v3403_v28 = vsel %vm3357_vm6, %v3321_v0, %v6293_v54  ;;  %v3508_v45 = vsel %vm3439_vm7, %v3426_v7, %v6307_v2  ;;  %v3484_v10 = vsel %vm3439_vm7, %v3402_v60, %v6302_v22  ;;  %v513_v0 = vld [vmem:[%s10745_s0 + $0x2a5] sm:$0xff]  ;;  %v71_v60 = vld [vmem:[%s10745_s0 + $0x178] sm:$0xff] }
 0x287   :  { %v6311_v5 = vpop.permute.xlu0 %6310  ;;  %v4865_v40 = vpop.f32.mrf.mxu0  ;;  %v6318_v12 = vunpack.i.h.bf16 %v6316_v53  ;;  %v6317_v36 = vunpack.i.l.bf16 %v6316_v53  ;;  %v3509_v15 = vsel %vm3439_vm7, %v3427_v34, %v6308_v58  ;;  %v3485_v18 = vsel %vm3439_vm7, %v3403_v28, %v6303_v43  ;;  %v594_v43 = vld [vmem:[%s10745_s0 + $0x2a6] sm:$0xff] }
 0x288   :  { %1729 = vrot.lane.b32.xlu1 %v349_v56, %s6612_s13  ;;  %v6313_v50 = vunpack.i.h.bf16 %v6311_v5  ;;  %v6312_v38 = vunpack.i.l.bf16 %v6311_v5  ;;  %v10873_v7 = vld [vmem:[#allocation15_spill] sm:$0xff] }
 0x289   :  { %1405 = vrot.lane.b32.xlu0 %v268_v24, %s6609_s23  ;;  %v3590_v53 = vsel %vm3521_vm8, %v3508_v45, %v6317_v36  ;;  %v3591_v24 = vsel %vm3521_vm8, %v3509_v15, %v6318_v12  ;;  %v5112_v34 = vunpack.i.l.bf16 %v10873_v7  ;;  %v94_v45 = vld [vmem:[%s10745_s0 + $0x230] sm:$0xff]  ;;  %v95_v15 = vld [vmem:[%s10745_s0 + $0x238] sm:$0xff] }
 0x28a   :  { %v6326_v61 = vpop.permute.xlu1 %6325  ;;  %v3566_v54 = vsel %vm3521_vm8, %v3484_v10, %v6312_v38  ;;  %v3567_v58 = vsel %vm3521_vm8, %v3485_v18, %v6313_v50  ;;  %v10874_v50 = vld [vmem:[#allocation26_spill] sm:$0xff] }
 0x28b   :  { %v6328_v6 = vunpack.i.h.bf16 %v6326_v61  ;;  %v6327_v63 = vunpack.i.l.bf16 %v6326_v61  ;;  %v6321_v56 = vpop.permute.xlu0 %6320  ;;  %v5172_v38 = vunpack.i.l.bf16 %v10874_v50  ;;  %v5173_v28 = vunpack.i.h.bf16 %v10874_v50  ;;  %v10875_v61 = vld [vmem:[#allocation29_spill] sm:$0xff] }
 0x28c   :  { %v6323_v35 = vunpack.i.h.bf16 %v6321_v56  ;;  %v6322_v14 = vunpack.i.l.bf16 %v6321_v56  ;;  %2298 = vrot.lane.b32.xlu1 %v432_v52, %s6614_s17  ;;  %v70_v52 = vld [vmem:[%s10745_s0 + $0x170] sm:$0xff]  ;;  %v5178_v10 = vunpack.i.h.bf16 %v10875_v61  ;;  %v5177_v18 = vunpack.i.l.bf16 %v10875_v61 }
 0x28d   :  { %v3672_v2 = vsel %vm3603_vm9, %v3590_v53, %v6327_v63  ;;  %v3673_v8 = vsel %vm3603_vm9, %v3591_v24, %v6328_v6  ;;  %2053 = vrot.lane.b32.xlu0 %v10032_v48, %s6610_s9  ;;  %v5113_v48 = vunpack.i.h.bf16 %v10873_v7  ;;  %v10876_v6 = vld [vmem:[#allocation42_spill] sm:$0xff]  ;;  %v97_v24 = vld [vmem:[%s10745_s0 + $0x248] sm:$0xff] }
 0x28e   :  { %v3719_v22 = vpack.c.bf16 %v3673_v8, %v3672_v2  ;;  %v3648_v5 = vsel %vm3603_vm9, %v3566_v54, %v6322_v14  ;;  %v3649_v40 = vsel %vm3603_vm9, %v3567_v58, %v6323_v35  ;;  %v10147_v46 = vpop.permute.xlu1 %6335  ;;  %v5312_v63 = vunpack.i.l.bf16 %v10876_v6  ;;  %v96_v53 = vld [vmem:[%s10745_s0 + $0x240] sm:$0xff] }
 0x28f   :  { %v3707_v12 = vpack.c.bf16 %v3649_v40, %v3648_v5  ;;  %v10152_v36 = vpop.permute.xlu0 %6330  ;;  %v5313_v35 = vunpack.i.h.bf16 %v10876_v6  ;;  %v10193_v14 = vld [vmem:[%s10747_s2] ss:$0 sm:$0xff]  ;;  %v3076_v58 = vsel %vm3029_vm2, %v70_v52, %v5112_v34  ;;  %v3077_v2 = vsel %vm3029_vm2, %v71_v60, %v5113_v48 }
 0x290   :  { %4943 = vmatmul.mubr.msk.bf16.gmra.mxu1 %vm3753_vm10, %v3719_v22  ;;  %2946 = vrot.lane.b32.xlu1 %v594_v43, %s6615_s22  ;;  %v3100_v8 = vsel %vm3029_vm2, %v94_v45, %v5172_v38  ;;  %v10202_v43 = vadd.f32 %v10193_v14, %v9249_v37  ;;  %v3101_v22 = vsel %vm3029_vm2, %v95_v15, %v5173_v28  ;;  %v6337_v60 = vunpack.i.l.bf16 %v10147_v46 }
 0x291   :  { %2622 = vrot.lane.b32.xlu0 %v513_v0, %s6613_s16  ;;  %4895 = vmatmul.mubr.msk.bf16.gmra.mxu0 %vm3753_vm10, %v3707_v12  ;;  %v10207_v5 = vadd.f32 %v10193_v14, %v9316_v33  ;;  %v10211_v40 = vadd.f32 %v10193_v14, %v9360_v31  ;;  %v10215_v0 = vadd.f32 %v10193_v14, %v9391_v23  ;;  %v6338_v15 = vunpack.i.h.bf16 %v10147_v46 }
 0x292   :  { %v10177_v56 = vpop.permute.xlu1 %6345  ;;  %4898 = vmatprep.mubr.msk.bf16.mxu0 %vm6611_vm1, %v10837_v20  ;;  %4946 = vmatprep.mubr.msk.bf16.mxu1 %vm6611_vm1, %v10837_v20  ;;  %v10218_v12 = vsel %vm3029_vm2, %v96_v53, %v5177_v18  ;;  %v10221_v37 = vsel %vm3029_vm2, %v97_v24, %v5178_v10  ;;  %v3158_v7 = vsel %vm3111_vm3, %v3076_v58, %v5312_v63  ;;  %v6332_v10 = vunpack.i.l.bf16 %v10152_v36 }
 0x293   :  { %v10195_v54 = vpop.permute.xlu0 %6340  ;;  %v10226_v33 = vadd.f32 %v10193_v14, %v9408_v4  ;;  %v3159_v31 = vsel %vm3111_vm3, %v3077_v2, %v5313_v35  ;;  %v10231_v34 = vadd.f32 %v10193_v14, %v9080_v19  ;;  %v10235_v23 = vadd.f32 %v10193_v14, %v9188_v25 }
 0x294   :  { %v10239_v50 = vadd.f32 %v10193_v14, %v10083_v47  ;;  %v10245_v4 = vadd.f32 %v10193_v14, %v9224_v3  ;;  %v10250_v19 = vadd.f32 %v10193_v14, %v10106_v49  ;;  %v4255_v45 = vmax.f32 %v10215_v0, 0.0 }
 0x295   :  { %v4256_v3 = vmax.f32 %v10226_v33, 0.0  ;;  %v10260_v61 = vadd.f32 %v10193_v14, %v9809_v11  ;;  %v6333_v49 = vunpack.i.h.bf16 %v10152_v36  ;;  %v10266_v63 = vadd.f32 %v10193_v14, %v9945_v1 }
 0x296   :  { %v6356_v48 = vpop.permute.xlu1 %6355  ;;  %v10270_v53 = vadd.f32 %v10193_v14, %v9966_v13  ;;  %v6347_v24 = vunpack.i.l.bf16 %v10177_v56  ;;  %v4270_v35 = vmax.f32 %v10250_v19, 0.0  ;;  %v3240_v36 = vsel %vm3193_vm4, %v3158_v7, %v6337_v60 }
 0x297   :  { %v10241_v38 = vpop.permute.xlu0 %6350  ;;  %v6348_v58 = vunpack.i.h.bf16 %v10177_v56  ;;  %v6342_v2 = vunpack.i.l.bf16 %v10195_v54  ;;  %v3241_v0 = vsel %vm3193_vm4, %v3159_v31, %v6338_v15  ;;  %v6343_v13 = vunpack.i.h.bf16 %v10195_v54 }
 0x298   :  { %v4035_v25 = vpop.f32.mrf.mxu0  ;;  %v3182_v28 = vsel %vm3111_vm3, %v3100_v8, %v6332_v10  ;;  %v3183_v19 = vsel %vm3111_vm3, %v3101_v22, %v6333_v49  ;;  %v6358_v7 = vunpack.i.h.bf16 %v6356_v48  ;;  %v6357_v60 = vunpack.i.l.bf16 %v6356_v48 }
 0x299   :  { %v4036_v33 = vadd.f32 %v10193_v14, %v4035_v25  ;;  %v3322_v47 = vsel %vm3275_vm5, %v3240_v36, %v6347_v24  ;;  %v3323_v25 = vsel %vm3275_vm5, %v3241_v0, %v6348_v58  ;;  %v3265_v8 = vsel %vm3193_vm4, %v3183_v19, %v6343_v13 }
 0x29a   :  { %v6366_v18 = vpop.permute.xlu1 %6365  ;;  %v4868_v6 = vpop.f32.mrf.mxu0  ;;  %v6353_v22 = vunpack.i.h.bf16 %v10241_v38  ;;  %v6352_v48 = vunpack.i.l.bf16 %v10241_v38 }
 0x29b   :  { %v10274_v11 = vpop.permute.xlu0 %6360  ;;  %v6368_v44 = vunpack.i.h.bf16 %v6366_v18  ;;  %v6367_v31 = vunpack.i.l.bf16 %v6366_v18  ;;  %v4271_v49 = vmax.f32 %v4036_v33, 0.0  ;;  %v3404_v18 = vsel %vm3357_vm6, %v3322_v47, %v6357_v60 }
 0x29c   :  { %v4038_v1 = vpop.f32.mrf.mxu0 }
 0x29d   :  { %v4039_v6 = vadd.f32 %v10193_v14, %v4038_v1  ;;  %v10284_v52 = vpop.f32.mrf.mxu1  ;;  %v3264_v1 = vsel %vm3193_vm4, %v3182_v28, %v6342_v2  ;;  %v6362_v28 = vunpack.i.l.bf16 %v10274_v11  ;;  %v3486_v36 = vsel %vm3439_vm7, %v3404_v18, %v6367_v31 }
 0x29e   :  { %10877 = vst [vmem:[#allocation4_spill] sm:$0xff] %v10284_v52  ;;  %v6376_v56 = vpop.permute.xlu1 %6375  ;;  %v4869_v46 = vpop.f32.mrf.mxu0  ;;  %v3347_v31 = vsel %vm3275_vm5, %v3265_v8, %v6353_v22 }
 0x29f   :  { %v4272_v15 = vmax.f32 %v4039_v6, 0.0  ;;  %v6371_v54 = vpop.permute.xlu0 %6370  ;;  %v4916_v30 = vpop.f32.mrf.mxu1  ;;  %v6378_v52 = vunpack.i.h.bf16 %v6376_v56  ;;  %v6377_v27 = vunpack.i.l.bf16 %v6376_v56  ;;  %v6363_v46 = vunpack.i.h.bf16 %v10274_v11 }
 0x2a0   :  { %v3405_v30 = vsel %vm3357_vm6, %v3323_v25, %v6358_v7  ;;  %v6373_v6 = vunpack.i.h.bf16 %v6371_v54  ;;  %v6372_v19 = vunpack.i.l.bf16 %v6371_v54  ;;  %v3346_v56 = vsel %vm3275_vm5, %v3264_v1, %v6352_v48 }
 0x2a1   :  { %v10294_v10 = vpop.f32.mrf.mxu1  ;;  %4727 = vmatprep.subr.mxu1 %v4272_v15  ;;  %v3487_v58 = vsel %vm3439_vm7, %v3405_v30, %v6368_v44  ;;  %v3568_v33 = vsel %vm3521_vm8, %v3486_v36, %v6377_v27  ;;  %v4015_v44 = vadd.f32 %v10193_v14, %v9848_v9  ;;  %v4268_v54 = vmax.f32 %v10270_v53, 0.0 }
 0x2a2   :  { %v6386_v24 = vpop.permute.xlu1 %6385  ;;  %4728 = vmatpush3.msra.mxu1 %v4256_v3  ;;  %v3569_v47 = vsel %vm3521_vm8, %v3487_v58, %v6378_v52  ;;  %v10878_v52 = vmax.f32 %v10211_v40, 0.0  ;;  %v3428_v25 = vsel %vm3357_vm6, %v3346_v56, %v6362_v28  ;;  %v10879_v9 = vmax.f32 %v10239_v50, 0.0 }
 0x2a3   :  { %v6388_v2 = vunpack.i.h.bf16 %v6386_v24  ;;  %v6387_v38 = vunpack.i.l.bf16 %v6386_v24  ;;  %v6381_v0 = vpop.permute.xlu0 %6380  ;;  %v4917_v13 = vpop.f32.mrf.mxu1  ;;  %4729 = vmatprep.subr.mxu1 %v4271_v49  ;;  %v3510_v1 = vsel %vm3439_vm7, %v3428_v25, %v6372_v19  ;;  %v10880_v40 = vmax.f32 %v10207_v5, 0.0 }
 0x2a4   :  { %4730 = vmatpush3.msra.mxu1 %v4255_v45  ;;  %v6383_v7 = vunpack.i.h.bf16 %v6381_v0  ;;  %v6382_v60 = vunpack.i.l.bf16 %v6381_v0  ;;  %v4267_v45 = vmax.f32 %v10266_v63, 0.0  ;;  %v3948_v50 = vadd.f32 %v10193_v14, %v9152_v57 }
 0x2a5   :  { %v3650_v11 = vsel %vm3603_vm9, %v3568_v33, %v6387_v38  ;;  %v3651_v3 = vsel %vm3603_vm9, %v3569_v47, %v6388_v2  ;;  %4731 = vmatprep.subr.mxu1 %v4270_v35  ;;  %v3429_v35 = vsel %vm3357_vm6, %v3347_v31, %v6363_v46  ;;  %v4251_v46 = vmax.f32 %v10245_v4, 0.0 }
 0x2a6   :  { %v3708_v27 = vpack.c.bf16 %v3651_v3, %v3650_v11  ;;  %v6396_v15 = vpop.permute.xlu1 %6395  ;;  %4732 = vmatpush3.msra.mxu1 %v10878_v52  ;;  %v3511_v8 = vsel %vm3439_vm7, %v3429_v35, %v6373_v6  ;;  %v3592_v63 = vsel %vm3521_vm8, %v3510_v1, %v6382_v60  ;;  %v10881_v36 = vmax.f32 %v10202_v43, 0.0 }
 0x2a7   :  { %v6391_v49 = vpop.permute.xlu0 %6390  ;;  %4733 = vmatprep.subr.mxu1 %v10879_v9  ;;  %v3593_v53 = vsel %vm3521_vm8, %v3511_v8, %v6383_v7  ;;  %v6398_v18 = vunpack.i.h.bf16 %v6396_v15  ;;  %v6397_v30 = vunpack.i.l.bf16 %v6396_v15  ;;  %v4250_v58 = vmax.f32 %v10235_v23, 0.0 }
 0x2a8   :  { %v6393_v22 = vunpack.i.h.bf16 %v6391_v49  ;;  %v6392_v48 = vunpack.i.l.bf16 %v6391_v49  ;;  %4899 = vmatmul.mubr.msk.bf16.gmra.mxu0 %vm3753_vm10, %v3708_v27  ;;  %4734 = vmatpush3.msra.mxu1 %v10880_v40  ;;  %v4007_v2 = vadd.f32 %v10193_v14, %v9772_v55  ;;  %v4266_v38 = vmax.f32 %v4015_v44, 0.0 }
 0x2a9   :  { %4735 = vmatprep.subr.mxu1 %v4268_v54  ;;  %4902 = vmatprep.mubr.msk.bf16.mxu0 %vm6611_vm1, %v10837_v20  ;;  %v4004_v57 = vadd.f32 %v10193_v14, %v9761_v29  ;;  %v4265_v4 = vmax.f32 %v10260_v61, 0.0  ;;  %v3184_v43 = vsel %vm3111_vm3, %v10218_v12, %v6397_v30  ;;  %v3185_v23 = vsel %vm3111_vm3, %v10221_v37, %v6398_v18 }
 0x2aa   :  { %v3674_v28 = vsel %vm3603_vm9, %v3592_v63, %v6392_v48  ;;  %v3675_v5 = vsel %vm3603_vm9, %v3593_v53, %v6393_v22  ;;  %v6406_v24 = vpop.permute.xlu1 %6405  ;;  %4736 = vmatpush3.msra.mxu1 %v10881_v36  ;;  %v3940_v19 = vadd.f32 %v10193_v14, %v9055_v41  ;;  %v4249_v29 = vmax.f32 %v3948_v50, 0.0 }
 0x2ab   :  { %v3720_v0 = vpack.c.bf16 %v3675_v5, %v3674_v28  ;;  %v6401_v13 = vpop.permute.xlu0 %6400  ;;  %4737 = vmatprep.subr.mxu1 %v4267_v45  ;;  %v6408_v6 = vunpack.i.h.bf16 %v6406_v24  ;;  %v6407_v55 = vunpack.i.l.bf16 %v6406_v24  ;;  %v3935_v12 = vadd.f32 %v10193_v14, %v9029_v16 }
 0x2ac   :  { %v6403_v33 = vunpack.i.h.bf16 %v6401_v13  ;;  %v6402_v47 = vunpack.i.l.bf16 %v6401_v13  ;;  %4738 = vmatpush3.msra.mxu1 %v4251_v46  ;;  %v4248_v37 = vmax.f32 %v10231_v34, 0.0  ;;  %v3999_v7 = vadd.f32 %v10193_v14, %v9677_v39 }
 0x2ad   :  { %4947 = vmatmul.mubr.msk.bf16.gmra.mxu1 %vm3753_vm10, %v3720_v0  ;;  %4739 = vmatprep.subr.mxu1 %v4266_v38  ;;  %v4264_v60 = vmax.f32 %v4007_v2, 0.0  ;;  %v3996_v44 = vadd.f32 %v10193_v14, %v9628_v32  ;;  %v4263_v56 = vmax.f32 %v4004_v57, 0.0  ;;  %v3932_v39 = vadd.f32 %v10193_v14, %v9007_v17 }
 0x2ae   :  { %v3266_v61 = vsel %vm3193_vm4, %v3184_v43, %v6402_v47  ;;  %v3267_v11 = vsel %vm3193_vm4, %v3185_v23, %v6403_v33  ;;  %v6416_v3 = vpop.permute.xlu1 %6415  ;;  %4740 = vmatpush3.msra.mxu1 %v4250_v58  ;;  %4950 = vmatprep.mubr.msk.bf16.mxu1 %vm6611_vm1, %v10837_v20  ;;  %v4247_v34 = vmax.f32 %v3940_v19, 0.0  ;;  %v3927_v35 = vadd.f32 %v10193_v14, %v8924_v26  ;;  %v10882_v33 = vld [vmem:[#allocation8_spill] sm:$0xff] }
 0x2af   :  { %v6411_v41 = vpop.permute.xlu0 %6410  ;;  %4741 = vmatprep.subr.mxu1 %v4265_v4  ;;  %v6418_v15 = vunpack.i.h.bf16 %v6416_v3  ;;  %v6417_v52 = vunpack.i.l.bf16 %v6416_v3  ;;  %v3348_v45 = vsel %vm3275_vm5, %v3266_v61, %v6407_v55  ;;  %v3349_v16 = vsel %vm3275_vm5, %v3267_v11, %v6408_v6  ;;  %v10883_v6 = vld [vmem:[#allocation2_spill] sm:$0xff] }
 0x2b0   :  { %v6413_v31 = vunpack.i.h.bf16 %v6411_v41  ;;  %v6412_v27 = vunpack.i.l.bf16 %v6411_v41  ;;  %4742 = vmatpush3.msra.mxu1 %v4249_v29  ;;  %v3991_v49 = vadd.f32 %v10193_v14, %v9589_v59  ;;  %v4262_v9 = vmax.f32 %v3999_v7, 0.0  ;;  %v10884_v41 = vld [vmem:[#allocation18_spill] sm:$0xff] }
 0x2b1   :  { %4743 = vmatprep.subr.mxu1 %v4264_v60  ;;  %v4246_v22 = vmax.f32 %v3935_v12, 0.0  ;;  %v3988_v53 = vadd.f32 %v10193_v14, %v9573_v42  ;;  %v4261_v18 = vmax.f32 %v3996_v44, 0.0  ;;  %v3924_v50 = vadd.f32 %v10193_v14, %v8896_v62 }
 0x2b2   :  { %v3430_v54 = vsel %vm3357_vm6, %v3348_v45, %v6412_v27  ;;  %v3431_v25 = vsel %vm3357_vm6, %v3349_v16, %v6413_v31  ;;  %v6426_v32 = vpop.permute.xlu1 %6425  ;;  %4744 = vmatpush3.msra.mxu1 %v4248_v37  ;;  %v4245_v46 = vmax.f32 %v3932_v39, 0.0  ;;  %v3983_v42 = vadd.f32 %v10193_v14, %v9507_v21  ;;  %v72_v27 = vld [vmem:[%s10745_s0 + $0x180] sm:$0xff]  ;;  %v98_v39 = vld [vmem:[%s10745_s0 + $0x250] sm:$0xff] }
 0x2b3   :  { %v6427_v1 = vunpack.i.l.bf16 %v6426_v32  ;;  %v6421_v8 = vpop.permute.xlu0 %6420  ;;  %4745 = vmatprep.subr.mxu1 %v4263_v56  ;;  %v6428_v48 = vunpack.i.h.bf16 %v6426_v32  ;;  %v3512_v26 = vsel %vm3439_vm7, %v3430_v54, %v6417_v52  ;;  %v3513_v30 = vsel %vm3439_vm7, %v3431_v25, %v6418_v15  ;;  %v73_v15 = vld [vmem:[%s10745_s0 + $0x188] sm:$0xff]  ;;  %v10885_v52 = vld [vmem:[#allocation28_spill] sm:$0xff]  ;;  %v10886_v54 = vld [vmem:[#allocation41_spill] sm:$0xff] }
 0x2b4   :  { %v6423_v17 = vunpack.i.h.bf16 %v6421_v8  ;;  %v6422_v40 = vunpack.i.l.bf16 %v6421_v8  ;;  %v10368_v63 = vpop.f32.mrf.mxu1  ;;  %4746 = vmatpush3.msra.mxu1 %v4247_v34  ;;  %v4260_v58 = vmax.f32 %v3991_v49, 0.0  ;;  %v3919_v62 = vadd.f32 %v10193_v14, %v8853_v51  ;;  %v99_v34 = vld [vmem:[%s10745_s0 + $0x258] sm:$0xff] }
 0x2b5   :  { %v10374_v59 = vpop.f32.mrf.mxu0  ;;  %4747 = vmatprep.subr.mxu1 %v4262_v9  ;;  %v4244_v13 = vmax.f32 %v3927_v35, 0.0  ;;  %v3980_v47 = vadd.f32 %v10193_v14, %v10882_v33  ;;  %v4259_v21 = vmax.f32 %v3988_v53, 0.0  ;;  %v3916_v55 = vadd.f32 %v10193_v14, %v10883_v6 }
 0x2b6   :  { %v3594_v28 = vsel %vm3521_vm8, %v3512_v26, %v6422_v40  ;;  %v3595_v5 = vsel %vm3521_vm8, %v3513_v30, %v6423_v17  ;;  %v10380_v24 = vpop.permute.xlu1 %6435  ;;  %v4920_v36 = vpop.f32.mrf.mxu1  ;;  %4748 = vmatpush3.msra.mxu1 %v4246_v22  ;;  %v4243_v19 = vmax.f32 %v3924_v50, 0.0  ;;  %v4258_v61 = vmax.f32 %v3983_v42, 0.0 }
 0x2b7   :  { %v10384_v2 = vpop.permute.xlu0 %6430  ;;  %v4872_v38 = vpop.f32.mrf.mxu0  ;;  %4749 = vmatprep.subr.mxu1 %v4261_v18  ;;  %v3676_v0 = vsel %vm3603_vm9, %v3594_v28, %v6427_v1  ;;  %v3677_v4 = vsel %vm3603_vm9, %v3595_v5, %v6428_v48  ;;  %v4242_v12 = vmax.f32 %v3919_v62, 0.0  ;;  %v4257_v37 = vmax.f32 %v3980_v47, 0.0 }
 0x2b8   :  { %v10389_v57 = vpop.f32.mrf.mxu1  ;;  %4750 = vmatpush3.msra.mxu1 %v4245_v46  ;;  %v3721_v23 = vpack.c.bf16 %v3677_v4, %v3676_v0  ;;  %v4241_v7 = vmax.f32 %v3916_v55, 0.0  ;;  %v5118_v44 = vunpack.i.h.bf16 %v10884_v41  ;;  %v5117_v56 = vunpack.i.l.bf16 %v10884_v41 }
 0x2b9   :  { %v10394_v43 = vpop.f32.mrf.mxu0  ;;  %4751 = vmatprep.subr.mxu1 %v4260_v58  ;;  %v5183_v45 = vunpack.i.h.bf16 %v10885_v52  ;;  %v5182_v16 = vunpack.i.l.bf16 %v10885_v52  ;;  %v5318_v25 = vunpack.i.h.bf16 %v10886_v54  ;;  %v5317_v32 = vunpack.i.l.bf16 %v10886_v54 }
 0x2ba   :  { %v6446_v29 = vpop.permute.xlu1 %6445  ;;  %v4921_v51 = vpop.f32.mrf.mxu1  ;;  %4752 = vmatpush3.msra.mxu1 %v4244_v13  ;;  %v6438_v35 = vunpack.i.h.bf16 %v10380_v24  ;;  %v6437_v49 = vunpack.i.l.bf16 %v10380_v24  ;;  %v3078_v1 = vsel %vm3029_vm2, %v72_v27, %v5117_v56  ;;  %v3079_v8 = vsel %vm3029_vm2, %v73_v15, %v5118_v44 }
 0x2bb   :  { %4951 = vmatmul.mubr.msk.bf16.gmra.mxu1 %vm3753_vm10, %v3721_v23  ;;  %v6441_v11 = vpop.permute.xlu0 %6440  ;;  %v4873_v3 = vpop.f32.mrf.mxu0  ;;  %4753 = vmatprep.subr.mxu1 %v4259_v21  ;;  %v6433_v22 = vunpack.i.h.bf16 %v10384_v2  ;;  %v6432_v48 = vunpack.i.l.bf16 %v10384_v2  ;;  %v3104_v40 = vsel %vm3029_vm2, %v98_v39, %v5182_v16  ;;  %v3105_v53 = vsel %vm3029_vm2, %v99_v34, %v5183_v45 }
 0x2bc   :  { %4754 = vmatpush3.msra.mxu1 %v4243_v19  ;;  %4954 = vmatprep.mubr.msk.bf16.mxu1 %vm6611_vm1, %v10837_v20  ;;  %v6448_v18 = vunpack.i.h.bf16 %v6446_v29  ;;  %v6447_v26 = vunpack.i.l.bf16 %v6446_v29  ;;  %v3160_v30 = vsel %vm3111_vm3, %v3078_v1, %v5317_v32  ;;  %v3161_v50 = vsel %vm3111_vm3, %v3079_v8, %v5318_v25 }
 0x2bd   :  { %4755 = vmatprep.subr.mxu1 %v4258_v61  ;;  %v6443_v46 = vunpack.i.h.bf16 %v6441_v11  ;;  %v6442_v28 = vunpack.i.l.bf16 %v6441_v11  ;;  %v3242_v5 = vsel %vm3193_vm4, %v3160_v30, %v6437_v49  ;;  %v3243_v24 = vsel %vm3193_vm4, %v3161_v50, %v6438_v35 }
 0x2be   :  { %v6456_v60 = vpop.permute.xlu1 %6455  ;;  %4756 = vmatpush3.msra.mxu1 %v4242_v12  ;;  %v3186_v2 = vsel %vm3111_vm3, %v3104_v40, %v6432_v48  ;;  %v3187_v38 = vsel %vm3111_vm3, %v3105_v53, %v6433_v22  ;;  %v3324_v4 = vsel %vm3275_vm5, %v3242_v5, %v6447_v26  ;;  %v3325_v33 = vsel %vm3275_vm5, %v3243_v24, %v6448_v18 }
 0x2bf   :  { %v10403_v31 = vpop.permute.xlu0 %6450  ;;  %4757 = vmatprep.subr.mxu1 %v4257_v37  ;;  %v6458_v36 = vunpack.i.h.bf16 %v6456_v60  ;;  %v6457_v42 = vunpack.i.l.bf16 %v6456_v60  ;;  %v3268_v23 = vsel %vm3193_vm4, %v3186_v2, %v6442_v28  ;;  %v3269_v6 = vsel %vm3193_vm4, %v3187_v38, %v6443_v46 }
 0x2c0   :  { %4758 = vmatpush3.msra.mxu1 %v4241_v7  ;;  %v6453_v55 = vunpack.i.h.bf16 %v10403_v31  ;;  %v6452_v19 = vunpack.i.l.bf16 %v10403_v31 }
 0x2c1   :  { %v3406_v29 = vsel %vm3357_vm6, %v3324_v4, %v6457_v42  ;;  %v3407_v51 = vsel %vm3357_vm6, %v3325_v33, %v6458_v36  ;;  %v74_v4 = vld [vmem:[%s10745_s0 + $0x190] sm:$0xff]  ;;  %v75_v33 = vld [vmem:[%s10745_s0 + $0x198] sm:$0xff] }
 0x2c2   :  { %v6466_v9 = vpop.permute.xlu1 %6465  ;;  %v3350_v34 = vsel %vm3275_vm5, %v3268_v23, %v6452_v19  ;;  %v3351_v54 = vsel %vm3275_vm5, %v3269_v6, %v6453_v55  ;;  %v10889_v6 = vld [vmem:[#allocation43_spill] sm:$0xff] }
 0x2c3   :  { %v6461_v17 = vpop.permute.xlu0 %6460  ;;  %v6468_v0 = vunpack.i.h.bf16 %v6466_v9  ;;  %v6467_v62 = vunpack.i.l.bf16 %v6466_v9  ;;  %v5323_v55 = vunpack.i.h.bf16 %v10889_v6  ;;  %v5322_v19 = vunpack.i.l.bf16 %v10889_v6 }
 0x2c4   :  { %v6463_v61 = vunpack.i.h.bf16 %v6461_v17  ;;  %v6462_v11 = vunpack.i.l.bf16 %v6461_v17 }
 0x2c5   :  { %v3488_v12 = vsel %vm3439_vm7, %v3406_v29, %v6467_v62  ;;  %v3489_v37 = vsel %vm3439_vm7, %v3407_v51, %v6468_v0  ;;  %v10887_v0 = vld [vmem:[#allocation17_spill] sm:$0xff]  ;;  %v100_v51 = vld [vmem:[%s10745_s0 + $0x260] sm:$0xff] }
 0x2c6   :  { %v6476_v58 = vpop.permute.xlu1 %6475  ;;  %v3432_v49 = vsel %vm3357_vm6, %v3350_v34, %v6462_v11  ;;  %v3433_v9 = vsel %vm3357_vm6, %v3351_v54, %v6463_v61  ;;  %v5123_v62 = vunpack.i.h.bf16 %v10887_v0  ;;  %v101_v61 = vld [vmem:[%s10745_s0 + $0x268] sm:$0xff] }
 0x2c7   :  { %v6471_v13 = vpop.permute.xlu0 %6470  ;;  %v6478_v47 = vunpack.i.h.bf16 %v6476_v58  ;;  %v6477_v21 = vunpack.i.l.bf16 %v6476_v58 }
 0x2c8   :  { %v6473_v27 = vunpack.i.h.bf16 %v6471_v13  ;;  %v6472_v31 = vunpack.i.l.bf16 %v6471_v13  ;;  %v5122_v13 = vunpack.i.l.bf16 %v10887_v0 }
 0x2c9   :  { %v3570_v44 = vsel %vm3521_vm8, %v3488_v12, %v6477_v21  ;;  %v3571_v56 = vsel %vm3521_vm8, %v3489_v37, %v6478_v47  ;;  %v10888_v47 = vld [vmem:[#allocation31_spill] sm:$0xff] }
 0x2ca   :  { %v6486_v3 = vpop.permute.xlu1 %6485  ;;  %v3514_v8 = vsel %vm3439_vm7, %v3432_v49, %v6472_v31  ;;  %v3515_v22 = vsel %vm3439_vm7, %v3433_v9, %v6473_v27  ;;  %v5188_v21 = vunpack.i.h.bf16 %v10888_v47  ;;  %v5187_v23 = vunpack.i.l.bf16 %v10888_v47 }
 0x2cb   :  { %v6488_v7 = vunpack.i.h.bf16 %v6486_v3  ;;  %v6487_v60 = vunpack.i.l.bf16 %v6486_v3  ;;  %v6481_v41 = vpop.permute.xlu0 %6480  ;;  %v3080_v37 = vsel %vm3029_vm2, %v74_v4, %v5122_v13 }
 0x2cc   :  { %v10447_v15 = vpop.f32.mrf.mxu0  ;;  %v6483_v16 = vunpack.i.h.bf16 %v6481_v41  ;;  %v6482_v39 = vunpack.i.l.bf16 %v6481_v41 }
 0x2cd   :  { %v3652_v52 = vsel %vm3603_vm9, %v3570_v44, %v6487_v60  ;;  %v3653_v45 = vsel %vm3603_vm9, %v3571_v56, %v6488_v7  ;;  %v3081_v7 = vsel %vm3029_vm2, %v75_v33, %v5123_v62  ;;  %v10890_v44 = vld [vmem:[#allocation30_spill] sm:$0xff] }
 0x2ce   :  { %v3709_v25 = vpack.c.bf16 %v3653_v45, %v3652_v52  ;;  %v6496_v32 = vpop.permute.xlu1 %6495  ;;  %v4876_v35 = vpop.f32.mrf.mxu0  ;;  %v3596_v53 = vsel %vm3521_vm8, %v3514_v8, %v6482_v39  ;;  %v3597_v18 = vsel %vm3521_vm8, %v3515_v22, %v6483_v16  ;;  %v5193_v56 = vunpack.i.h.bf16 %v10890_v44 }
 0x2cf   :  { %v6491_v1 = vpop.permute.xlu0 %6490  ;;  %v6498_v11 = vunpack.i.h.bf16 %v6496_v32  ;;  %v6497_v3 = vunpack.i.l.bf16 %v6496_v32  ;;  %v5192_v27 = vunpack.i.l.bf16 %v10890_v44  ;;  %v3106_v45 = vsel %vm3029_vm2, %v100_v51, %v5187_v23 }
 0x2d0   :  { %v6493_v48 = vunpack.i.h.bf16 %v6491_v1  ;;  %v6492_v17 = vunpack.i.l.bf16 %v6491_v1  ;;  %v10457_v40 = vpop.f32.mrf.mxu0  ;;  %4903 = vmatmul.mubr.msk.bf16.gmra.mxu0 %vm3753_vm10, %v3709_v25  ;;  %v3107_v16 = vsel %vm3029_vm2, %v101_v61, %v5188_v21  ;;  %v3162_v39 = vsel %vm3111_vm3, %v3080_v37, %v5322_v19 }
 0x2d1   :  { %v10462_v26 = vpop.f32.mrf.mxu1  ;;  %4906 = vmatprep.mubr.msk.bf16.mxu0 %vm6611_vm1, %v10837_v20  ;;  %v3163_v34 = vsel %vm3111_vm3, %v3081_v7, %v5323_v55  ;;  %v3188_v25 = vsel %vm3111_vm3, %v3106_v45, %v6497_v3  ;;  %v3189_v32 = vsel %vm3111_vm3, %v3107_v16, %v6498_v11 }
 0x2d2   :  { %v3678_v30 = vsel %vm3603_vm9, %v3596_v53, %v6492_v17  ;;  %v3679_v50 = vsel %vm3603_vm9, %v3597_v18, %v6493_v48  ;;  %v6506_v46 = vpop.permute.xlu1 %6505  ;;  %v4877_v28 = vpop.f32.mrf.mxu0 }
 0x2d3   :  { %v3722_v5 = vpack.c.bf16 %v3679_v50, %v3678_v30  ;;  %v6501_v24 = vpop.permute.xlu0 %6500  ;;  %v4924_v36 = vpop.f32.mrf.mxu1  ;;  %v6508_v60 = vunpack.i.h.bf16 %v6506_v46  ;;  %v6507_v41 = vunpack.i.l.bf16 %v6506_v46 }
 0x2d4   :  { %v6503_v31 = vunpack.i.h.bf16 %v6501_v24  ;;  %v6502_v52 = vunpack.i.l.bf16 %v6501_v24 }
 0x2d5   :  { %v10468_v42 = vpop.f32.mrf.mxu1  ;;  %4955 = vmatmul.mubr.msk.bf16.gmra.mxu1 %vm3753_vm10, %v3722_v5  ;;  %v3270_v1 = vsel %vm3193_vm4, %v3188_v25, %v6507_v41  ;;  %v3271_v8 = vsel %vm3193_vm4, %v3189_v32, %v6508_v60  ;;  %v102_v32 = vld [vmem:[%s10745_s0 + $0x270] sm:$0xff] }
 0x2d6   :  { %v6516_v58 = vpop.permute.xlu1 %6515  ;;  %4958 = vmatprep.mubr.msk.bf16.mxu1 %vm6611_vm1, %v10837_v20  ;;  %v3244_v17 = vsel %vm3193_vm4, %v3162_v39, %v6502_v52  ;;  %v3245_v53 = vsel %vm3193_vm4, %v3163_v34, %v6503_v31 }
 0x2d7   :  { %v6511_v2 = vpop.permute.xlu0 %6510  ;;  %v4925_v38 = vpop.f32.mrf.mxu1  ;;  %v6518_v35 = vunpack.i.h.bf16 %v6516_v58  ;;  %v6517_v49 = vunpack.i.l.bf16 %v6516_v58 }
 0x2d8   :  { %v6513_v22 = vunpack.i.h.bf16 %v6511_v2  ;;  %v6512_v48 = vunpack.i.l.bf16 %v6511_v2 }
 0x2d9   :  { %v3352_v36 = vsel %vm3275_vm5, %v3270_v1, %v6517_v49  ;;  %v3353_v58 = vsel %vm3275_vm5, %v3271_v8, %v6518_v35  ;;  %v103_v35 = vld [vmem:[%s10745_s0 + $0x278] sm:$0xff] }
 0x2da   :  { %v6526_v29 = vpop.permute.xlu1 %6525  ;;  %v3326_v2 = vsel %vm3275_vm5, %v3244_v17, %v6512_v48  ;;  %v3327_v13 = vsel %vm3275_vm5, %v3245_v53, %v6513_v22 }
 0x2db   :  { %v6521_v12 = vpop.permute.xlu0 %6520  ;;  %v6528_v18 = vunpack.i.h.bf16 %v6526_v29  ;;  %v6527_v30 = vunpack.i.l.bf16 %v6526_v29 }
 0x2dc   :  { %v6523_v50 = vunpack.i.h.bf16 %v6521_v12  ;;  %v6522_v46 = vunpack.i.l.bf16 %v6521_v12 }
 0x2dd   :  { %v3434_v47 = vsel %vm3357_vm6, %v3352_v36, %v6527_v30  ;;  %v3435_v21 = vsel %vm3357_vm6, %v3353_v58, %v6528_v18 }
 0x2de   :  { %v6536_v54 = vpop.permute.xlu1 %6535  ;;  %v3408_v55 = vsel %vm3357_vm6, %v3326_v2, %v6522_v46  ;;  %v3409_v19 = vsel %vm3357_vm6, %v3327_v13, %v6523_v50  ;;  %v3108_v46 = vsel %vm3029_vm2, %v102_v32, %v5192_v27 }
 0x2df   :  { %v6531_v9 = vpop.permute.xlu0 %6530  ;;  %v6538_v28 = vunpack.i.h.bf16 %v6536_v54  ;;  %v6537_v5 = vunpack.i.l.bf16 %v6536_v54 }
 0x2e0   :  { %v6533_v38 = vunpack.i.h.bf16 %v6531_v9  ;;  %v6532_v0 = vunpack.i.l.bf16 %v6531_v9 }
 0x2e1   :  { %v3516_v29 = vsel %vm3439_vm7, %v3434_v47, %v6537_v5  ;;  %v3517_v51 = vsel %vm3439_vm7, %v3435_v21, %v6538_v28  ;;  %v3109_v28 = vsel %vm3029_vm2, %v103_v35, %v5193_v56 }
 0x2e2   :  { %v6546_v24 = vpop.permute.xlu1 %6545  ;;  %v3490_v11 = vsel %vm3439_vm7, %v3408_v55, %v6532_v0  ;;  %v3491_v3 = vsel %vm3439_vm7, %v3409_v19, %v6533_v38 }
 0x2e3   :  { %v6541_v62 = vpop.permute.xlu0 %6540  ;;  %v6548_v4 = vunpack.i.h.bf16 %v6546_v24  ;;  %v6547_v33 = vunpack.i.l.bf16 %v6546_v24 }
 0x2e4   :  { %v6543_v23 = vunpack.i.h.bf16 %v6541_v62  ;;  %v6542_v6 = vunpack.i.l.bf16 %v6541_v62 }
 0x2e5   :  { %v3598_v60 = vsel %vm3521_vm8, %v3516_v29, %v6547_v33  ;;  %v3599_v41 = vsel %vm3521_vm8, %v3517_v51, %v6548_v4 }
 0x2e6   :  { %v6556_v61 = vpop.permute.xlu1 %6555  ;;  %v3572_v16 = vsel %vm3521_vm8, %v3490_v11, %v6542_v6  ;;  %v3573_v39 = vsel %vm3521_vm8, %v3491_v3, %v6543_v23 }
 0x2e7   :  { %v6558_v12 = vunpack.i.h.bf16 %v6556_v61  ;;  %v6557_v37 = vunpack.i.l.bf16 %v6556_v61  ;;  %v6551_v7 = vpop.permute.xlu0 %6550 }
 0x2e8   :  { %v6553_v31 = vunpack.i.h.bf16 %v6551_v7  ;;  %v6552_v52 = vunpack.i.l.bf16 %v6551_v7  ;;  %v10519_v45 = vpop.f32.mrf.mxu1 }
 0x2e9   :  { %v3680_v34 = vsel %vm3603_vm9, %v3598_v60, %v6557_v37  ;;  %v3681_v54 = vsel %vm3603_vm9, %v3599_v41, %v6558_v12  ;;  %v10525_v25 = vpop.f32.mrf.mxu0  ;;  %v104_v60 = vld [vmem:[%s10745_s0 + $0x280] sm:$0xff] }
 0x2ea   :  { %v3723_v49 = vpack.c.bf16 %v3681_v54, %v3680_v34  ;;  %v3654_v9 = vsel %vm3603_vm9, %v3572_v16, %v6552_v52  ;;  %v3655_v1 = vsel %vm3603_vm9, %v3573_v39, %v6553_v31  ;;  %v6566_v8 = vpop.permute.xlu1 %6565  ;;  %v4928_v22 = vpop.f32.mrf.mxu1  ;;  %v10891_v34 = vld [vmem:[#allocation32_spill] sm:$0xff] }
 0x2eb   :  { %v3710_v48 = vpack.c.bf16 %v3655_v1, %v3654_v9  ;;  %v6561_v17 = vpop.permute.xlu0 %6560  ;;  %v4880_v53 = vpop.f32.mrf.mxu0  ;;  %v6568_v5 = vunpack.i.h.bf16 %v6566_v8  ;;  %v6567_v24 = vunpack.i.l.bf16 %v6566_v8  ;;  %v3110_v54 = vsel %vm3029_vm2, %v104_v60, %v10891_v34 }
 0x2ec   :  { %v6563_v18 = vunpack.i.h.bf16 %v6561_v17  ;;  %v6562_v30 = vunpack.i.l.bf16 %v6561_v17  ;;  %v10535_v50 = vpop.f32.mrf.mxu1  ;;  %4959 = vmatmul.mubr.msk.bf16.gmra.mxu1 %vm3753_vm10, %v3723_v49 }
 0x2ed   :  { %v10544_v36 = vpop.f32.mrf.mxu0  ;;  %4907 = vmatmul.mubr.msk.bf16.gmra.mxu0 %vm3753_vm10, %v3710_v48  ;;  %4962 = vmatprep.mubr.msk.bf16.mxu1 %vm6611_vm1, %v10837_v20 }
 0x2ee   :  { %v3190_v58 = vsel %vm3111_vm3, %v3108_v46, %v6562_v30  ;;  %v3191_v38 = vsel %vm3111_vm3, %v3109_v28, %v6563_v18  ;;  %v6576_v0 = vpop.permute.xlu1 %6575  ;;  %v4929_v62 = vpop.f32.mrf.mxu1 }
 0x2ef   :  { %v6571_v27 = vpop.permute.xlu0 %6570  ;;  %v4881_v2 = vpop.f32.mrf.mxu0  ;;  %v6578_v56 = vunpack.i.h.bf16 %v6576_v0  ;;  %v6577_v4 = vunpack.i.l.bf16 %v6576_v0  ;;  %v3272_v33 = vsel %vm3193_vm4, %v3190_v58, %v6567_v24  ;;  %v3273_v47 = vsel %vm3193_vm4, %v3191_v38, %v6568_v5 }
 0x2f0   :  { %v6573_v44 = vunpack.i.h.bf16 %v6571_v27  ;;  %v6572_v13 = vunpack.i.l.bf16 %v6571_v27 }
 0x2f2   :  { %v3354_v21 = vsel %vm3275_vm5, %v3272_v33, %v6572_v13  ;;  %v3355_v23 = vsel %vm3275_vm5, %v3273_v47, %v6573_v44  ;;  %v6586_v6 = vpop.permute.xlu1 %6585  ;;  %v4323_v44 = vld [vmem:[%s10748_s3 + $0x8] sm:$0xff] }
 0x2f3   :  { %v6581_v55 = vpop.permute.xlu0 %6580  ;;  %v6588_v51 = vunpack.i.h.bf16 %v6586_v6  ;;  %v6587_v61 = vunpack.i.l.bf16 %v6586_v6  ;;  %v3436_v11 = vsel %vm3357_vm6, %v3354_v21, %v6577_v4  ;;  %v3437_v3 = vsel %vm3357_vm6, %v3355_v23, %v6578_v56  ;;  %v4322_v21 = vld [vmem:[%s10748_s3] sm:$0xff] }
 0x2f4   :  { %v6583_v19 = vunpack.i.h.bf16 %v6581_v55  ;;  %v6582_v29 = vunpack.i.l.bf16 %v6581_v55 }
 0x2f6   :  { %v3518_v12 = vsel %vm3439_vm7, %v3436_v11, %v6582_v29  ;;  %v3519_v37 = vsel %vm3439_vm7, %v3437_v3, %v6583_v19  ;;  %v1161_v7 = vpop.permute.xlu1 %1160 }
 0x2f7   :  { %v6591_v41 = vpop.permute.xlu0 %6590  ;;  %v3600_v16 = vsel %vm3521_vm8, %v3518_v12, %v6587_v61  ;;  %v3601_v39 = vsel %vm3521_vm8, %v3519_v37, %v6588_v51  ;;  %v3192_v9 = vsel %vm3111_vm3, %v3110_v54, %v1161_v7 }
 0x2f8   :  { %v6593_v31 = vunpack.i.h.bf16 %v6591_v41  ;;  %v6592_v52 = vunpack.i.l.bf16 %v6591_v41 }
 0x2fa   :  { %v3682_v32 = vsel %vm3603_vm9, %v3600_v16, %v6592_v52  ;;  %v3683_v35 = vsel %vm3603_vm9, %v3601_v39, %v6593_v31  ;;  %v1730_v49 = vpop.permute.xlu1 %1729  ;;  %v4325_v31 = vld [vmem:[%s10748_s3 + $0x18] sm:$0xff] }
 0x2fb   :  { %v3724_v1 = vpack.c.bf16 %v3683_v35, %v3682_v32  ;;  %v1406_v8 = vpop.permute.xlu0 %1405 }
 0x2fc   :  { %v3274_v22 = vsel %vm3193_vm4, %v3192_v9, %v1406_v8 }
 0x2fd   :  { %4963 = vmatmul.mubr.msk.bf16.gmra.mxu1 %vm3753_vm10, %v3724_v1  ;;  %v3356_v17 = vsel %vm3275_vm5, %v3274_v22, %v1730_v49  ;;  %v10610_v22 = vld [vmem:[%s10747_s2] ss:$0 sm:$0xff] }
 0x2fe   :  { %v2299_v48 = vpop.permute.xlu1 %2298  ;;  %4966 = vmatprep.mubr.msk.bf16.mxu1 %vm6611_vm1, %v10837_v20 }
 0x2ff   :  { %v2054_v53 = vpop.permute.xlu0 %2053 }
 0x300   :  { %v3438_v18 = vsel %vm3357_vm6, %v3356_v17, %v2054_v53  ;;  %v10575_v30 = vpop.f32.mrf.mxu0 }
 0x301   :  { %v3520_v5 = vsel %vm3439_vm7, %v3438_v18, %v2299_v48 }
 0x302   :  { %v4884_v46 = vpop.f32.mrf.mxu0  ;;  %v2947_v28 = vpop.permute.xlu1 %2946 }
 0x303   :  { %v2623_v24 = vpop.permute.xlu0 %2622 }
 0x304   :  { %v3602_v58 = vsel %vm3521_vm8, %v3520_v5, %v2623_v24  ;;  %v10579_v38 = vpop.f32.mrf.mxu0 }
 0x305   :  { %v3684_v0 = vsel %vm3603_vm9, %v3602_v58, %v2947_v28  ;;  %v4163_v62 = vpop.f32.mrf.mxu1  ;;  %v4159_v28 = vadd.f32 %v10610_v22, %v10535_v50 }
 0x306   :  { %v3725_v27 = vpack.c.bf16 %v3684_v0, %v3684_v0  ;;  %v4885_v2 = vpop.f32.mrf.mxu0  ;;  %v4164_v48 = vadd.f32 %v10610_v22, %v4163_v62 }
 0x307   :  { %v4932_v13 = vpop.f32.mrf.mxu1 }
 0x308   :  { %4967 = vmatmul.mubr.msk.bf16.gmra.mxu1 %vm3753_vm10, %v3725_v27  ;;  %v4156_v27 = vadd.f32 %v10610_v22, %v10519_v45  ;;  %v4303_v2 = vmax.f32 %v4164_v48, 0.0  ;;  %v4148_v45 = vadd.f32 %v10610_v22, %v10462_v26  ;;  %v10894_v48 = vld [vmem:[#allocation19_spill] sm:$0xff] }
 0x309   :  { %v4166_v56 = vpop.f32.mrf.mxu1  ;;  %4395 = vmatprep.mubr.f32.mxu1 %v4323_v44 }
 0x30a   :  { %v4167_v4 = vadd.f32 %v10193_v14, %v4166_v56  ;;  %v4151_v56 = vadd.f32 %v10610_v22, %v10468_v42 }
 0x30b   :  { %v4933_v33 = vpop.f32.mrf.mxu1 }
 0x30c   :  { %v4304_v47 = vmax.f32 %v4167_v4, 0.0  ;;  %v4302_v4 = vmax.f32 %v4159_v28, 0.0  ;;  %v4300_v42 = vmax.f32 %v4151_v56, 0.0 }
 0x30e   :  { %4762 = vmatprep.subr.mxu1 %v4304_v47 }
 0x310   :  { %4396 = vmatmul.mubr.f32.vlgmr.msra.gmra.mxu1 %v4322_v21  ;;  %v4301_v21 = vmax.f32 %v4156_v27, 0.0 }
 0x311   :  { %4465 = vmatprep.mubr.f32.mxu1 %v4325_v31 }
 0x31c   :  { %v10590_v23 = vpop.f32.mrf.mxu1 }
 0x31d   :  { %v10592_v6 = vpop.f32.mrf.mxu0 }
 0x31e   :  { %v4936_v55 = vpop.f32.mrf.mxu1  ;;  %v4076_v26 = vadd.f32 %v10610_v22, %v10592_v6  ;;  %v4068_v6 = vadd.f32 %v10610_v22, %v10575_v30  ;;  %v4060_v30 = vadd.f32 %v10610_v22, %v10525_v25 }
 0x31f   :  { %v4888_v19 = vpop.f32.mrf.mxu0 }
 0x320   :  { %v10594_v29 = vpop.f32.mrf.mxu1 }
 0x321   :  { %v4078_v51 = vpop.f32.mrf.mxu0 }
 0x322   :  { %v4937_v61 = vpop.f32.mrf.mxu1 }
 0x323   :  { %v4889_v11 = vpop.f32.mrf.mxu0  ;;  %v4143_v61 = vadd.f32 %v10610_v22, %v10389_v57 }
 0x324   :  { %v4079_v11 = vadd.f32 %v10610_v22, %v4078_v51  ;;  %v4071_v51 = vadd.f32 %v10610_v22, %v10579_v38  ;;  %v4063_v38 = vadd.f32 %v10610_v22, %v10544_v36 }
 0x325   :  { %v4298_v57 = vmax.f32 %v4143_v61, 0.0 }
 0x326   :  { %v4282_v31 = vmax.f32 %v4079_v11, 0.0 }
 0x334   :  { %v4083_v14 = vpop.f32.mrf.mxu0 }
 0x335   :  { %v4084_v55 = vadd.f32 %v10610_v22, %v4083_v14 }
 0x336   :  { %v4892_v3 = vpop.f32.mrf.mxu0 }
 0x337   :  { %v4283_v14 = vmax.f32 %v4084_v55, 0.0  ;;  %v4055_v55 = vadd.f32 %v10610_v22, %v10457_v40 }
 0x338   :  { %v4086_v12 = vpop.f32.mrf.mxu0 }
 0x339   :  { %v10596_v37 = vpop.f32.mrf.mxu1  ;;  %v4087_v50 = vadd.f32 %v10610_v22, %v4086_v12  ;;  %v4140_v12 = vadd.f32 %v10610_v22, %v10368_v63  ;;  %v10892_v63 = vld [vmem:[#allocation4_spill] sm:$0xff] }
 0x33a   :  { %v4893_v7 = vpop.f32.mrf.mxu0 }
 0x33b   :  { %v4940_v60 = vpop.f32.mrf.mxu1  ;;  %v4284_v3 = vmax.f32 %v4087_v50, 0.0  ;;  %v4299_v7 = vmax.f32 %v4148_v45, 0.0 }
 0x33c   :  { %v4135_v60 = vadd.f32 %v10610_v22, %v10294_v10  ;;  %v10893_v10 = vld [vmem:[#allocation34_spill] sm:$0xff] }
 0x33d   :  { %v10598_v41 = vpop.f32.mrf.mxu1 }
 0x33f   :  { %v4941_v52 = vpop.f32.mrf.mxu1 }
 0x350   :  { %v10603_v16 = vpop.f32.mrf.mxu1 }
 0x351   :  { %v4091_v39 = vpop.f32.mrf.mxu0 }
 0x352   :  { %v4944_v34 = vpop.f32.mrf.mxu1  ;;  %v4092_v62 = vadd.f32 %v10610_v22, %v4091_v39  ;;  %v4132_v39 = vadd.f32 %v10610_v22, %v10892_v63 }
 0x353   :  { %v4896_v54 = vpop.f32.mrf.mxu0  ;;  %v4297_v34 = vmax.f32 %v4140_v12, 0.0 }
 0x354   :  { %v10605_v32 = vpop.f32.mrf.mxu1  ;;  %v4285_v19 = vmax.f32 %v4092_v62, 0.0  ;;  %v4281_v54 = vmax.f32 %v4076_v26, 0.0 }
 0x355   :  { %v4094_v35 = vpop.f32.mrf.mxu0 }
 0x356   :  { %v4945_v49 = vpop.f32.mrf.mxu1  ;;  %v4095_v24 = vadd.f32 %v10610_v22, %v4094_v35 }
 0x357   :  { %v4897_v9 = vpop.f32.mrf.mxu0  ;;  %v4127_v49 = vadd.f32 %v10610_v22, %v10893_v10 }
 0x358   :  { %v4286_v33 = vmax.f32 %v4095_v24, 0.0  ;;  %v4296_v9 = vmax.f32 %v4135_v60, 0.0  ;;  %v4278_v24 = vmax.f32 %v4063_v38, 0.0  ;;  %v4276_v60 = vmax.f32 %v4055_v55, 0.0 }
 0x368   :  { %v4099_v1 = vpop.f32.mrf.mxu0 }
 0x369   :  { %v4100_v53 = vadd.f32 %v10610_v22, %v4099_v1  ;;  %v4280_v1 = vmax.f32 %v4071_v51, 0.0  ;;  %v4044_v51 = vadd.f32 %v10610_v22, %v10374_v59 }
 0x36a   :  { %v4900_v8 = vpop.f32.mrf.mxu0 }
 0x36b   :  { %v4287_v44 = vmax.f32 %v4100_v53, 0.0  ;;  %v4295_v53 = vmax.f32 %v4132_v39, 0.0 }
 0x36c   :  { %v4102_v17 = vpop.f32.mrf.mxu0 }
 0x36d   :  { %v4103_v18 = vadd.f32 %v10610_v22, %v4102_v17  ;;  %v10615_v46 = vpop.f32.mrf.mxu1  ;;  %v4124_v17 = vadd.f32 %v10610_v22, %v10894_v48 }
 0x36e   :  { %v4901_v5 = vpop.f32.mrf.mxu0 }
 0x36f   :  { %v4288_v58 = vmax.f32 %v4103_v18, 0.0  ;;  %v4948_v0 = vpop.f32.mrf.mxu1  ;;  %v4279_v18 = vmax.f32 %v4068_v6, 0.0  ;;  %v4294_v5 = vmax.f32 %v4127_v49, 0.0  ;;  %v4293_v36 = vmax.f32 %v4124_v17, 0.0  ;;  %v4327_v6 = vld [vmem:[%s10748_s3 + $0x28] sm:$0xff] }
 0x371   :  { %v10623_v13 = vpop.f32.mrf.mxu1  ;;  %4763 = vmatpush3.msra.mxu1 %v4288_v58  ;;  %v4277_v58 = vmax.f32 %v4060_v30, 0.0 }
 0x372   :  { %4764 = vmatprep.subr.mxu1 %v4303_v2 }
 0x373   :  { %v4949_v47 = vpop.f32.mrf.mxu1  ;;  %4765 = vmatpush3.msra.mxu1 %v4287_v44 }
 0x374   :  { %4766 = vmatprep.subr.mxu1 %v4302_v4 }
 0x375   :  { %4767 = vmatpush3.msra.mxu1 %v4286_v33 }
 0x376   :  { %4768 = vmatprep.subr.mxu1 %v4301_v21 }
 0x377   :  { %4769 = vmatpush3.msra.mxu1 %v4285_v19 }
 0x378   :  { %4770 = vmatprep.subr.mxu1 %v4300_v42 }
 0x379   :  { %4771 = vmatpush3.msra.mxu1 %v4284_v3  ;;  %v4052_v3 = vadd.f32 %v10610_v22, %v10447_v15 }
 0x37a   :  { %4772 = vmatprep.subr.mxu1 %v4299_v7 }
 0x37b   :  { %v10642_v52 = vpop.f32.mrf.mxu1  ;;  %4773 = vmatpush3.msra.mxu1 %v4283_v14  ;;  %v4047_v14 = vadd.f32 %v10610_v22, %v10394_v43  ;;  %v4324_v43 = vld [vmem:[%s10748_s3 + $0x10] sm:$0xff] }
 0x37c   :  { %4774 = vmatprep.subr.mxu1 %v4298_v57 }
 0x37d   :  { %v4952_v35 = vpop.f32.mrf.mxu1  ;;  %4775 = vmatpush3.msra.mxu1 %v4282_v31  ;;  %v4275_v31 = vmax.f32 %v4052_v3, 0.0  ;;  %v4274_v15 = vmax.f32 %v4047_v14, 0.0 }
 0x37e   :  { %4776 = vmatprep.subr.mxu1 %v4297_v34  ;;  %v4273_v34 = vmax.f32 %v4044_v51, 0.0 }
 0x37f   :  { %v10652_v8 = vpop.f32.mrf.mxu1  ;;  %4777 = vmatpush3.msra.mxu1 %v4281_v54 }
 0x380   :  { %4778 = vmatprep.subr.mxu1 %v4296_v9 }
 0x381   :  { %v4953_v28 = vpop.f32.mrf.mxu1  ;;  %4779 = vmatpush3.msra.mxu1 %v4280_v1 }
 0x382   :  { %4780 = vmatprep.subr.mxu1 %v4295_v53 }
 0x383   :  { %4781 = vmatpush3.msra.mxu1 %v4279_v18 }
 0x384   :  { %4782 = vmatprep.subr.mxu1 %v4294_v5 }
 0x385   :  { %4783 = vmatpush3.msra.mxu1 %v4278_v24 }
 0x386   :  { %4784 = vmatprep.subr.mxu1 %v4293_v36  ;;  %v4207_v36 = vadd.f32 %v10610_v22, %v10652_v8  ;;  %v4196_v8 = vadd.f32 %v10610_v22, %v10615_v46  ;;  %v4183_v46 = vadd.f32 %v10610_v22, %v10598_v41  ;;  %v4172_v41 = vadd.f32 %v10610_v22, %v10590_v23  ;;  %v4326_v23 = vld [vmem:[%s10748_s3 + $0x20] sm:$0xff] }
 0x387   :  { %4785 = vmatpush3.msra.mxu1 %v4277_v58 }
 0x390   :  { %v4107_v0 = vpop.f32.mrf.mxu0 }
 0x391   :  { %v4108_v57 = vadd.f32 %v10610_v22, %v4107_v0 }
 0x392   :  { %v4904_v27 = vpop.f32.mrf.mxu0 }
 0x393   :  { %v4289_v39 = vmax.f32 %v4108_v57, 0.0  ;;  %v4204_v27 = vadd.f32 %v10610_v22, %v10642_v52  ;;  %v4191_v52 = vadd.f32 %v10610_v22, %v10605_v32  ;;  %v4180_v32 = vadd.f32 %v10610_v22, %v10596_v37 }
 0x394   :  { %v4110_v2 = vpop.f32.mrf.mxu0 }
 0x395   :  { %v4211_v62 = vpop.f32.mrf.mxu1  ;;  %v4111_v7 = vadd.f32 %v10610_v22, %v4110_v2 }
 0x396   :  { %v4905_v44 = vpop.f32.mrf.mxu0  ;;  %v4212_v28 = vadd.f32 %v10610_v22, %v4211_v62  ;;  %v4199_v62 = vadd.f32 %v10610_v22, %v10623_v13  ;;  %v4188_v13 = vadd.f32 %v10610_v22, %v10603_v16  ;;  %v4175_v16 = vadd.f32 %v10610_v22, %v10594_v29 }
 0x397   :  { %v4956_v56 = vpop.f32.mrf.mxu1  ;;  %v4290_v63 = vmax.f32 %v4111_v7, 0.0 }
 0x398   :  { %v4315_v2 = vmax.f32 %v4212_v28, 0.0  ;;  %v4314_v56 = vmax.f32 %v4207_v36, 0.0  ;;  %v4306_v55 = vmax.f32 %v4175_v16, 0.0 }
 0x399   :  { %v4214_v25 = vpop.f32.mrf.mxu1 }
 0x39a   :  { %v4215_v53 = vadd.f32 %v10610_v22, %v4214_v25  ;;  %v4313_v25 = vmax.f32 %v4204_v27, 0.0 }
 0x39b   :  { %v4957_v4 = vpop.f32.mrf.mxu1 }
 0x39c   :  { %v4316_v58 = vmax.f32 %v4215_v53, 0.0  ;;  %v4312_v4 = vmax.f32 %v4199_v62, 0.0 }
 0x3ac   :  { %v4219_v50 = vpop.f32.mrf.mxu1 }
 0x3ad   :  { %v4115_v33 = vpop.f32.mrf.mxu0  ;;  %v4220_v48 = vadd.f32 %v10610_v22, %v4219_v50  ;;  %v4311_v50 = vmax.f32 %v4196_v8, 0.0 }
 0x3ae   :  { %v4960_v47 = vpop.f32.mrf.mxu1  ;;  %v4116_v61 = vadd.f32 %v10610_v22, %v4115_v33  ;;  %v4310_v33 = vmax.f32 %v4191_v52, 0.0 }
 0x3af   :  { %v4908_v45 = vpop.f32.mrf.mxu0  ;;  %v4317_v5 = vmax.f32 %v4220_v48, 0.0  ;;  %v4309_v47 = vmax.f32 %v4188_v13, 0.0 }
 0x3b0   :  { %v4222_v21 = vpop.f32.mrf.mxu1  ;;  %v4291_v40 = vmax.f32 %v4116_v61, 0.0  ;;  %v4308_v45 = vmax.f32 %v4183_v46, 0.0  ;;  %v6598_v61 = vld [vmem:[%s10749_s4] sm:$0xff]  }
 0x3b1   :  { %v4118_v19 = vpop.f32.mrf.mxu0  ;;  %v4223_v38 = vadd.f32 %v10610_v22, %v4222_v21  ;;  %v4307_v21 = vmax.f32 %v4180_v32, 0.0 }
 0x3b2   :  { %v4119_v42 = vadd.f32 %v10610_v22, %v4118_v19  ;;  %v4961_v11 = vpop.f32.mrf.mxu1  ;;  %v4305_v19 = vmax.f32 %v4172_v41, 0.0 }
 0x3b3   :  { %v4909_v12 = vpop.f32.mrf.mxu0  ;;  %v4318_v30 = vmax.f32 %v4223_v38, 0.0 }
 0x3b4   :  { %v4292_v26 = vmax.f32 %v4119_v42, 0.0 }
 0x3b6   :  { %4786 = vmatprep.subr.mxu1 %v4292_v26 }
 0x3b7   :  { %4787 = vmatpush3.msra.mxu1 %v4276_v60 }
 0x3b8   :  { %4788 = vmatprep.subr.mxu1 %v4291_v40 }
 0x3b9   :  { %4789 = vmatpush3.msra.mxu1 %v4275_v31 }
 0x3ba   :  { %4790 = vmatprep.subr.mxu1 %v4290_v63 }
 0x3bb   :  { %4791 = vmatpush3.msra.mxu1 %v4274_v15 }
 0x3bc   :  { %4792 = vmatprep.subr.mxu1 %v4289_v39 }
 0x3bd   :  { %v4227_v59 = vpop.f32.mrf.mxu1  ;;  %4793 = vmatpush3.msra.mxu1 %v4273_v34 }
 0x3be   :  { %4466 = vmatmul.mubr.f32.vlgmr.msra.gmra.mxu1 %v4324_v43  ;;  %4471 = vmatprep.subr.mxu1 %v10837_v20  ;;  %v4228_v10 = vadd.f32 %v10610_v22, %v4227_v59 }
 0x3bf   :  { %v4964_v54 = vpop.f32.mrf.mxu1  ;;  %4678 = vmatprep.mubr.msk.f32.mxu1 %vm3111_vm3, %v4327_v6 }
 0x3c0   :  { %v4319_v17 = vmax.f32 %v4228_v10, 0.0 }
 0x3c1   :  { %v4230_v35 = vpop.f32.mrf.mxu1 }
 0x3c2   :  { %v4231_v49 = vadd.f32 %v10610_v22, %v4230_v35 }
 0x3c3   :  { %v4965_v9 = vpop.f32.mrf.mxu1 }
 0x3c4   :  { %v4320_v1 = vmax.f32 %v4231_v49, 0.0 }
 0x3c6   :  { %4472 = vmatpush1.msra.mxu1 %v4320_v1 }
 0x3c7   :  { %4473 = vmatprep.subr.mxu1 %v10837_v20 }
 0x3c8   :  { %v4235_v18 = vpop.f32.mrf.mxu1  ;;  %4474 = vmatpush1.msra.mxu1 %v4319_v17 }
 0x3c9   :  { %4475 = vmatprep.subr.mxu1 %v10837_v20  ;;  %v4236_v37 = vadd.f32 %v10610_v22, %v4235_v18  ;;  %v6597_v22 = vld [vmem:[%s10749_s4 + $0x8] sm:$0xff]  }
 0x3ca   :  { %v4968_v24 = vpop.f32.mrf.mxu1  ;;  %4476 = vmatpush1.msra.mxu1 %v4318_v30 }
 0x3cb   :  { %4477 = vmatprep.subr.mxu1 %v10837_v20  ;;  %v4321_v29 = vmax.f32 %v4236_v37, 0.0 }
 0x3cc   :  { %v4238_v0 = vpop.f32.mrf.mxu1  ;;  %4478 = vmatpush1.msra.mxu1 %v4317_v5 }
 0x3cd   :  { %4479 = vmatprep.subr.mxu1 %v10837_v20 }
 0x3ce   :  { %v4969_v44 = vpop.f32.mrf.mxu1  ;;  %4480 = vmatpush1.msra.mxu1 %v4316_v58 }
 0x3cf   :  { %4481 = vmatprep.subr.mxu1 %v10837_v20 }
 0x3d0   :  { %4482 = vmatpush1.msra.mxu1 %v4315_v2  ;;  %v4759_v42 = vpop.f32.mrf.mxu1 }
 0x3d1   :  { %4483 = vmatprep.subr.mxu1 %v10837_v20 }
 0x3d2   :  { %4484 = vmatpush1.msra.mxu1 %v4314_v56  ;;  %v4760_v11 = vpop.f32.mrf.mxu1 }
 0x3d3   :  { %4485 = vmatprep.subr.mxu1 %v10837_v20  ;;  %v4761_v26 = vadd.f32 %v4760_v11, %v4759_v42 }
 0x3d4   :  { %4486 = vmatpush1.msra.mxu1 %v4313_v25 }
 0x3d5   :  { %4487 = vmatprep.subr.mxu1 %v10837_v20 }
 0x3d6   :  { %4488 = vmatpush1.msra.mxu1 %v4312_v4 }
 0x3d7   :  { %4489 = vmatprep.subr.mxu1 %v10837_v20 }
 0x3d8   :  { %4490 = vmatpush1.msra.mxu1 %v4311_v50 }
 0x3d9   :  { %4491 = vmatprep.subr.mxu1 %v10837_v20 }
 0x3da   :  { %4492 = vmatpush1.msra.mxu1 %v4310_v33 }
 0x3db   :  { %4493 = vmatprep.subr.mxu1 %v10837_v20 }
 0x3dc   :  { %4494 = vmatpush1.msra.mxu1 %v4309_v47 }
 0x3dd   :  { %4495 = vmatprep.subr.mxu1 %v10837_v20 }
 0x3de   :  { %4496 = vmatpush1.msra.mxu1 %v4308_v45 }
 0x3df   :  { %4497 = vmatprep.subr.mxu1 %v10837_v20 }
 0x3e0   :  { %4498 = vmatpush1.msra.mxu1 %v4307_v21 }
 0x3e1   :  { %4499 = vmatprep.subr.mxu1 %v10837_v20 }
 0x3e2   :  { %4500 = vmatpush1.msra.mxu1 %v4306_v55 }
 0x3e3   :  { %4501 = vmatprep.subr.mxu1 %v10837_v20 }
 0x3e4   :  { %4502 = vmatpush1.msra.mxu1 %v4305_v19 }
 0x3e5   :  { %4533 = vmatprep.subr.mxu1 %v10837_v20 }
 0x3e6   :  { %4534 = vmatpush2.msra.mxu1 %v4321_v29 }
 0x3e7   :  { %4536 = vmatmul.mubr.f32.vlgmr.msra.gmra.mxu1 %v4326_v23  ;;  %4970 = vmatprep.subr.bf16.mxu1 %v10837_v20 }
 0x3e8   :  { %4974 = vmatprep.mubr.msk.bf16.mxu1 %vm6611_vm1, %v10837_v20  ;;  %4971 = vmatpush3.bf16.msra.mxu1 %v6597_v22 }
 0x3e9   :  { %4972 = vmatprep.subr.bf16.mxu1 %v10837_v20  ;;  %v4679_v20 = vld [vmem:[%s10750_s5] ss:$0 sm:$0xff] }
 0x3ec   :  { %4973 = vmatpush3.bf16.msra.mxu1 %v6598_v61 }
 0x47e   :  { %v4794_v3 = vpop.f32.mrf.mxu1 }
 0x480   :  { %v4795_v12 = vpop.f32.mrf.mxu1 }
 0x481   :  { %v4796_v7 = vadd.f32 %v4795_v12, %v4794_v3 }
 0x483   :  { %v4468_v14 = vadd.f32 %v4796_v7, %v4761_v26 }
 0x4a7   :  { %v4537_v60 = vpop.f32.mrf.mxu1 }
 0x4a8   :  { %v4538_v57 = vadd.f32 %v4537_v60, %v4468_v14 }
 0x4a9   :  { %v4539_v40 = vpop.f32.mrf.mxu1 }
 0x4aa   :  { %v4541_v51 = vpack.c.bf16 %v4538_v57, %v4538_v57 }
 0x4ac   :  { %4975 = vmatmul.mubr.msk.bf16.vlgmr.msra.gmra.mxu1 %vm3603_vm9, %v4541_v51 }
 0x56c   :  { %v4602_v31 = vpop.f32.mrf.mxu1 }
 0x56d   :  { %v4603_v63 = vadd.f32 %v4679_v20, %v4602_v31 }
 0x56e   :  { %v4976_v15 = vpop.f32.mrf.mxu1 }
 0x56f   :  { %v4608_v39 = vmul.f32 %v4603_v63, %v4603_v63 }
 0x570   :  { %v4605_v34 = vpop.f32.mrf.mxu1 }
 0x571   :  { %v4609_v43 = vsel %vm3275_vm5, %v4608_v39, 0.0 }
 0x572   :  { %4610 = vadd.xlane.f32.xlu0 %v4609_v43  ;;  %v4977_v6 = vpop.f32.mrf.mxu1 }
 0x5fb   :  { %v4611_v59 = vpop.xlane.xlu0 %4610 }
 0x5fc   :  { %v4612_v54 = vmax.f32 %v4611_v59, 1e-24 }
 0x5fe   :  { %6599 = vrsqrt.f32 %v4612_v54 }
 0x60b   :  { %v6600_v35 = vpop.eup %6599 }
 0x60c   :  { %v4614_v10 = vmul.f32 %v6600_v35, %v4603_v63 }
 0x60e   :  { %4616 = vrot.lane.b32.xlu1 %v4614_v10, %s6615_s22 }
 0x612   :  { %4620 = vrot.lane.b32.xlu1 %v4603_v63, %s6615_s22 }
 0x680   :  { %v4617_v49 = vpop.permute.xlu1 %4616 }
 0x681   :  { %v4623_v9 = vsel %vm3603_vm9, %v4538_v57, %v4617_v49 }
 0x684   :  { %v4621_v38 = vpop.permute.xlu1 %4620 }
 0x685   :  { %v4625_v1 = vsel %vm4624_vm11, %v4623_v9, %v4621_v38 }
 0x686   :  { %v4627_v48 = vsel %vm4626_vm12, %v4625_v1, 0.0 }
 0x687   :  { %4628 = vst [vmem:[%s10751_s6] sm:$0xff] %v4627_v48 }

</bundles_post_ra>
